<compile_context>
chip_gen: v5e
topology: v5e:2x2
jax: 0.10.0
libtpu: 0.0.40
codegen_flags: <defaults>
</compile_context>

<pallas_src>
import jax
import jax.numpy as jnp
from jax.experimental import pallas as pl
from jax.experimental.pallas import tpu as pltpu


_PADW = 8                        # left zero margin in the conv scratch -> sublane-aligned interior store
_VMEM_LIMIT = 48 * 1024 * 1024   # budgeted for v7x (64 MiB physical VMEM) per perf review


def _divisor_tile(n, target):
    """Largest divisor of n that is <= min(n, target)."""
    t = min(n, target)
    while n % t:
        t -= 1
    return t


def _even_divisor_tile(n, target):
    """Largest even divisor of n that is <= min(n, target) (n must be even)."""
    t = min(n, target)
    t -= t % 2
    t = max(t, 2)
    while n % t:
        t -= 2
    return t


# --------------------------------------------------------------------------- #
# Kernels 1/2: [optional fused BN+ReLU prologue] -> 3x3 conv + bias -> BN stats #
# --------------------------------------------------------------------------- #

def _make_conv_kernel(apply_affine_relu):
    def kernel(x_ref, scale_ref, shift_ref, w_ref, b_ref,
               y_ref, sum_ref, sq_ref, apad_ref):
        # x_ref   : (H, W, Cin)    full image, resident across the row-tile grid axis
        # scale   : (1, Cin)       folded BN scale of the *previous* layer (ones for conv1)
        # shift   : (1, Cin)       folded BN shift of the previous layer (zeros for conv1)
        # w_ref   : (9*Cin, Cout)  conv weights, (dy,dx,ci) flattened into K
        # b_ref   : (1, Cout)
        # y_ref   : (TH, W, Cout)  pre-BN conv output row tile
        # sum_ref : (1, 1, Cout)   per-tile partial sum of y       (BN statistics)
        # sq_ref  : (1, 1, Cout)   per-tile partial sum of y*y
        # apad_ref: (H+2, W+2*_PADW, Cin) VMEM scratch: zero-padded (activated) input
        H, W, Cin = x_ref.shape
        TH, _, Cout = y_ref.shape
        h = pl.program_id(1)

        # Stage the (activated) input image into the zero-padded scratch once per
        # batch element.  This removes the wrapper-side jnp.pad HBM round trip and
        # fuses the previous layer's BN+ReLU into this kernel's prologue.
        @pl.when(h == 0)
        def _stage_input():
            apad_ref[...] = jnp.zeros(apad_ref.shape, apad_ref.dtype)
            a = x_ref[...].astype(jnp.float32)
            if apply_affine_relu:
                a = jnp.maximum(a * scale_ref[...].reshape(1, 1, Cin)
                                + shift_ref[...].reshape(1, 1, Cin), 0.0)
            # interior store starts at sublane offset _PADW (multiple of 8) -> aligned
            apad_ref[1:H + 1, _PADW:W + _PADW, :] = a

        # im2col: gather the 9 shifted taps for this row tile and run ONE MXU matmul
        # with K = 9*Cin instead of nine tiny K=Cin matmuls.
        r0 = h * TH
        taps = []
        for dy in range(3):
            for dx in range(3):
                taps.append(apad_ref[pl.ds(r0 + dy, TH),
                                     pl.ds(_PADW - 1 + dx, W), :])
        col = jnp.concatenate(taps, axis=-1).reshape(TH * W, 9 * Cin)
        acc = jnp.dot(col, w_ref[...], preferred_element_type=jnp.float32)
        acc = acc + b_ref[...]

        y_ref[...] = acc.reshape(TH, W, Cout)
        # BN statistics fused in the epilogue (no separate full re-read of y).
        sum_ref[...] = jnp.sum(acc, axis=0, keepdims=True).reshape(1, 1, Cout)
        sq_ref[...] = jnp.sum(acc * acc, axis=0, keepdims=True).reshape(1, 1, Cout)

    return kernel


def _conv_block(x, scale_prev, shift_prev, w, b, *, apply_affine_relu,
                row_tile_target=8):
    """3x3 same conv + bias (+ fused previous-layer BN+ReLU prologue).

    Returns (y, sum_partials, sumsq_partials); y is the pre-BN conv output.
    """
    N, H, W, Cin = x.shape
    Cout = w.shape[-1]
    TH = _divisor_tile(H, row_tile_target)
    n_h = H // TH
    w2d = w.reshape(9 * Cin, Cout)        # K index = (dy*3 + dx)*Cin + ci

    y, s, q = pl.pallas_call(
        _make_conv_kernel(apply_affine_relu),
        grid=(N, n_h),
        in_specs=[
            # full image resident per batch element (index constant across row tiles
            # -> DMA'd once per image, re-used by every row tile)
            pl.BlockSpec((None, H, W, Cin), lambda n, h: (n, 0, 0, 0)),
            pl.BlockSpec((1, Cin), lambda n, h: (0, 0)),
            pl.BlockSpec((1, Cin), lambda n, h: (0, 0)),
            pl.BlockSpec((9 * Cin, Cout), lambda n, h: (0, 0)),
            pl.BlockSpec((1, Cout), lambda n, h: (0, 0)),
        ],
        out_specs=[
            pl.BlockSpec((None, TH, W, Cout), lambda n, h: (n, h, 0, 0)),
            pl.BlockSpec((None, 1, 1, Cout), lambda n, h: (n, h, 0, 0)),
            pl.BlockSpec((None, 1, 1, Cout), lambda n, h: (n, h, 0, 0)),
        ],
        out_shape=[
            jax.ShapeDtypeStruct((N, H, W, Cout), jnp.float32),
            jax.ShapeDtypeStruct((N, n_h, 1, Cout), jnp.float32),
            jax.ShapeDtypeStruct((N, n_h, 1, Cout), jnp.float32),
        ],
        scratch_shapes=[
            pltpu.VMEM((H + 2, W + 2 * _PADW, Cin), jnp.float32),
        ],
        compiler_params=pltpu.CompilerParams(
            # batch axis parallel (uses both v7x TensorCores); the row axis is
            # "arbitrary" because the padded-input scratch filled at h==0 is
            # re-used by later row tiles of the same image.
            dimension_semantics=("parallel", "arbitrary"),
            vmem_limit_bytes=_VMEM_LIMIT,
        ),
    )(x, scale_prev, shift_prev, w2d, b.reshape(1, Cout))
    return y, s, q


# --------------------------------------------------------------------------- #
# Kernel 3: fused BN + ReLU + 2x2 max-pool                                      #
# --------------------------------------------------------------------------- #

def _bn_relu_pool_kernel(y_ref, scale_ref, shift_ref, feat_ref, pool_ref):
    # y_ref     : (TH, Wo, 2C)   horizontal pooling pair folded into the lane dim
    # scale/shift: (1, 2C)       folded BN2 params, tiled twice over lanes
    # feat_ref  : (TH, Wo, 2C)   normalized+activated features (== conv_features)
    # pool_ref  : (TH//2, Wo, C) 2x2 max-pooled output
    TH, Wo, C2 = y_ref.shape
    C = C2 // 2
    a = jnp.maximum(y_ref[...] * scale_ref[...].reshape(1, 1, C2)
                    + shift_ref[...].reshape(1, 1, C2), 0.0)
    feat_ref[...] = a
    wmax = jnp.maximum(a[:, :, :C], a[:, :, C:])                       # max over W pair
    pool_ref[...] = jnp.max(wmax.reshape(TH // 2, 2, Wo, C), axis=1)   # max over H pair


def _bn_relu_maxpool(y, scale, shift, *, row_tile_target=8):
    N, H, W, C = y.shape
    Ho, Wo = H // 2, W // 2
    TH = _even_divisor_tile(H, row_tile_target)
    n_h = H // TH

    # Free (layout-preserving) XLA reshape: fold the W pooling pair into lanes.
    y_il = y.reshape(N, H, Wo, 2 * C)
    scale_il = jnp.tile(scale.reshape(1, C), (1, 2))
    shift_il = jnp.tile(shift.reshape(1, C), (1, 2))

    feat_il, pooled = pl.pallas_call(
        _bn_relu_pool_kernel,
        grid=(N, n_h),
        in_specs=[
            pl.BlockSpec((None, TH, Wo, 2 * C), lambda n, h: (n, h, 0, 0)),
            pl.BlockSpec((1, 2 * C), lambda n, h: (0, 0)),
            pl.BlockSpec((1, 2 * C), lambda n, h: (0, 0)),
        ],
        out_specs=[
            pl.BlockSpec((None, TH, Wo, 2 * C), lambda n, h: (n, h, 0, 0)),
            pl.BlockSpec((None, TH // 2, Wo, C), lambda n, h: (n, h, 0, 0)),
        ],
        out_shape=[
            jax.ShapeDtypeStruct((N, H, Wo, 2 * C), jnp.float32),
            jax.ShapeDtypeStruct((N, Ho, Wo, C), jnp.float32),
        ],
        compiler_params=pltpu.CompilerParams(
            dimension_semantics=("parallel", "parallel"),
            vmem_limit_bytes=_VMEM_LIMIT,
        ),
    )(y_il, scale_il, shift_il)

    conv_features = feat_il.reshape(N, H, W, C)     # free reshape back to NHWC
    return pooled, conv_features


# --------------------------------------------------------------------------- #
# Forward pass                                                                  #
# --------------------------------------------------------------------------- #

def _fold_bn(sum_, sumsq, count, gamma, beta, eps):
    # training-mode BatchNorm (batch mean, biased variance) folded to scale/shift.
    mean = sum_ / count
    var = jnp.maximum(sumsq / count - mean * mean, 0.0)   # clamp: E[x^2]-E[x]^2 can dip < 0 in f32
    scale = gamma.reshape(1, -1) * jax.lax.rsqrt(var + eps)
    shift = beta.reshape(1, -1) - mean * scale
    return scale, shift


def down_forward(x_nchw, params, eps=1e-5):
    # NCHW (PyTorch) -> NHWC once at the module boundary.  When chaining Down blocks,
    # keep activations NHWC between blocks and hoist these transposes to the model edge.
    x = jnp.transpose(x_nchw, (0, 2, 3, 1)).astype(jnp.float32)
    N, H, W, Cin = x.shape
    assert H % 2 == 0 and W % 2 == 0, "pooling path assumes even H and W"
    # TODO(synk): odd H/W would need nn.MaxPool2d's floor semantics.

    ones_in = jnp.ones((1, Cin), jnp.float32)
    zeros_in = jnp.zeros((1, Cin), jnp.float32)
    cnt = float(N * H * W)

    # conv1 + bias (BN1 statistics fused into the epilogue)
    y1, s1, q1 = _conv_block(x, ones_in, zeros_in, params["w1"], params["b1"],
                             apply_affine_relu=False)
    scale1, shift1 = _fold_bn(jnp.sum(s1, axis=(0, 1)), jnp.sum(q1, axis=(0, 1)),
                              cnt, params["g1"], params["be1"], eps)

    # BN1 + ReLU fused as the prologue of conv2 (+ bias + BN2 statistics)
    y2, s2, q2 = _conv_block(y1, scale1, shift1, params["w2"], params["b2"],
                             apply_affine_relu=True)
    scale2, shift2 = _fold_bn(jnp.sum(s2, axis=(0, 1)), jnp.sum(q2, axis=(0, 1)),
                              cnt, params["g2"], params["be2"], eps)

    # BN2 + ReLU + 2x2 max-pool fused; emits conv_features and the pooled output.
    pooled, conv_features = _bn_relu_maxpool(y2, scale2, shift2)

    outputs = jnp.transpose(pooled, (0, 3, 1, 2))
    conv_features_nchw = jnp.transpose(conv_features, (0, 3, 1, 2))
    return outputs, conv_features_nchw


def init_params(key, in_channels, out_channels):
    k1, k2, k3, k4 = jax.random.split(key, 4)
    return dict(
        w1=jax.random.normal(k1, (3, 3, in_channels, out_channels), jnp.float32) * 0.1,
        b1=jax.random.normal(k2, (out_channels,), jnp.float32) * 0.1,
        g1=jnp.ones((out_channels,), jnp.float32),   # BatchNorm2d default init
        be1=jnp.zeros((out_channels,), jnp.float32),
        w2=jax.random.normal(k3, (3, 3, out_channels, out_channels), jnp.float32) * 0.1,
        b2=jax.random.normal(k4, (out_channels,), jnp.float32) * 0.1,
        g2=jnp.ones((out_channels,), jnp.float32),
        be2=jnp.zeros((out_channels,), jnp.float32),
    )


def _reference_down(x_nchw, params, eps=1e-5):
    """Pure-JAX reference matching the PyTorch module (training-mode BN)."""
    def conv_bn_relu(x, w, b, g, be):
        y = jax.lax.conv_general_dilated(
            x, w, window_strides=(1, 1), padding="SAME",
            dimension_numbers=("NHWC", "HWIO", "NHWC"),
            precision=jax.lax.Precision.HIGHEST)
        y = y + b.reshape(1, 1, 1, -1)
        mean = jnp.mean(y, axis=(0, 1, 2))
        var = jnp.mean((y - mean) ** 2, axis=(0, 1, 2))
        yhat = (y - mean) * jax.lax.rsqrt(var + eps)
        return jnp.maximum(yhat * g + be, 0.0)

    x = jnp.transpose(x_nchw, (0, 2, 3, 1)).astype(jnp.float32)
    h = conv_bn_relu(x, params["w1"], params["b1"], params["g1"], params["be1"])
    f = conv_bn_relu(h, params["w2"], params["b2"], params["g2"], params["be2"])
    N, H, W, C = f.shape
    p = jnp.max(f.reshape(N, H // 2, 2, W // 2, 2, C), axis=(2, 4))
    return jnp.transpose(p, (0, 3, 1, 2)), jnp.transpose(f, (0, 3, 1, 2))


if __name__ == "__main__":
    key = jax.random.PRNGKey(0)
    kx, kp = jax.random.split(key)

    N, Cin, Cout, H, W = 2, 4, 8, 16, 16
    x = jax.random.normal(kx, (N, Cin, H, W), jnp.float32)   # NCHW like PyTorch
    params = init_params(kp, Cin, Cout)

    outputs, conv_features = jax.jit(down_forward)(x, params)
    jax.block_until_ready((outputs, conv_features))

    assert outputs.shape == (N, Cout, H // 2, W // 2)
    assert conv_features.shape == (N, Cout, H, W)
    assert bool(jnp.all(jnp.isfinite(outputs))) and bool(jnp.all(jnp.isfinite(conv_features)))

    ref_out, ref_feat = _reference_down(x, params)
    err_out = float(jnp.max(jnp.abs(outputs - ref_out)))
    err_feat = float(jnp.max(jnp.abs(conv_features - ref_feat)))
    assert err_out < 2e-3 and err_feat < 2e-3, (err_out, err_feat)

    print("KERNEL_OK")
</pallas_src>

<mosaic_0001>
module attributes {stable_mosaic.version = 11 : i64} {
  func.func @kernel(%arg0: i32, %arg1: i32, %arg2: memref<1x16x16x4xf32, #tpu.memory_space<vmem>>, %arg3: memref<1x4xf32, #tpu.memory_space<vmem>>, %arg4: memref<1x4xf32, #tpu.memory_space<vmem>>, %arg5: memref<36x8xf32, #tpu.memory_space<vmem>>, %arg6: memref<1x8xf32, #tpu.memory_space<vmem>>, %arg7: memref<1x8x16x8xf32, #tpu.memory_space<vmem>>, %arg8: memref<1x1x1x8xf32, #tpu.memory_space<vmem>>, %arg9: memref<1x1x1x8xf32, #tpu.memory_space<vmem>>, %arg10: memref<18x32x4xf32, #tpu.memory_space<vmem>>) attributes {dimension_semantics = [#tpu.dimension_semantics<parallel>, #tpu.dimension_semantics<arbitrary>], iteration_bounds = array<i64: 2, 2>, scalar_prefetch = 0 : i64, scratch_operands = 1 : i64, tpu.core_type = #tpu.core_type<tc>, window_params = [{transform_indices = @transform_0, window_bounds = array<i64: 1, 16, 16, 4>}, {pipeline_mode = #tpu.pipeline_mode<synchronous>, transform_indices = @transform_1, window_bounds = array<i64: 1, 4>}, {pipeline_mode = #tpu.pipeline_mode<synchronous>, transform_indices = @transform_2, window_bounds = array<i64: 1, 4>}, {pipeline_mode = #tpu.pipeline_mode<synchronous>, transform_indices = @transform_3, window_bounds = array<i64: 36, 8>}, {pipeline_mode = #tpu.pipeline_mode<synchronous>, transform_indices = @transform_4, window_bounds = array<i64: 1, 8>}, {transform_indices = @transform_5, window_bounds = array<i64: 1, 8, 16, 8>}, {transform_indices = @transform_6, window_bounds = array<i64: 1, 1, 1, 8>}, {transform_indices = @transform_7, window_bounds = array<i64: 1, 1, 1, 8>}]} {
    %c0_i32 = arith.constant 0 : i32
    %0 = arith.cmpi eq, %arg1, %c0_i32 : i32
    %1 = arith.extui %0 : i1 to i32
    %c0_i32_0 = arith.constant 0 : i32
    %2 = arith.cmpi ne, %1, %c0_i32_0 : i32
    scf.if %2 {
      %cst_40 = arith.constant 0.000000e+00 : f32
      %55 = vector.broadcast %cst_40 : f32 to vector<18x32x4xf32>
      %c0_41 = arith.constant 0 : index
      %c0_42 = arith.constant 0 : index
      %c0_43 = arith.constant 0 : index
      %56 = vector.load %arg10[%c0_41, %c0_42, %c0_43] : memref<18x32x4xf32, #tpu.memory_space<vmem>>, vector<18x32x4xf32>
      tpu.vector_store %arg10[%c0_41, %c0_42, %c0_43], %55 {strides = array<i32>} : memref<18x32x4xf32, #tpu.memory_space<vmem>>, vector<18x32x4xf32>,
      %c0_44 = arith.constant 0 : index
      %c0_45 = arith.constant 0 : index
      %c0_46 = arith.constant 0 : index
      %c0_47 = arith.constant 0 : index
      %57 = vector.load %arg2[%c0_44, %c0_45, %c0_46, %c0_47] : memref<1x16x16x4xf32, #tpu.memory_space<vmem>>, vector<1x16x16x4xf32>
      %58 = vector.shape_cast %57 : vector<1x16x16x4xf32> to vector<16x16x4xf32>
      %c1 = arith.constant 1 : index
      %c8_48 = arith.constant 8 : index
      %c0_49 = arith.constant 0 : index
      %59 = vector.load %arg10[%c1, %c8_48, %c0_49] : memref<18x32x4xf32, #tpu.memory_space<vmem>>, vector<16x16x4xf32>
      tpu.vector_store %arg10[%c1, %c8_48, %c0_49], %58 {strides = array<i32>} : memref<18x32x4xf32, #tpu.memory_space<vmem>>, vector<16x16x4xf32>,
    } else {
    }
    %c8_i32 = arith.constant 8 : i32
    %3 = arith.muli %arg1, %c8_i32 : i32
    %c0_i32_1 = arith.constant 0 : i32
    %4 = arith.addi %3, %c0_i32_1 : i32
    %5 = arith.index_cast %4 : i32 to index
    %c7 = arith.constant 7 : index
    %c0 = arith.constant 0 : index
    %6 = vector.load %arg10[%5, %c7, %c0] : memref<18x32x4xf32, #tpu.memory_space<vmem>>, vector<8x16x4xf32>
    %c0_i32_2 = arith.constant 0 : i32
    %7 = arith.addi %3, %c0_i32_2 : i32
    %8 = arith.index_cast %7 : i32 to index
    %c8 = arith.constant 8 : index
    %c0_3 = arith.constant 0 : index
    %9 = vector.load %arg10[%8, %c8, %c0_3] : memref<18x32x4xf32, #tpu.memory_space<vmem>>, vector<8x16x4xf32>
    %c0_i32_4 = arith.constant 0 : i32
    %10 = arith.addi %3, %c0_i32_4 : i32
    %11 = arith.index_cast %10 : i32 to index
    %c9 = arith.constant 9 : index
    %c0_5 = arith.constant 0 : index
    %12 = vector.load %arg10[%11, %c9, %c0_5] : memref<18x32x4xf32, #tpu.memory_space<vmem>>, vector<8x16x4xf32>
    %c1_i32 = arith.constant 1 : i32
    %13 = arith.addi %3, %c1_i32 : i32
    %14 = arith.index_cast %13 : i32 to index
    %c7_6 = arith.constant 7 : index
    %c0_7 = arith.constant 0 : index
    %15 = vector.load %arg10[%14, %c7_6, %c0_7] : memref<18x32x4xf32, #tpu.memory_space<vmem>>, vector<8x16x4xf32>
    %c1_i32_8 = arith.constant 1 : i32
    %16 = arith.addi %3, %c1_i32_8 : i32
    %17 = arith.index_cast %16 : i32 to index
    %c8_9 = arith.constant 8 : index
    %c0_10 = arith.constant 0 : index
    %18 = vector.load %arg10[%17, %c8_9, %c0_10] : memref<18x32x4xf32, #tpu.memory_space<vmem>>, vector<8x16x4xf32>
    %c1_i32_11 = arith.constant 1 : i32
    %19 = arith.addi %3, %c1_i32_11 : i32
    %20 = arith.index_cast %19 : i32 to index
    %c9_12 = arith.constant 9 : index
    %c0_13 = arith.constant 0 : index
    %21 = vector.load %arg10[%20, %c9_12, %c0_13] : memref<18x32x4xf32, #tpu.memory_space<vmem>>, vector<8x16x4xf32>
    %c2_i32 = arith.constant 2 : i32
    %22 = arith.addi %3, %c2_i32 : i32
    %23 = arith.index_cast %22 : i32 to index
    %c7_14 = arith.constant 7 : index
    %c0_15 = arith.constant 0 : index
    %24 = vector.load %arg10[%23, %c7_14, %c0_15] : memref<18x32x4xf32, #tpu.memory_space<vmem>>, vector<8x16x4xf32>
    %c2_i32_16 = arith.constant 2 : i32
    %25 = arith.addi %3, %c2_i32_16 : i32
    %26 = arith.index_cast %25 : i32 to index
    %c8_17 = arith.constant 8 : index
    %c0_18 = arith.constant 0 : index
    %27 = vector.load %arg10[%26, %c8_17, %c0_18] : memref<18x32x4xf32, #tpu.memory_space<vmem>>, vector<8x16x4xf32>
    %c2_i32_19 = arith.constant 2 : i32
    %28 = arith.addi %3, %c2_i32_19 : i32
    %29 = arith.index_cast %28 : i32 to index
    %c9_20 = arith.constant 9 : index
    %c0_21 = arith.constant 0 : index
    %30 = vector.load %arg10[%29, %c9_20, %c0_21] : memref<18x32x4xf32, #tpu.memory_space<vmem>>, vector<8x16x4xf32>
    %31 = tpu.concatenate %6, %9, %12, %15, %18, %21, %24, %27, %30 in 2 : vector<8x16x4xf32>, vector<8x16x4xf32>, vector<8x16x4xf32>, vector<8x16x4xf32>, vector<8x16x4xf32>, vector<8x16x4xf32>, vector<8x16x4xf32>, vector<8x16x4xf32>, vector<8x16x4xf32> -> vector<8x16x36xf32>
    %32 = vector.shape_cast %31 : vector<8x16x36xf32> to vector<128x36xf32>
    %c0_22 = arith.constant 0 : index
    %c0_23 = arith.constant 0 : index
    %33 = vector.load %arg5[%c0_22, %c0_23] : memref<36x8xf32, #tpu.memory_space<vmem>>, vector<36x8xf32>
    %cst = arith.constant dense<0.000000e+00> : vector<128x8xf32>
    %34 = tpu.matmul %32, %33, %cst {dimension_numbers = #tpu.dot_dimension_numbers<[1], [0], [0], [1], [0, 0, 1, 1], [], []>} : vector<128x36xf32>, vector<36x8xf32>, vector<128x8xf32> -> vector<128x8xf32>
    %c0_24 = arith.constant 0 : index
    %c0_25 = arith.constant 0 : index
    %35 = vector.load %arg6[%c0_24, %c0_25] : memref<1x8xf32, #tpu.memory_space<vmem>>, vector<1x8xf32>
    %36 = vector.broadcast %35 : vector<1x8xf32> to vector<128x8xf32>
    %37 = arith.addf %34, %36 : vector<128x8xf32>
    %38 = vector.shape_cast %37 : vector<128x8xf32> to vector<8x16x8xf32>
    %c0_26 = arith.constant 0 : index
    %c0_27 = arith.constant 0 : index
    %c0_28 = arith.constant 0 : index
    %c0_29 = arith.constant 0 : index
    %39 = vector.load %arg7[%c0_26, %c0_27, %c0_28, %c0_29] : memref<1x8x16x8xf32, #tpu.memory_space<vmem>>, vector<1x8x16x8xf32>
    %40 = vector.shape_cast %39 : vector<1x8x16x8xf32> to vector<8x16x8xf32>
    %41 = vector.shape_cast %38 : vector<8x16x8xf32> to vector<1x8x16x8xf32>
    tpu.vector_store %arg7[%c0_26, %c0_27, %c0_28, %c0_29], %41 {strides = array<i32>} : memref<1x8x16x8xf32, #tpu.memory_space<vmem>>, vector<1x8x16x8xf32>,
    %cst_30 = arith.constant dense<0.000000e+00> : vector<8xf32>
    %42 = vector.multi_reduction <add>, %37, %cst_30 [0] : vector<128x8xf32> to vector<8xf32>
    %43 = vector.shape_cast %42 : vector<8xf32> to vector<1x8xf32>
    %44 = vector.shape_cast %43 : vector<1x8xf32> to vector<1x1x8xf32>
    %c0_31 = arith.constant 0 : index
    %c0_32 = arith.constant 0 : index
    %c0_33 = arith.constant 0 : index
    %c0_34 = arith.constant 0 : index
    %45 = vector.load %arg8[%c0_31, %c0_32, %c0_33, %c0_34] : memref<1x1x1x8xf32, #tpu.memory_space<vmem>>, vector<1x1x1x8xf32>
    %46 = vector.shape_cast %45 : vector<1x1x1x8xf32> to vector<1x1x8xf32>
    %47 = vector.shape_cast %44 : vector<1x1x8xf32> to vector<1x1x1x8xf32>
    tpu.vector_store %arg8[%c0_31, %c0_32, %c0_33, %c0_34], %47 {strides = array<i32>} : memref<1x1x1x8xf32, #tpu.memory_space<vmem>>, vector<1x1x1x8xf32>,
    %48 = arith.mulf %37, %37 : vector<128x8xf32>
    %cst_35 = arith.constant dense<0.000000e+00> : vector<8xf32>
    %49 = vector.multi_reduction <add>, %48, %cst_35 [0] : vector<128x8xf32> to vector<8xf32>
    %50 = vector.shape_cast %49 : vector<8xf32> to vector<1x8xf32>
    %51 = vector.shape_cast %50 : vector<1x8xf32> to vector<1x1x8xf32>
    %c0_36 = arith.constant 0 : index
    %c0_37 = arith.constant 0 : index
    %c0_38 = arith.constant 0 : index
    %c0_39 = arith.constant 0 : index
    %52 = vector.load %arg9[%c0_36, %c0_37, %c0_38, %c0_39] : memref<1x1x1x8xf32, #tpu.memory_space<vmem>>, vector<1x1x1x8xf32>
    %53 = vector.shape_cast %52 : vector<1x1x1x8xf32> to vector<1x1x8xf32>
    %54 = vector.shape_cast %51 : vector<1x1x8xf32> to vector<1x1x1x8xf32>
    tpu.vector_store %arg9[%c0_36, %c0_37, %c0_38, %c0_39], %54 {strides = array<i32>} : memref<1x1x1x8xf32, #tpu.memory_space<vmem>>, vector<1x1x1x8xf32>,
    return
  }
  func.func @transform_0(%arg0: i32, %arg1: i32) -> (i32, i32, i32, i32) {
    %c0_i32 = arith.constant 0 : i32
    %c0_i32_0 = arith.constant 0 : i32
    %c0_i32_1 = arith.constant 0 : i32
    %c0_i32_2 = arith.constant 0 : i32
    return %arg0, %c0_i32, %c0_i32_0, %c0_i32_1 : i32, i32, i32, i32
  }
  func.func @transform_1(%arg0: i32, %arg1: i32) -> (i32, i32) {
    %c0_i32 = arith.constant 0 : i32
    %c0_i32_0 = arith.constant 0 : i32
    %c0_i32_1 = arith.constant 0 : i32
    return %c0_i32, %c0_i32_0 : i32, i32
  }
  func.func @transform_2(%arg0: i32, %arg1: i32) -> (i32, i32) {
    %c0_i32 = arith.constant 0 : i32
    %c0_i32_0 = arith.constant 0 : i32
    %c0_i32_1 = arith.constant 0 : i32
    return %c0_i32, %c0_i32_0 : i32, i32
  }
  func.func @transform_3(%arg0: i32, %arg1: i32) -> (i32, i32) {
    %c0_i32 = arith.constant 0 : i32
    %c0_i32_0 = arith.constant 0 : i32
    %c0_i32_1 = arith.constant 0 : i32
    return %c0_i32, %c0_i32_0 : i32, i32
  }
  func.func @transform_4(%arg0: i32, %arg1: i32) -> (i32, i32) {
    %c0_i32 = arith.constant 0 : i32
    %c0_i32_0 = arith.constant 0 : i32
    %c0_i32_1 = arith.constant 0 : i32
    return %c0_i32, %c0_i32_0 : i32, i32
  }
  func.func @transform_5(%arg0: i32, %arg1: i32) -> (i32, i32, i32, i32) {
    %c0_i32 = arith.constant 0 : i32
    %c0_i32_0 = arith.constant 0 : i32
    %c0_i32_1 = arith.constant 0 : i32
    return %arg0, %arg1, %c0_i32, %c0_i32_0 : i32, i32, i32, i32
  }
  func.func @transform_6(%arg0: i32, %arg1: i32) -> (i32, i32, i32, i32) {
    %c0_i32 = arith.constant 0 : i32
    %c0_i32_0 = arith.constant 0 : i32
    %c0_i32_1 = arith.constant 0 : i32
    return %arg0, %arg1, %c0_i32, %c0_i32_0 : i32, i32, i32, i32
  }
  func.func @transform_7(%arg0: i32, %arg1: i32) -> (i32, i32, i32, i32) {
    %c0_i32 = arith.constant 0 : i32
    %c0_i32_0 = arith.constant 0 : i32
    %c0_i32_1 = arith.constant 0 : i32
    return %arg0, %arg1, %c0_i32, %c0_i32_0 : i32, i32, i32, i32
  }
}

module attributes {stable_mosaic.version = 11 : i64} {
  func.func @kernel(%arg0: i32, %arg1: i32, %arg2: memref<1x16x16x8xf32, #tpu.memory_space<vmem>>, %arg3: memref<1x8xf32, #tpu.memory_space<vmem>>, %arg4: memref<1x8xf32, #tpu.memory_space<vmem>>, %arg5: memref<72x8xf32, #tpu.memory_space<vmem>>, %arg6: memref<1x8xf32, #tpu.memory_space<vmem>>, %arg7: memref<1x8x16x8xf32, #tpu.memory_space<vmem>>, %arg8: memref<1x1x1x8xf32, #tpu.memory_space<vmem>>, %arg9: memref<1x1x1x8xf32, #tpu.memory_space<vmem>>, %arg10: memref<18x32x8xf32, #tpu.memory_space<vmem>>) attributes {dimension_semantics = [#tpu.dimension_semantics<parallel>, #tpu.dimension_semantics<arbitrary>], iteration_bounds = array<i64: 2, 2>, scalar_prefetch = 0 : i64, scratch_operands = 1 : i64, tpu.core_type = #tpu.core_type<tc>, window_params = [{transform_indices = @transform_0, window_bounds = array<i64: 1, 16, 16, 8>}, {pipeline_mode = #tpu.pipeline_mode<synchronous>, transform_indices = @transform_1, window_bounds = array<i64: 1, 8>}, {pipeline_mode = #tpu.pipeline_mode<synchronous>, transform_indices = @transform_2, window_bounds = array<i64: 1, 8>}, {pipeline_mode = #tpu.pipeline_mode<synchronous>, transform_indices = @transform_3, window_bounds = array<i64: 72, 8>}, {pipeline_mode = #tpu.pipeline_mode<synchronous>, transform_indices = @transform_4, window_bounds = array<i64: 1, 8>}, {transform_indices = @transform_5, window_bounds = array<i64: 1, 8, 16, 8>}, {transform_indices = @transform_6, window_bounds = array<i64: 1, 1, 1, 8>}, {transform_indices = @transform_7, window_bounds = array<i64: 1, 1, 1, 8>}]} {
    %c0_i32 = arith.constant 0 : i32
    %0 = arith.cmpi eq, %arg1, %c0_i32 : i32
    %1 = arith.extui %0 : i1 to i32
    %c0_i32_0 = arith.constant 0 : i32
    %2 = arith.cmpi ne, %1, %c0_i32_0 : i32
    scf.if %2 {
      %cst_40 = arith.constant 0.000000e+00 : f32
      %55 = vector.broadcast %cst_40 : f32 to vector<18x32x8xf32>
      %c0_41 = arith.constant 0 : index
      %c0_42 = arith.constant 0 : index
      %c0_43 = arith.constant 0 : index
      %56 = vector.load %arg10[%c0_41, %c0_42, %c0_43] : memref<18x32x8xf32, #tpu.memory_space<vmem>>, vector<18x32x8xf32>
      tpu.vector_store %arg10[%c0_41, %c0_42, %c0_43], %55 {strides = array<i32>} : memref<18x32x8xf32, #tpu.memory_space<vmem>>, vector<18x32x8xf32>,
      %c0_44 = arith.constant 0 : index
      %c0_45 = arith.constant 0 : index
      %c0_46 = arith.constant 0 : index
      %c0_47 = arith.constant 0 : index
      %57 = vector.load %arg2[%c0_44, %c0_45, %c0_46, %c0_47] : memref<1x16x16x8xf32, #tpu.memory_space<vmem>>, vector<1x16x16x8xf32>
      %58 = vector.shape_cast %57 : vector<1x16x16x8xf32> to vector<16x16x8xf32>
      %c0_48 = arith.constant 0 : index
      %c0_49 = arith.constant 0 : index
      %59 = vector.load %arg3[%c0_48, %c0_49] : memref<1x8xf32, #tpu.memory_space<vmem>>, vector<1x8xf32>
      %60 = vector.shape_cast %59 : vector<1x8xf32> to vector<1x1x8xf32>
      %61 = vector.broadcast %60 : vector<1x1x8xf32> to vector<16x16x8xf32>
      %62 = arith.mulf %58, %61 : vector<16x16x8xf32>
      %c0_50 = arith.constant 0 : index
      %c0_51 = arith.constant 0 : index
      %63 = vector.load %arg4[%c0_50, %c0_51] : memref<1x8xf32, #tpu.memory_space<vmem>>, vector<1x8xf32>
      %64 = vector.shape_cast %63 : vector<1x8xf32> to vector<1x1x8xf32>
      %65 = vector.broadcast %64 : vector<1x1x8xf32> to vector<16x16x8xf32>
      %66 = arith.addf %62, %65 : vector<16x16x8xf32>
      %cst_52 = arith.constant 0.000000e+00 : f32
      %67 = vector.broadcast %cst_52 : f32 to vector<16x16x8xf32>
      %68 = arith.maximumf %66, %67 : vector<16x16x8xf32>
      %c1 = arith.constant 1 : index
      %c8_53 = arith.constant 8 : index
      %c0_54 = arith.constant 0 : index
      %69 = vector.load %arg10[%c1, %c8_53, %c0_54] : memref<18x32x8xf32, #tpu.memory_space<vmem>>, vector<16x16x8xf32>
      tpu.vector_store %arg10[%c1, %c8_53, %c0_54], %68 {strides = array<i32>} : memref<18x32x8xf32, #tpu.memory_space<vmem>>, vector<16x16x8xf32>,
    } else {
    }
    %c8_i32 = arith.constant 8 : i32
    %3 = arith.muli %arg1, %c8_i32 : i32
    %c0_i32_1 = arith.constant 0 : i32
    %4 = arith.addi %3, %c0_i32_1 : i32
    %5 = arith.index_cast %4 : i32 to index
    %c7 = arith.constant 7 : index
    %c0 = arith.constant 0 : index
    %6 = vector.load %arg10[%5, %c7, %c0] : memref<18x32x8xf32, #tpu.memory_space<vmem>>, vector<8x16x8xf32>
    %c0_i32_2 = arith.constant 0 : i32
    %7 = arith.addi %3, %c0_i32_2 : i32
    %8 = arith.index_cast %7 : i32 to index
    %c8 = arith.constant 8 : index
    %c0_3 = arith.constant 0 : index
    %9 = vector.load %arg10[%8, %c8, %c0_3] : memref<18x32x8xf32, #tpu.memory_space<vmem>>, vector<8x16x8xf32>
    %c0_i32_4 = arith.constant 0 : i32
    %10 = arith.addi %3, %c0_i32_4 : i32
    %11 = arith.index_cast %10 : i32 to index
    %c9 = arith.constant 9 : index
    %c0_5 = arith.constant 0 : index
    %12 = vector.load %arg10[%11, %c9, %c0_5] : memref<18x32x8xf32, #tpu.memory_space<vmem>>, vector<8x16x8xf32>
    %c1_i32 = arith.constant 1 : i32
    %13 = arith.addi %3, %c1_i32 : i32
    %14 = arith.index_cast %13 : i32 to index
    %c7_6 = arith.constant 7 : index
    %c0_7 = arith.constant 0 : index
    %15 = vector.load %arg10[%14, %c7_6, %c0_7] : memref<18x32x8xf32, #tpu.memory_space<vmem>>, vector<8x16x8xf32>
    %c1_i32_8 = arith.constant 1 : i32
    %16 = arith.addi %3, %c1_i32_8 : i32
    %17 = arith.index_cast %16 : i32 to index
    %c8_9 = arith.constant 8 : index
    %c0_10 = arith.constant 0 : index
    %18 = vector.load %arg10[%17, %c8_9, %c0_10] : memref<18x32x8xf32, #tpu.memory_space<vmem>>, vector<8x16x8xf32>
    %c1_i32_11 = arith.constant 1 : i32
    %19 = arith.addi %3, %c1_i32_11 : i32
    %20 = arith.index_cast %19 : i32 to index
    %c9_12 = arith.constant 9 : index
    %c0_13 = arith.constant 0 : index
    %21 = vector.load %arg10[%20, %c9_12, %c0_13] : memref<18x32x8xf32, #tpu.memory_space<vmem>>, vector<8x16x8xf32>
    %c2_i32 = arith.constant 2 : i32
    %22 = arith.addi %3, %c2_i32 : i32
    %23 = arith.index_cast %22 : i32 to index
    %c7_14 = arith.constant 7 : index
    %c0_15 = arith.constant 0 : index
    %24 = vector.load %arg10[%23, %c7_14, %c0_15] : memref<18x32x8xf32, #tpu.memory_space<vmem>>, vector<8x16x8xf32>
    %c2_i32_16 = arith.constant 2 : i32
    %25 = arith.addi %3, %c2_i32_16 : i32
    %26 = arith.index_cast %25 : i32 to index
    %c8_17 = arith.constant 8 : index
    %c0_18 = arith.constant 0 : index
    %27 = vector.load %arg10[%26, %c8_17, %c0_18] : memref<18x32x8xf32, #tpu.memory_space<vmem>>, vector<8x16x8xf32>
    %c2_i32_19 = arith.constant 2 : i32
    %28 = arith.addi %3, %c2_i32_19 : i32
    %29 = arith.index_cast %28 : i32 to index
    %c9_20 = arith.constant 9 : index
    %c0_21 = arith.constant 0 : index
    %30 = vector.load %arg10[%29, %c9_20, %c0_21] : memref<18x32x8xf32, #tpu.memory_space<vmem>>, vector<8x16x8xf32>
    %31 = tpu.concatenate %6, %9, %12, %15, %18, %21, %24, %27, %30 in 2 : vector<8x16x8xf32>, vector<8x16x8xf32>, vector<8x16x8xf32>, vector<8x16x8xf32>, vector<8x16x8xf32>, vector<8x16x8xf32>, vector<8x16x8xf32>, vector<8x16x8xf32>, vector<8x16x8xf32> -> vector<8x16x72xf32>
    %32 = vector.shape_cast %31 : vector<8x16x72xf32> to vector<128x72xf32>
    %c0_22 = arith.constant 0 : index
    %c0_23 = arith.constant 0 : index
    %33 = vector.load %arg5[%c0_22, %c0_23] : memref<72x8xf32, #tpu.memory_space<vmem>>, vector<72x8xf32>
    %cst = arith.constant dense<0.000000e+00> : vector<128x8xf32>
    %34 = tpu.matmul %32, %33, %cst {dimension_numbers = #tpu.dot_dimension_numbers<[1], [0], [0], [1], [0, 0, 1, 1], [], []>} : vector<128x72xf32>, vector<72x8xf32>, vector<128x8xf32> -> vector<128x8xf32>
    %c0_24 = arith.constant 0 : index
    %c0_25 = arith.constant 0 : index
    %35 = vector.load %arg6[%c0_24, %c0_25] : memref<1x8xf32, #tpu.memory_space<vmem>>, vector<1x8xf32>
    %36 = vector.broadcast %35 : vector<1x8xf32> to vector<128x8xf32>
    %37 = arith.addf %34, %36 : vector<128x8xf32>
    %38 = vector.shape_cast %37 : vector<128x8xf32> to vector<8x16x8xf32>
    %c0_26 = arith.constant 0 : index
    %c0_27 = arith.constant 0 : index
    %c0_28 = arith.constant 0 : index
    %c0_29 = arith.constant 0 : index
    %39 = vector.load %arg7[%c0_26, %c0_27, %c0_28, %c0_29] : memref<1x8x16x8xf32, #tpu.memory_space<vmem>>, vector<1x8x16x8xf32>
    %40 = vector.shape_cast %39 : vector<1x8x16x8xf32> to vector<8x16x8xf32>
    %41 = vector.shape_cast %38 : vector<8x16x8xf32> to vector<1x8x16x8xf32>
    tpu.vector_store %arg7[%c0_26, %c0_27, %c0_28, %c0_29], %41 {strides = array<i32>} : memref<1x8x16x8xf32, #tpu.memory_space<vmem>>, vector<1x8x16x8xf32>,
    %cst_30 = arith.constant dense<0.000000e+00> : vector<8xf32>
    %42 = vector.multi_reduction <add>, %37, %cst_30 [0] : vector<128x8xf32> to vector<8xf32>
    %43 = vector.shape_cast %42 : vector<8xf32> to vector<1x8xf32>
    %44 = vector.shape_cast %43 : vector<1x8xf32> to vector<1x1x8xf32>
    %c0_31 = arith.constant 0 : index
    %c0_32 = arith.constant 0 : index
    %c0_33 = arith.constant 0 : index
    %c0_34 = arith.constant 0 : index
    %45 = vector.load %arg8[%c0_31, %c0_32, %c0_33, %c0_34] : memref<1x1x1x8xf32, #tpu.memory_space<vmem>>, vector<1x1x1x8xf32>
    %46 = vector.shape_cast %45 : vector<1x1x1x8xf32> to vector<1x1x8xf32>
    %47 = vector.shape_cast %44 : vector<1x1x8xf32> to vector<1x1x1x8xf32>
    tpu.vector_store %arg8[%c0_31, %c0_32, %c0_33, %c0_34], %47 {strides = array<i32>} : memref<1x1x1x8xf32, #tpu.memory_space<vmem>>, vector<1x1x1x8xf32>,
    %48 = arith.mulf %37, %37 : vector<128x8xf32>
    %cst_35 = arith.constant dense<0.000000e+00> : vector<8xf32>
    %49 = vector.multi_reduction <add>, %48, %cst_35 [0] : vector<128x8xf32> to vector<8xf32>
    %50 = vector.shape_cast %49 : vector<8xf32> to vector<1x8xf32>
    %51 = vector.shape_cast %50 : vector<1x8xf32> to vector<1x1x8xf32>
    %c0_36 = arith.constant 0 : index
    %c0_37 = arith.constant 0 : index
    %c0_38 = arith.constant 0 : index
    %c0_39 = arith.constant 0 : index
    %52 = vector.load %arg9[%c0_36, %c0_37, %c0_38, %c0_39] : memref<1x1x1x8xf32, #tpu.memory_space<vmem>>, vector<1x1x1x8xf32>
    %53 = vector.shape_cast %52 : vector<1x1x1x8xf32> to vector<1x1x8xf32>
    %54 = vector.shape_cast %51 : vector<1x1x8xf32> to vector<1x1x1x8xf32>
    tpu.vector_store %arg9[%c0_36, %c0_37, %c0_38, %c0_39], %54 {strides = array<i32>} : memref<1x1x1x8xf32, #tpu.memory_space<vmem>>, vector<1x1x1x8xf32>,
    return
  }
  func.func @transform_0(%arg0: i32, %arg1: i32) -> (i32, i32, i32, i32) {
    %c0_i32 = arith.constant 0 : i32
    %c0_i32_0 = arith.constant 0 : i32
    %c0_i32_1 = arith.constant 0 : i32
    %c0_i32_2 = arith.constant 0 : i32
    return %arg0, %c0_i32, %c0_i32_0, %c0_i32_1 : i32, i32, i32, i32
  }
  func.func @transform_1(%arg0: i32, %arg1: i32) -> (i32, i32) {
    %c0_i32 = arith.constant 0 : i32
    %c0_i32_0 = arith.constant 0 : i32
    %c0_i32_1 = arith.constant 0 : i32
    return %c0_i32, %c0_i32_0 : i32, i32
  }
  func.func @transform_2(%arg0: i32, %arg1: i32) -> (i32, i32) {
    %c0_i32 = arith.constant 0 : i32
    %c0_i32_0 = arith.constant 0 : i32
    %c0_i32_1 = arith.constant 0 : i32
    return %c0_i32, %c0_i32_0 : i32, i32
  }
  func.func @transform_3(%arg0: i32, %arg1: i32) -> (i32, i32) {
    %c0_i32 = arith.constant 0 : i32
    %c0_i32_0 = arith.constant 0 : i32
    %c0_i32_1 = arith.constant 0 : i32
    return %c0_i32, %c0_i32_0 : i32, i32
  }
  func.func @transform_4(%arg0: i32, %arg1: i32) -> (i32, i32) {
    %c0_i32 = arith.constant 0 : i32
    %c0_i32_0 = arith.constant 0 : i32
    %c0_i32_1 = arith.constant 0 : i32
    return %c0_i32, %c0_i32_0 : i32, i32
  }
  func.func @transform_5(%arg0: i32, %arg1: i32) -> (i32, i32, i32, i32) {
    %c0_i32 = arith.constant 0 : i32
    %c0_i32_0 = arith.constant 0 : i32
    %c0_i32_1 = arith.constant 0 : i32
    return %arg0, %arg1, %c0_i32, %c0_i32_0 : i32, i32, i32, i32
  }
  func.func @transform_6(%arg0: i32, %arg1: i32) -> (i32, i32, i32, i32) {
    %c0_i32 = arith.constant 0 : i32
    %c0_i32_0 = arith.constant 0 : i32
    %c0_i32_1 = arith.constant 0 : i32
    return %arg0, %arg1, %c0_i32, %c0_i32_0 : i32, i32, i32, i32
  }
  func.func @transform_7(%arg0: i32, %arg1: i32) -> (i32, i32, i32, i32) {
    %c0_i32 = arith.constant 0 : i32
    %c0_i32_0 = arith.constant 0 : i32
    %c0_i32_1 = arith.constant 0 : i32
    return %arg0, %arg1, %c0_i32, %c0_i32_0 : i32, i32, i32, i32
  }
}

module attributes {stable_mosaic.version = 11 : i64} {
  func.func @_bn_relu_pool_kernel(%arg0: i32, %arg1: i32, %arg2: memref<1x8x8x16xf32, #tpu.memory_space<vmem>>, %arg3: memref<1x16xf32, #tpu.memory_space<vmem>>, %arg4: memref<1x16xf32, #tpu.memory_space<vmem>>, %arg5: memref<1x8x8x16xf32, #tpu.memory_space<vmem>>, %arg6: memref<1x4x8x8xf32, #tpu.memory_space<vmem>>) attributes {dimension_semantics = [#tpu.dimension_semantics<parallel>, #tpu.dimension_semantics<parallel>], iteration_bounds = array<i64: 2, 2>, scalar_prefetch = 0 : i64, scratch_operands = 0 : i64, tpu.core_type = #tpu.core_type<tc>, window_params = [{transform_indices = @transform_0, window_bounds = array<i64: 1, 8, 8, 16>}, {pipeline_mode = #tpu.pipeline_mode<synchronous>, transform_indices = @transform_1, window_bounds = array<i64: 1, 16>}, {pipeline_mode = #tpu.pipeline_mode<synchronous>, transform_indices = @transform_2, window_bounds = array<i64: 1, 16>}, {transform_indices = @transform_3, window_bounds = array<i64: 1, 8, 8, 16>}, {transform_indices = @transform_4, window_bounds = array<i64: 1, 4, 8, 8>}]} {
    %c0 = arith.constant 0 : index
    %c0_0 = arith.constant 0 : index
    %c0_1 = arith.constant 0 : index
    %c0_2 = arith.constant 0 : index
    %0 = vector.load %arg2[%c0, %c0_0, %c0_1, %c0_2] : memref<1x8x8x16xf32, #tpu.memory_space<vmem>>, vector<1x8x8x16xf32>
    %1 = vector.shape_cast %0 : vector<1x8x8x16xf32> to vector<8x8x16xf32>
    %c0_3 = arith.constant 0 : index
    %c0_4 = arith.constant 0 : index
    %2 = vector.load %arg3[%c0_3, %c0_4] : memref<1x16xf32, #tpu.memory_space<vmem>>, vector<1x16xf32>
    %3 = vector.shape_cast %2 : vector<1x16xf32> to vector<1x1x16xf32>
    %4 = vector.broadcast %3 : vector<1x1x16xf32> to vector<8x8x16xf32>
    %5 = arith.mulf %1, %4 : vector<8x8x16xf32>
    %c0_5 = arith.constant 0 : index
    %c0_6 = arith.constant 0 : index
    %6 = vector.load %arg4[%c0_5, %c0_6] : memref<1x16xf32, #tpu.memory_space<vmem>>, vector<1x16xf32>
    %7 = vector.shape_cast %6 : vector<1x16xf32> to vector<1x1x16xf32>
    %8 = vector.broadcast %7 : vector<1x1x16xf32> to vector<8x8x16xf32>
    %9 = arith.addf %5, %8 : vector<8x8x16xf32>
    %cst = arith.constant 0.000000e+00 : f32
    %10 = vector.broadcast %cst : f32 to vector<8x8x16xf32>
    %11 = arith.maximumf %9, %10 : vector<8x8x16xf32>
    %c0_7 = arith.constant 0 : index
    %c0_8 = arith.constant 0 : index
    %c0_9 = arith.constant 0 : index
    %c0_10 = arith.constant 0 : index
    %12 = vector.load %arg5[%c0_7, %c0_8, %c0_9, %c0_10] : memref<1x8x8x16xf32, #tpu.memory_space<vmem>>, vector<1x8x8x16xf32>
    %13 = vector.shape_cast %12 : vector<1x8x8x16xf32> to vector<8x8x16xf32>
    %14 = vector.shape_cast %11 : vector<8x8x16xf32> to vector<1x8x8x16xf32>
    tpu.vector_store %arg5[%c0_7, %c0_8, %c0_9, %c0_10], %14 {strides = array<i32>} : memref<1x8x8x16xf32, #tpu.memory_space<vmem>>, vector<1x8x8x16xf32>,
    %15 = vector.extract_strided_slice %11 {offsets = [0, 0, 0], sizes = [8, 8, 8], strides = [1, 1, 1]} : vector<8x8x16xf32> to vector<8x8x8xf32>
    %16 = vector.extract_strided_slice %11 {offsets = [0, 0, 8], sizes = [8, 8, 8], strides = [1, 1, 1]} : vector<8x8x16xf32> to vector<8x8x8xf32>
    %17 = arith.maximumf %15, %16 : vector<8x8x8xf32>
    %18 = vector.shape_cast %17 : vector<8x8x8xf32> to vector<4x2x8x8xf32>
    %cst_11 = arith.constant dense<0xFF800000> : vector<4x8x8xf32>
    %19 = vector.multi_reduction <maximumf>, %18, %cst_11 [1] : vector<4x2x8x8xf32> to vector<4x8x8xf32>
    %c0_12 = arith.constant 0 : index
    %c0_13 = arith.constant 0 : index
    %c0_14 = arith.constant 0 : index
    %c0_15 = arith.constant 0 : index
    %20 = vector.load %arg6[%c0_12, %c0_13, %c0_14, %c0_15] : memref<1x4x8x8xf32, #tpu.memory_space<vmem>>, vector<1x4x8x8xf32>
    %21 = vector.shape_cast %20 : vector<1x4x8x8xf32> to vector<4x8x8xf32>
    %22 = vector.shape_cast %19 : vector<4x8x8xf32> to vector<1x4x8x8xf32>
    tpu.vector_store %arg6[%c0_12, %c0_13, %c0_14, %c0_15], %22 {strides = array<i32>} : memref<1x4x8x8xf32, #tpu.memory_space<vmem>>, vector<1x4x8x8xf32>,
    return
  }
  func.func @transform_0(%arg0: i32, %arg1: i32) -> (i32, i32, i32, i32) {
    %c0_i32 = arith.constant 0 : i32
    %c0_i32_0 = arith.constant 0 : i32
    %c0_i32_1 = arith.constant 0 : i32
    return %arg0, %arg1, %c0_i32, %c0_i32_0 : i32, i32, i32, i32
  }
  func.func @transform_1(%arg0: i32, %arg1: i32) -> (i32, i32) {
    %c0_i32 = arith.constant 0 : i32
    %c0_i32_0 = arith.constant 0 : i32
    %c0_i32_1 = arith.constant 0 : i32
    return %c0_i32, %c0_i32_0 : i32, i32
  }
  func.func @transform_2(%arg0: i32, %arg1: i32) -> (i32, i32) {
    %c0_i32 = arith.constant 0 : i32
    %c0_i32_0 = arith.constant 0 : i32
    %c0_i32_1 = arith.constant 0 : i32
    return %c0_i32, %c0_i32_0 : i32, i32
  }
  func.func @transform_3(%arg0: i32, %arg1: i32) -> (i32, i32, i32, i32) {
    %c0_i32 = arith.constant 0 : i32
    %c0_i32_0 = arith.constant 0 : i32
    %c0_i32_1 = arith.constant 0 : i32
    return %arg0, %arg1, %c0_i32, %c0_i32_0 : i32, i32, i32, i32
  }
  func.func @transform_4(%arg0: i32, %arg1: i32) -> (i32, i32, i32, i32) {
    %c0_i32 = arith.constant 0 : i32
    %c0_i32_0 = arith.constant 0 : i32
    %c0_i32_1 = arith.constant 0 : i32
    return %arg0, %arg1, %c0_i32, %c0_i32_0 : i32, i32, i32, i32
  }
}

</mosaic_0001>

<bundles_post_ra>
// kernel: down_forward.5
= control target key start
LH: loop header
LB: loop body
LE: loop exit
PB: predicated region body
PF: predicated region fallthrough
CT: control target
= control target key end

     0   :  { %s632_s15 = smov 0   ;;  %s634_s16 = smov 0   ;;  %s720_s0 = inlined_call_operand.vmem [shape: f32[2,16,8,16], index: 0, kind: input, shape index: {}]   ;;  %s721_s1 = inlined_call_operand.vmem [shape: f32[1,16], index: 1, kind: input, shape index: {}]   ;;  %s722_s2 = inlined_call_operand.vmem [shape: f32[1,16], index: 2, kind: input, shape index: {}]   ;;  %s723_s3 = inlined_call_operand.vmem [shape: f32[2,16,8,16], index: 3, kind: output, shape index: {0}]   ;;  %s724_s4 = inlined_call_operand.vmem [shape: f32[2,8,8,8], index: 4, kind: output, shape index: {1}]  }
   0x1   :  { %s636_s17 = smov 0   ;;  %s638_s18 = smov 0  }
   0x2   :  { %s640_s19 = smov 0  }
   0x3 LB: > { %s24_s20 = sadd.s32 1, %s596_s17  ;;  %s27_s21 = sadd.s32 1, %s600_s18  ;;  %s604_s19 = sphi %s640_s19, %s15_s19   ;;  %s600_s18 = sphi %s638_s18, %s728_s18   ;;  %s596_s17 = sphi %s636_s17, %s727_s17   ;;  %s592_s16 = sphi %s634_s16, %s726_s16   ;;  %s588_s15 = sphi %s632_s15, %s725_s15  }
   0x4   : > { %p25_p0 = scmp.ge.s32.totalorder %s24_s20, 2  ;;  %p511_p1 = scmp.ge.s32.totalorder %s604_s19, 1 }
   0x5   : > { %p188_p2 = scmp.lt.s32.totalorder %s604_s19, 5 }
   0x6   : > { %s730_s20 = smov (%p25_p0, %s24_s20), 0  ;;  %s732_s21 = smov (!%p25_p0, %s27_s21), %s600_s18 }
   0x7   : > { %p189_p3 = pnand %p511_p1, %p188_p2  ;;  %p29_p4 = scmp.ge.s32.totalorder %s732_s21, 2 }
   0x8   : > { %s512_s22 = sshll.u32 (!%p189_p3), %s588_s15, 3  ;;  %p232_p5 = scmp.lt.s32.totalorder (!%p189_p3), %s592_s16, 1 }
   0x9   : > { %s734_s21 = smov (%p29_p4, %s732_s21), 0  ;;  %192 = sbr.rel (%p189_p3) target bundleno = 163 (0xa3), region = 32 }
   0xa   : > { %p234_p6 = scmp.lt.s32.totalorder (!%p189_p3), %s512_s22, 15  ;;  %s606_s10 = smov (!%p189_p3), 120  }
   0xb   : > { %s518_s11 = sshll.u32 (!%p189_p3), %s588_s15, 2 }
   0xc   : > { %p254_p7 = scmp.lt.s32.totalorder (!%p189_p3), %s518_s11, 7 }
   0xe   : > { %s736_s16 = smov (!%p232_p5, %s592_s16), 1  ;;  %s738_s22 = smov (!%p234_p6, %s512_s22), 15  ;;  %v564_v0 = vld [vmem:[%s721_s1] ss:$0 sm:$0xff]  ;;  %vm301_vm0 = vcmask 130048   ;;  %vm350_vm1 = vcmask 64512  }
   0xf   : > { %s513_s23 = sshll.u32 %s736_s16, 4  ;;  %v565_v1 = vld [vmem:[%s722_s2] ss:$0 sm:$0xff]  ;;  %s740_s11 = smov (!%p254_p7, %s518_s11), 7 }
  0x10   : > { %s237_s24 = sadd.s32 %s513_s23, %s738_s22  ;;  %s519_s12 = sshll.u32 %s736_s16, 3 }
  0x11   : > { %s514_s27 = sshll.u32 %s237_s24, 3  ;;  %s257_s13 = sadd.s32 %s519_s12, %s740_s11 }
  0x12   : > { %s239_s30 = scalar_lea.vmem %s720_s0, %s514_s27  ;;  %s249_s9 = scalar_lea.vmem %s723_s3, %s514_s27 }
  0x13   : > { %v263_v2 = vld [vmem:[%s239_s30 + $0x10] sm:$0xff]  ;;  %v261_v3 = vld [vmem:[%s239_s30] sm:$0xff]  ;;  %v264_v4 = vld [vmem:[%s239_s30 + $0x18] sm:$0xff]  ;;  %s520_s14 = sshll.u32 %s257_s13, 3 }
  0x14   : > { %v275_v5 = vmul.f32 %v564_v0, %v263_v2  ;;  %v273_v6 = vmul.f32 %v564_v0, %v261_v3  ;;  %v276_v7 = vmul.f32 %v564_v0, %v264_v4  ;;  %v262_v8 = vld [vmem:[%s239_s30 + $0x8] sm:$0xff]  ;;  %v268_v9 = vld [vmem:[%s239_s30 + $0x38] sm:$0xff]  ;;  %v267_v10 = vld [vmem:[%s239_s30 + $0x30] sm:$0xff]  ;;  %s259_s24 = scalar_lea.vmem %s724_s4, %s520_s14 }
  0x15   : > { %v274_v11 = vmul.f32 %v564_v0, %v262_v8  ;;  %v280_v12 = vmul.f32 %v564_v0, %v268_v9  ;;  %v279_v13 = vmul.f32 %v564_v0, %v267_v10  ;;  %v265_v14 = vld [vmem:[%s239_s30 + $0x20] sm:$0xff]  ;;  %v266_v15 = vld [vmem:[%s239_s30 + $0x28] sm:$0xff] }
  0x16   : > { %v287_v16 = vadd.f32 %v565_v1, %v275_v5  ;;  %v285_v17 = vadd.f32 %v565_v1, %v273_v6  ;;  %v288_v18 = vadd.f32 %v565_v1, %v276_v7  ;;  %v277_v19 = vmul.f32 %v564_v0, %v265_v14 }
  0x17   : > { %v286_v20 = vadd.f32 %v565_v1, %v274_v11  ;;  %v278_v21 = vmul.f32 %v564_v0, %v266_v15  ;;  %v292_v24 = vadd.f32 %v565_v1, %v280_v12  ;;  %v291_v26 = vadd.f32 %v565_v1, %v279_v13 }
  0x18   : > { %v295_v22 = vmax.f32 %v287_v16, 0.0  ;;  %v293_v23 = vmax.f32 %v285_v17, 0.0  ;;  %v289_v25 = vadd.f32 %v565_v1, %v277_v19  ;;  %v296_v27 = vmax.f32 %v288_v18, 0.0 }
  0x19   : > { %v294_v29 = vmax.f32 %v286_v20, 0.0  ;;  %v290_v30 = vadd.f32 %v565_v1, %v278_v21  ;;  %v300_v31 = vmax.f32 %v292_v24, 0.0  ;;  %v299_v32 = vmax.f32 %v291_v26, 0.0 }
  0x1a   : > { %322 = vrot.lane.b32.xlu1 %v295_v22, %s606_s10  ;;  %304 = vst.msk [vmem:[%s249_s9 + $0x10] sm:$0xff] %vm301_vm0, %v295_v22  ;;  %318 = vrot.lane.b32.xlu0 %v293_v23, %s606_s10  ;;  %v297_v28 = vmax.f32 %v289_v25, 0.0 }
  0x1b   : > { %302 = vst.msk [vmem:[%s249_s9] sm:$0xff] %vm301_vm0, %v293_v23  ;;  %v298_v33 = vmax.f32 %v290_v30, 0.0 }
  0x1c   : > { %305 = vst.msk [vmem:[%s249_s9 + $0x18] sm:$0xff] %vm301_vm0, %v296_v27  ;;  %326 = vrot.lane.b32.xlu2 %v297_v28, %s606_s10 }
  0x1d   : > { %303 = vst.msk [vmem:[%s249_s9 + $0x8] sm:$0xff] %vm301_vm0, %v294_v29 }
  0x1e   : > { %309 = vst.msk [vmem:[%s249_s9 + $0x38] sm:$0xff] %vm301_vm0, %v300_v31 }
  0x1f   : > { %308 = vst.msk [vmem:[%s249_s9 + $0x30] sm:$0xff] %vm301_vm0, %v299_v32 }
  0x20   : > { %306 = vst.msk [vmem:[%s249_s9 + $0x20] sm:$0xff] %vm301_vm0, %v297_v28 }
  0x21   : > { %307 = vst.msk [vmem:[%s249_s9 + $0x28] sm:$0xff] %vm301_vm0, %v298_v33 }
  0x22   : > { %324 = vrot.lane.b32.xlu1 %v296_v27, %s606_s10  ;;  %320 = vrot.lane.b32.xlu0 %v294_v29, %s606_s10 }
  0x24   : > { %328 = vrot.lane.b32.xlu2 %v298_v33, %s606_s10 }
  0x2a   : > { %332 = vrot.lane.b32.xlu1 %v300_v31, %s606_s10  ;;  %330 = vrot.lane.b32.xlu0 %v299_v32, %s606_s10 }
  0x76   : > { %v327_v34 = vpop.permute.xlu2 %326 }
  0x77   : > { %v346_v35 = vmax.f32 %v297_v28, %v327_v34 }
  0x79   : > { %v357_v37 = vsel %vm350_vm1, %v346_v35, -inf }
  0x7e   : > { %v329_v36 = vpop.permute.xlu2 %328 }
  0x7f   : > { %v347_v38 = vmax.f32 %v298_v33, %v329_v36 }
  0x81   : > { %v358_v39 = vsel %vm350_vm1, %v347_v38, -inf }
  0x82   : > { %v359_v40 = vmax.f32 %v357_v37, %v358_v39 }
  0x84   : > { %365 = vst.msk [vmem:[%s259_s24 + $0x10] sm:$0xff] %vm350_vm1, %v359_v40 }
  0x8c   : > { %v323_v41 = vpop.permute.xlu1 %322  ;;  %v319_v42 = vpop.permute.xlu0 %318 }
  0x8d   : > { %v344_v43 = vmax.f32 %v295_v22, %v323_v41  ;;  %v342_v44 = vmax.f32 %v293_v23, %v319_v42 }
  0x8f   : > { %v354_v49 = vsel %vm350_vm1, %v344_v43, -inf  ;;  %v351_v50 = vsel %vm350_vm1, %v342_v44, -inf }
  0x94   : > { %v325_v45 = vpop.permute.xlu1 %324  ;;  %v321_v46 = vpop.permute.xlu0 %320 }
  0x95   : > { %v345_v47 = vmax.f32 %v296_v27, %v325_v45  ;;  %v343_v48 = vmax.f32 %v294_v29, %v321_v46 }
  0x97   : > { %v355_v51 = vsel %vm350_vm1, %v345_v47, -inf  ;;  %v352_v52 = vsel %vm350_vm1, %v343_v48, -inf }
  0x98   : > { %v356_v53 = vmax.f32 %v354_v49, %v355_v51  ;;  %v353_v54 = vmax.f32 %v351_v50, %v352_v52 }
  0x9a   : > { %364 = vst.msk [vmem:[%s259_s24 + $0x8] sm:$0xff] %vm350_vm1, %v356_v53 }
  0x9b   : > { %363 = vst.msk [vmem:[%s259_s24] sm:$0xff] %vm350_vm1, %v353_v54 }
  0x9c   : > { %v333_v55 = vpop.permute.xlu1 %332  ;;  %v331_v56 = vpop.permute.xlu0 %330 }
  0x9d   : > { %v349_v57 = vmax.f32 %v300_v31, %v333_v55  ;;  %v348_v58 = vmax.f32 %v299_v32, %v331_v56 }
  0x9f   : > { %v361_v59 = vsel %vm350_vm1, %v349_v57, -inf  ;;  %v360_v60 = vsel %vm350_vm1, %v348_v58, -inf }
  0xa0   : > { %v362_v61 = vmax.f32 %v360_v60, %v361_v59 }
  0xa2   : > { %366 = vst.msk [vmem:[%s259_s24 + $0x18] sm:$0xff] %vm350_vm1, %v362_v61 }
  0xa3 PF: > { %s15_s19 = sadd.s32 1, %s604_s19   ;;  %s725_s15 = smov %s596_s17 }
  0xa4   : > { %p12_p8 = scmp.ge.s32.totalorder %s15_s19, 6   ;;  %s726_s16 = smov %s600_s18 }
  0xa5   : > { %s727_s17 = smov %s730_s20  ;;  %s728_s18 = smov %s734_s21 }
  0xa6   :  { %14 = sbr.rel (!%p12_p8) target bundleno = 3 (0x3), region = 74 }

// kernel: down_forward.3
= control target key start
LH: loop header
LB: loop body
LE: loop exit
PB: predicated region body
PF: predicated region fallthrough
CT: control target
= control target key end

     0   :  { %s1995_s24 = smov 0   ;;  %s1997_s1 = smov 0   ;;  %s3038_s0 = inlined_call_operand.vmem [shape: f32[2,16,16,4], index: 0, kind: input, shape index: {}]   ;;  %s3039_s1 = inlined_call_operand.vmem [shape: f32[1,4], index: 1, kind: input, shape index: {}]   ;;  %s3040_s2 = inlined_call_operand.vmem [shape: f32[1,4], index: 2, kind: input, shape index: {}]   ;;  %s3041_s3 = inlined_call_operand.vmem [shape: f32[36,8], index: 3, kind: input, shape index: {}]   ;;  %s3042_s4 = inlined_call_operand.vmem [shape: f32[1,8], index: 4, kind: input, shape index: {}]   ;;  %s3043_s5 = inlined_call_operand.vmem [shape: f32[2,16,16,8], index: 5, kind: output, shape index: {0}]   ;;  %s3044_s6 = inlined_call_operand.vmem [shape: f32[2,2,1,8], index: 6, kind: output, shape index: {1}]   ;;  %s3045_s7 = inlined_call_operand.vmem [shape: f32[2,2,1,8], index: 7, kind: output, shape index: {2}]  }
   0x1   :  { %s1999_s2 = smov 0   ;;  %s2001_s25 = smov 0  }
   0x2   :  { %s2003_s26 = smov 0  }
   0x3 LB: > { %s27_s27 = sadd.s32 1, %s1936_s2  ;;  %s30_s28 = sadd.s32 1, %s1940_s25  ;;  %s1944_s26 = sphi %s2003_s26, %s18_s26   ;;  %s1940_s25 = sphi %s2001_s25, %s3049_s25   ;;  %s1936_s2 = sphi %s1999_s2, %s3048_s2   ;;  %s1932_s1 = sphi %s1997_s1, %s3047_s1   ;;  %s1928_s24 = sphi %s1995_s24, %s3046_s24  }
   0x4   : > { %p28_p0 = scmp.ge.s32.totalorder %s27_s27, 2  ;;  %p1706_p1 = scmp.ge.s32.totalorder %s1944_s26, 1 }
   0x5   : > { %p260_p2 = scmp.lt.s32.totalorder %s1944_s26, 5 }
   0x6   : > { %s3051_s27 = smov (%p28_p0, %s27_s27), 0  ;;  %s3053_s28 = smov (!%p28_p0, %s30_s28), %s1940_s25 }
   0x7   : > { %p261_p3 = pnand %p1706_p1, %p260_p2  ;;  %p32_p4 = scmp.ge.s32.totalorder %s3053_s28, 2 }
   0x8   : > { %p311_p5 = scmp.lt.s32.totalorder (!%p261_p3), %s1932_s1, 1  ;;  %s1709_s29 = sshll.u32 (!%p261_p3), %s1928_s24, 3 }
   0x9   : > { %s3055_s28 = smov (%p32_p4, %s3053_s28), 0  ;;  %264 = sbr.rel (%p261_p3) target bundleno = 743 (0x2e7), region = 40 }
   0xa   : > { %p319_p6 = scmp.lt.s32.totalorder (!%p261_p3), %s1709_s29, 15  ;;  %p329_p7 = scmp.lt.s32.totalorder (!%p261_p3), %s1928_s24, 1 }
   0xb   : > { %p1715_p8 = scmp.ne.s32.totalorder (!%p261_p3), %s1928_s24, 0 }
   0xe   : > { %s3057_s1 = smov (!%p311_p5, %s1932_s1), 1  ;;  %s3059_s29 = smov (!%p319_p6, %s1709_s29), 15 }
   0xf   : > { %s1837_s30 = sshll.u32 %s3057_s1, 8  ;;  %s1711_s8 = sshll.u32 %s3057_s1, 5 }
  0x10   : > { %s2032_s11 = scalar_lea.vmem %s3038_s0, %s1837_s30  ;;  %s1710_s12 = sshll.u32 %s3059_s29, 1 }
  0x11   : > { %s323_s13 = sadd.s32 %s1711_s8, %s1710_s12  ;;  %s1713_s18 = sshll.u32 %s3057_s1, 1 }
  0x12   : > { %s1712_s14 = sshll.u32 %s323_s13, 3 }
  0x13   : > { %s2037_s17 = scalar_lea.vmem %s3043_s5, %s1712_s14  ;;  %344 = sbr.rel (%p1715_p8) target bundleno = 129 (0x81), region = 44 }
  0x14   : > { %s330_s19 = scalar_select %p329_p7, %s1928_s24, 1 }
  0x16   : > { %s2040_s20 = sadd.s32 %s1713_s18, %s330_s19 }
  0x17   : > { %s333_s23 = scalar_lea.vmem %s3044_s6, %s2040_s20  ;;  %s340_s29 = scalar_lea.vmem %s3045_s7, %s2040_s20 }
  0x18   : > { %vm345_vm0 = vcmask 31744   ;;  %v1946_v0 = vmov 0.0   ;;  %v418_v1 = vld [vmem:[%s2032_s11] sm:$0xff]  ;;  %v419_v2 = vld [vmem:[%s2032_s11 + $0x8] sm:$0xff]  ;;  %v420_v3 = vld [vmem:[%s2032_s11 + $0x10] sm:$0xff] }
  0x19   : > { %351 = vst.msk [vmem:[#allocation2 + $0x28] sm:$0xff] %vm345_vm0, %v1946_v0  ;;  %v421_v4 = vld [vmem:[%s2032_s11 + $0x18] sm:$0xff]  ;;  %v422_v5 = vld [vmem:[%s2032_s11 + $0x20] sm:$0xff]  ;;  %v423_v6 = vld [vmem:[%s2032_s11 + $0x28] sm:$0xff] }
  0x1a   : > { %346 = vst.msk [vmem:[#allocation2] sm:$0xff] %vm345_vm0, %v1946_v0  ;;  %v424_v7 = vld [vmem:[%s2032_s11 + $0x30] sm:$0xff]  ;;  %v425_v8 = vld [vmem:[%s2032_s11 + $0x38] sm:$0xff]  ;;  %v426_v9 = vld [vmem:[%s2032_s11 + $0x40] sm:$0xff] }
  0x1b   : > { %347 = vst.msk [vmem:[#allocation2 + $0x8] sm:$0xff] %vm345_vm0, %v1946_v0  ;;  %v427_v10 = vld [vmem:[%s2032_s11 + $0x48] sm:$0xff]  ;;  %v428_v11 = vld [vmem:[%s2032_s11 + $0x50] sm:$0xff]  ;;  %v429_v12 = vld [vmem:[%s2032_s11 + $0x58] sm:$0xff] }
  0x1c   : > { %348 = vst.msk [vmem:[#allocation2 + $0x10] sm:$0xff] %vm345_vm0, %v1946_v0  ;;  %v430_v13 = vld [vmem:[%s2032_s11 + $0x60] sm:$0xff]  ;;  %v431_v14 = vld [vmem:[%s2032_s11 + $0x68] sm:$0xff]  ;;  %v432_v15 = vld [vmem:[%s2032_s11 + $0x70] sm:$0xff] }
  0x1d   : > { %349 = vst.msk [vmem:[#allocation2 + $0x18] sm:$0xff] %vm345_vm0, %v1946_v0  ;;  %v433_v16 = vld [vmem:[%s2032_s11 + $0x78] sm:$0xff]  ;;  %v434_v17 = vld [vmem:[%s2032_s11 + $0x80] sm:$0xff]  ;;  %v435_v18 = vld [vmem:[%s2032_s11 + $0x88] sm:$0xff] }
  0x1e   : > { %350 = vst.msk [vmem:[#allocation2 + $0x20] sm:$0xff] %vm345_vm0, %v1946_v0  ;;  %v436_v19 = vld [vmem:[%s2032_s11 + $0x90] sm:$0xff]  ;;  %v437_v20 = vld [vmem:[%s2032_s11 + $0x98] sm:$0xff]  ;;  %v438_v21 = vld [vmem:[%s2032_s11 + $0xa0] sm:$0xff] }
  0x1f   : > { %352 = vst.msk [vmem:[#allocation2 + $0x30] sm:$0xff] %vm345_vm0, %v1946_v0  ;;  %v439_v22 = vld [vmem:[%s2032_s11 + $0xa8] sm:$0xff]  ;;  %v440_v23 = vld [vmem:[%s2032_s11 + $0xb0] sm:$0xff]  ;;  %v441_v24 = vld [vmem:[%s2032_s11 + $0xb8] sm:$0xff] }
  0x20   : > { %353 = vst.msk [vmem:[#allocation2 + $0x38] sm:$0xff] %vm345_vm0, %v1946_v0  ;;  %v442_v25 = vld [vmem:[%s2032_s11 + $0xc0] sm:$0xff]  ;;  %v443_v26 = vld [vmem:[%s2032_s11 + $0xc8] sm:$0xff]  ;;  %v444_v27 = vld [vmem:[%s2032_s11 + $0xd0] sm:$0xff] }
  0x21   : > { %354 = vst.msk [vmem:[#allocation2 + $0x40] sm:$0xff] %vm345_vm0, %v1946_v0  ;;  %v445_v28 = vld [vmem:[%s2032_s11 + $0xd8] sm:$0xff]  ;;  %v446_v29 = vld [vmem:[%s2032_s11 + $0xe0] sm:$0xff]  ;;  %v447_v30 = vld [vmem:[%s2032_s11 + $0xe8] sm:$0xff] }
  0x22   : > { %355 = vst.msk [vmem:[#allocation2 + $0x48] sm:$0xff] %vm345_vm0, %v1946_v0  ;;  %v448_v31 = vld [vmem:[%s2032_s11 + $0xf0] sm:$0xff]  ;;  %v449_v32 = vld [vmem:[%s2032_s11 + $0xf8] sm:$0xff] }
  0x23   : > { %356 = vst.msk [vmem:[#allocation2 + $0x50] sm:$0xff] %vm345_vm0, %v1946_v0 }
  0x24   : > { %357 = vst.msk [vmem:[#allocation2 + $0x58] sm:$0xff] %vm345_vm0, %v1946_v0 }
  0x25   : > { %358 = vst.msk [vmem:[#allocation2 + $0x60] sm:$0xff] %vm345_vm0, %v1946_v0 }
  0x26   : > { %359 = vst.msk [vmem:[#allocation2 + $0x68] sm:$0xff] %vm345_vm0, %v1946_v0 }
  0x27   : > { %360 = vst.msk [vmem:[#allocation2 + $0x70] sm:$0xff] %vm345_vm0, %v1946_v0 }
  0x28   : > { %361 = vst.msk [vmem:[#allocation2 + $0x78] sm:$0xff] %vm345_vm0, %v1946_v0 }
  0x29   : > { %362 = vst.msk [vmem:[#allocation2 + $0x80] sm:$0xff] %vm345_vm0, %v1946_v0 }
  0x2a   : > { %363 = vst.msk [vmem:[#allocation2 + $0x88] sm:$0xff] %vm345_vm0, %v1946_v0 }
  0x2b   : > { %364 = vst.msk [vmem:[#allocation2 + $0x90] sm:$0xff] %vm345_vm0, %v1946_v0 }
  0x2c   : > { %365 = vst.msk [vmem:[#allocation2 + $0x98] sm:$0xff] %vm345_vm0, %v1946_v0 }
  0x2d   : > { %366 = vst.msk [vmem:[#allocation2 + $0xa0] sm:$0xff] %vm345_vm0, %v1946_v0 }
  0x2e   : > { %367 = vst.msk [vmem:[#allocation2 + $0xa8] sm:$0xff] %vm345_vm0, %v1946_v0 }
  0x2f   : > { %368 = vst.msk [vmem:[#allocation2 + $0xb0] sm:$0xff] %vm345_vm0, %v1946_v0 }
  0x30   : > { %369 = vst.msk [vmem:[#allocation2 + $0xb8] sm:$0xff] %vm345_vm0, %v1946_v0 }
  0x31   : > { %370 = vst.msk [vmem:[#allocation2 + $0xc0] sm:$0xff] %vm345_vm0, %v1946_v0 }
  0x32   : > { %371 = vst.msk [vmem:[#allocation2 + $0xc8] sm:$0xff] %vm345_vm0, %v1946_v0 }
  0x33   : > { %372 = vst.msk [vmem:[#allocation2 + $0xd0] sm:$0xff] %vm345_vm0, %v1946_v0 }
  0x34   : > { %373 = vst.msk [vmem:[#allocation2 + $0xd8] sm:$0xff] %vm345_vm0, %v1946_v0 }
  0x35   : > { %374 = vst.msk [vmem:[#allocation2 + $0xe0] sm:$0xff] %vm345_vm0, %v1946_v0 }
  0x36   : > { %375 = vst.msk [vmem:[#allocation2 + $0xe8] sm:$0xff] %vm345_vm0, %v1946_v0 }
  0x37   : > { %376 = vst.msk [vmem:[#allocation2 + $0xf0] sm:$0xff] %vm345_vm0, %v1946_v0 }
  0x38   : > { %377 = vst.msk [vmem:[#allocation2 + $0xf8] sm:$0xff] %vm345_vm0, %v1946_v0 }
  0x39   : > { %378 = vst.msk [vmem:[#allocation2 + $0x100] sm:$0xff] %vm345_vm0, %v1946_v0 }
  0x3a   : > { %379 = vst.msk [vmem:[#allocation2 + $0x108] sm:$0xff] %vm345_vm0, %v1946_v0 }
  0x3b   : > { %380 = vst.msk [vmem:[#allocation2 + $0x110] sm:$0xff] %vm345_vm0, %v1946_v0 }
  0x3c   : > { %381 = vst.msk [vmem:[#allocation2 + $0x118] sm:$0xff] %vm345_vm0, %v1946_v0 }
  0x3d   : > { %382 = vst.msk [vmem:[#allocation2 + $0x120] sm:$0xff] %vm345_vm0, %v1946_v0 }
  0x3e   : > { %383 = vst.msk [vmem:[#allocation2 + $0x128] sm:$0xff] %vm345_vm0, %v1946_v0 }
  0x3f   : > { %384 = vst.msk [vmem:[#allocation2 + $0x130] sm:$0xff] %vm345_vm0, %v1946_v0 }
  0x40   : > { %385 = vst.msk [vmem:[#allocation2 + $0x138] sm:$0xff] %vm345_vm0, %v1946_v0 }
  0x41   : > { %386 = vst.msk [vmem:[#allocation2 + $0x140] sm:$0xff] %vm345_vm0, %v1946_v0 }
  0x42   : > { %387 = vst.msk [vmem:[#allocation2 + $0x148] sm:$0xff] %vm345_vm0, %v1946_v0 }
  0x43   : > { %388 = vst.msk [vmem:[#allocation2 + $0x150] sm:$0xff] %vm345_vm0, %v1946_v0 }
  0x44   : > { %389 = vst.msk [vmem:[#allocation2 + $0x158] sm:$0xff] %vm345_vm0, %v1946_v0 }
  0x45   : > { %390 = vst.msk [vmem:[#allocation2 + $0x160] sm:$0xff] %vm345_vm0, %v1946_v0 }
  0x46   : > { %391 = vst.msk [vmem:[#allocation2 + $0x168] sm:$0xff] %vm345_vm0, %v1946_v0 }
  0x47   : > { %392 = vst.msk [vmem:[#allocation2 + $0x170] sm:$0xff] %vm345_vm0, %v1946_v0 }
  0x48   : > { %393 = vst.msk [vmem:[#allocation2 + $0x178] sm:$0xff] %vm345_vm0, %v1946_v0 }
  0x49   : > { %394 = vst.msk [vmem:[#allocation2 + $0x180] sm:$0xff] %vm345_vm0, %v1946_v0 }
  0x4a   : > { %395 = vst.msk [vmem:[#allocation2 + $0x188] sm:$0xff] %vm345_vm0, %v1946_v0 }
  0x4b   : > { %396 = vst.msk [vmem:[#allocation2 + $0x190] sm:$0xff] %vm345_vm0, %v1946_v0 }
  0x4c   : > { %397 = vst.msk [vmem:[#allocation2 + $0x198] sm:$0xff] %vm345_vm0, %v1946_v0 }
  0x4d   : > { %398 = vst.msk [vmem:[#allocation2 + $0x1a0] sm:$0xff] %vm345_vm0, %v1946_v0 }
  0x4e   : > { %399 = vst.msk [vmem:[#allocation2 + $0x1a8] sm:$0xff] %vm345_vm0, %v1946_v0 }
  0x4f   : > { %400 = vst.msk [vmem:[#allocation2 + $0x1b0] sm:$0xff] %vm345_vm0, %v1946_v0 }
  0x50   : > { %401 = vst.msk [vmem:[#allocation2 + $0x1b8] sm:$0xff] %vm345_vm0, %v1946_v0 }
  0x51   : > { %402 = vst.msk [vmem:[#allocation2 + $0x1c0] sm:$0xff] %vm345_vm0, %v1946_v0 }
  0x52   : > { %403 = vst.msk [vmem:[#allocation2 + $0x1c8] sm:$0xff] %vm345_vm0, %v1946_v0 }
  0x53   : > { %404 = vst.msk [vmem:[#allocation2 + $0x1d0] sm:$0xff] %vm345_vm0, %v1946_v0 }
  0x54   : > { %405 = vst.msk [vmem:[#allocation2 + $0x1d8] sm:$0xff] %vm345_vm0, %v1946_v0 }
  0x55   : > { %406 = vst.msk [vmem:[#allocation2 + $0x1e0] sm:$0xff] %vm345_vm0, %v1946_v0 }
  0x56   : > { %407 = vst.msk [vmem:[#allocation2 + $0x1e8] sm:$0xff] %vm345_vm0, %v1946_v0 }
  0x57   : > { %408 = vst.msk [vmem:[#allocation2 + $0x1f0] sm:$0xff] %vm345_vm0, %v1946_v0 }
  0x58   : > { %409 = vst.msk [vmem:[#allocation2 + $0x1f8] sm:$0xff] %vm345_vm0, %v1946_v0 }
  0x59   : > { %410 = vst.msk [vmem:[#allocation2 + $0x200] sm:$0xff] %vm345_vm0, %v1946_v0 }
  0x5a   : > { %411 = vst.msk [vmem:[#allocation2 + $0x208] sm:$0xff] %vm345_vm0, %v1946_v0 }
  0x5b   : > { %412 = vst.msk [vmem:[#allocation2 + $0x210] sm:$0xff] %vm345_vm0, %v1946_v0 }
  0x5c   : > { %413 = vst.msk [vmem:[#allocation2 + $0x218] sm:$0xff] %vm345_vm0, %v1946_v0 }
  0x5d   : > { %414 = vst.msk [vmem:[#allocation2 + $0x220] sm:$0xff] %vm345_vm0, %v1946_v0 }
  0x5e   : > { %415 = vst.msk [vmem:[#allocation2 + $0x228] sm:$0xff] %vm345_vm0, %v1946_v0 }
  0x5f   : > { %416 = vst.msk [vmem:[#allocation2 + $0x230] sm:$0xff] %vm345_vm0, %v1946_v0 }
  0x60   : > { %417 = vst.msk [vmem:[#allocation2 + $0x238] sm:$0xff] %vm345_vm0, %v1946_v0 }
  0x61   : > { %451 = vst.msk [vmem:[#allocation2 + $0x28] sm:$0xff] %vm345_vm0, %v418_v1 }
  0x62   : > { %452 = vst.msk [vmem:[#allocation2 + $0x30] sm:$0xff] %vm345_vm0, %v419_v2 }
  0x63   : > { %453 = vst.msk [vmem:[#allocation2 + $0x48] sm:$0xff] %vm345_vm0, %v420_v3 }
  0x64   : > { %454 = vst.msk [vmem:[#allocation2 + $0x50] sm:$0xff] %vm345_vm0, %v421_v4 }
  0x65   : > { %455 = vst.msk [vmem:[#allocation2 + $0x68] sm:$0xff] %vm345_vm0, %v422_v5 }
  0x66   : > { %456 = vst.msk [vmem:[#allocation2 + $0x70] sm:$0xff] %vm345_vm0, %v423_v6 }
  0x67   : > { %457 = vst.msk [vmem:[#allocation2 + $0x88] sm:$0xff] %vm345_vm0, %v424_v7 }
  0x68   : > { %458 = vst.msk [vmem:[#allocation2 + $0x90] sm:$0xff] %vm345_vm0, %v425_v8 }
  0x69   : > { %459 = vst.msk [vmem:[#allocation2 + $0xa8] sm:$0xff] %vm345_vm0, %v426_v9 }
  0x6a   : > { %460 = vst.msk [vmem:[#allocation2 + $0xb0] sm:$0xff] %vm345_vm0, %v427_v10 }
  0x6b   : > { %461 = vst.msk [vmem:[#allocation2 + $0xc8] sm:$0xff] %vm345_vm0, %v428_v11 }
  0x6c   : > { %462 = vst.msk [vmem:[#allocation2 + $0xd0] sm:$0xff] %vm345_vm0, %v429_v12 }
  0x6d   : > { %463 = vst.msk [vmem:[#allocation2 + $0xe8] sm:$0xff] %vm345_vm0, %v430_v13 }
  0x6e   : > { %464 = vst.msk [vmem:[#allocation2 + $0xf0] sm:$0xff] %vm345_vm0, %v431_v14 }
  0x6f   : > { %465 = vst.msk [vmem:[#allocation2 + $0x108] sm:$0xff] %vm345_vm0, %v432_v15 }
  0x70   : > { %466 = vst.msk [vmem:[#allocation2 + $0x110] sm:$0xff] %vm345_vm0, %v433_v16 }
  0x71   : > { %467 = vst.msk [vmem:[#allocation2 + $0x128] sm:$0xff] %vm345_vm0, %v434_v17 }
  0x72   : > { %468 = vst.msk [vmem:[#allocation2 + $0x130] sm:$0xff] %vm345_vm0, %v435_v18 }
  0x73   : > { %469 = vst.msk [vmem:[#allocation2 + $0x148] sm:$0xff] %vm345_vm0, %v436_v19 }
  0x74   : > { %470 = vst.msk [vmem:[#allocation2 + $0x150] sm:$0xff] %vm345_vm0, %v437_v20 }
  0x75   : > { %471 = vst.msk [vmem:[#allocation2 + $0x168] sm:$0xff] %vm345_vm0, %v438_v21 }
  0x76   : > { %472 = vst.msk [vmem:[#allocation2 + $0x170] sm:$0xff] %vm345_vm0, %v439_v22 }
  0x77   : > { %473 = vst.msk [vmem:[#allocation2 + $0x188] sm:$0xff] %vm345_vm0, %v440_v23 }
  0x78   : > { %474 = vst.msk [vmem:[#allocation2 + $0x190] sm:$0xff] %vm345_vm0, %v441_v24 }
  0x79   : > { %475 = vst.msk [vmem:[#allocation2 + $0x1a8] sm:$0xff] %vm345_vm0, %v442_v25 }
  0x7a   : > { %476 = vst.msk [vmem:[#allocation2 + $0x1b0] sm:$0xff] %vm345_vm0, %v443_v26 }
  0x7b   : > { %477 = vst.msk [vmem:[#allocation2 + $0x1c8] sm:$0xff] %vm345_vm0, %v444_v27 }
  0x7c   : > { %478 = vst.msk [vmem:[#allocation2 + $0x1d0] sm:$0xff] %vm345_vm0, %v445_v28 }
  0x7d   : > { %479 = vst.msk [vmem:[#allocation2 + $0x1e8] sm:$0xff] %vm345_vm0, %v446_v29 }
  0x7e   : > { %480 = vst.msk [vmem:[#allocation2 + $0x1f0] sm:$0xff] %vm345_vm0, %v447_v30 }
  0x7f   : > { %481 = vst.msk [vmem:[#allocation2 + $0x208] sm:$0xff] %vm345_vm0, %v448_v31 }
  0x80   : > { %482 = vst.msk [vmem:[#allocation2 + $0x210] sm:$0xff] %vm345_vm0, %v449_v32 }
  0x81 PF: > { %s1838_s1 = sshll.u32 %s1928_s24, 8  ;;  %s1947_s10 = smov 4   ;;  %vm1148_vm1 = vcmask 31744   ;;  %vm1165_vm2 = vcmask 64512   ;;  %vm1182_vm3 = vcmask 97280   ;;  %vm1342_vm4 = vcmask 1043456  }
  0x82   : > { %s2260_s8 = scalar_lea.vmem [#allocation2], %s1838_s1  ;;  %s1948_s24 = smov 8   ;;  %vm1199_vm5 = vcmask 130048   ;;  %vm1216_vm6 = vcmask 162816   ;;  %vm1233_vm7 = vcmask 195584   ;;  %vm1250_vm8 = vcmask 228352  }
  0x83   : > { %s1949_s11 = smov 12   ;;  %s1950_s12 = smov 20   ;;  %vm1267_vm9 = vcmask 261120   ;;  %vm1293_vm10 = vcmask 293888   ;;  %vm1464_vm11 = vcmask 57344  }
  0x84   : > { %s1951_s13 = smov 16   ;;  %s1952_s14 = smov 32  }
  0x85   : > { %s1953_s15 = smov 28   ;;  %s1954_s16 = smov 24  }
  0x87   : > { %v2263_v33 = vld [vmem:[%s2260_s8 + $0x48] sm:$0xff]  ;;  %v2275_v36 = vld [vmem:[%s2260_s8 + $0x50] sm:$0xff] }
  0x88   : > { %v2266_v34 = vld [vmem:[%s2260_s8 + $0x28] sm:$0xff]  ;;  %660 = vrot.lane.b32.xlu2 %v2263_v33, %s1947_s10  ;;  %v2278_v37 = vld [vmem:[%s2260_s8 + $0x30] sm:$0xff] }
  0x89   : > { %v502_v35 = vld [vmem:[%s2260_s8 + $0x8] sm:$0xff]  ;;  %656 = vrot.lane.b32.xlu1 %v2266_v34, %s1947_s10  ;;  %v503_v38 = vld [vmem:[%s2260_s8 + $0x10] sm:$0xff] }
  0x8a   : > { %652 = vrot.lane.b32.xlu0 %v502_v35, %s1947_s10  ;;  %v2287_v39 = vld [vmem:[%s2260_s8 + $0x88] sm:$0xff]  ;;  %v2290_v40 = vld [vmem:[%s2260_s8 + $0x70] sm:$0xff] }
  0x8b   : > { %v2293_v41 = vld [vmem:[%s2260_s8 + $0x68] sm:$0xff]  ;;  %v2302_v42 = vld [vmem:[%s2260_s8 + $0xb0] sm:$0xff] }
  0x8c   : > { %v2305_v43 = vld [vmem:[%s2260_s8 + $0xa8] sm:$0xff]  ;;  %v2308_v44 = vld [vmem:[%s2260_s8 + $0x90] sm:$0xff] }
  0x8d   : > { %v2317_v45 = vld [vmem:[%s2260_s8 + $0xe8] sm:$0xff]  ;;  %v2320_v46 = vld [vmem:[%s2260_s8 + $0xd0] sm:$0xff] }
  0x8e   : > { %v2323_v47 = vld [vmem:[%s2260_s8 + $0xc8] sm:$0xff]  ;;  %v519_v48 = vld [vmem:[%s2260_s8 + $0x11] sm:$0xff] }
  0x8f   : > { %v518_v49 = vld [vmem:[%s2260_s8 + $0x9] sm:$0xff]  ;;  %v2344_v52 = vld [vmem:[%s2260_s8 + $0x31] sm:$0xff] }
  0x90   : > { %662 = vrot.lane.b32.xlu2 %v2275_v36, %s1947_s10  ;;  %v2334_v50 = vld [vmem:[%s2260_s8 + $0xf0] sm:$0xff]  ;;  %v1720_v63 = vld [vmem:[%s2260_s8 + $0x27] sm:$0xff] }
  0x91   : > { %658 = vrot.lane.b32.xlu1 %v2278_v37, %s1947_s10  ;;  %v2341_v51 = vld [vmem:[%s2260_s8 + $0x49] sm:$0xff]  ;;  %v2356_v54 = vld [vmem:[%s2260_s8 + $0x71] sm:$0xff] }
  0x92   : > { %654 = vrot.lane.b32.xlu0 %v503_v38, %s1947_s10  ;;  %v2347_v53 = vld [vmem:[%s2260_s8 + $0x29] sm:$0xff]  ;;  %v2362_v56 = vld [vmem:[%s2260_s8 + $0x51] sm:$0xff] }
  0x93   : > { %v2359_v55 = vld [vmem:[%s2260_s8 + $0x69] sm:$0xff]  ;;  %v2374_v58 = vld [vmem:[%s2260_s8 + $0x91] sm:$0xff] }
  0x94   : > { %v2371_v57 = vld [vmem:[%s2260_s8 + $0xa9] sm:$0xff]  ;;  %v2386_v60 = vld [vmem:[%s2260_s8 + $0xd1] sm:$0xff] }
  0x95   : > { %v2377_v59 = vld [vmem:[%s2260_s8 + $0x89] sm:$0xff]  ;;  %v2392_v62 = vld [vmem:[%s2260_s8 + $0xb1] sm:$0xff] }
  0x96   : > { %v2389_v61 = vld [vmem:[%s2260_s8 + $0xc9] sm:$0xff]  ;;  %v2402_v0 = vld [vmem:[%s2260_s8 + $0xf1] sm:$0xff] }
  0x97   : > { %v2405_v1 = vld [vmem:[%s2260_s8 + $0xe9] sm:$0xff] }
  0x98   : > { %668 = vrot.lane.b32.xlu2 %v2287_v39, %s1947_s10  ;;  %v2413_v2 = vld [vmem:[%s2260_s8 + $0x4f] sm:$0xff]  ;;  %v1722_v3 = vld [vmem:[%s2260_s8 + $0x47] sm:$0xff] }
  0x99   : > { %666 = vrot.lane.b32.xlu1 %v2290_v40, %s1947_s10  ;;  %v1721_v4 = vld [vmem:[%s2260_s8 + $0x2f] sm:$0xff]  ;;  %v2423_v7 = vld [vmem:[%s2260_s8 + $0x87] sm:$0xff] }
  0x9a   : > { %664 = vrot.lane.b32.xlu0 %v2293_v41, %s1947_s10  ;;  %v2426_v8 = vld [vmem:[%s2260_s8 + $0x6f] sm:$0xff]  ;;  %v2429_v9 = vld [vmem:[%s2260_s8 + $0x67] sm:$0xff] }
  0x9b   : > { %v2442_v12 = vld [vmem:[%s2260_s8 + $0xaf] sm:$0xff]  ;;  %v2445_v13 = vld [vmem:[%s2260_s8 + $0xa7] sm:$0xff] }
  0x9c   : > { %v2448_v14 = vld [vmem:[%s2260_s8 + $0x8f] sm:$0xff]  ;;  %v2461_v17 = vld [vmem:[%s2260_s8 + $0xe7] sm:$0xff] }
  0x9d   : > { %v2464_v18 = vld [vmem:[%s2260_s8 + $0xcf] sm:$0xff]  ;;  %v2467_v19 = vld [vmem:[%s2260_s8 + $0xc7] sm:$0xff] }
  0x9e   : > { %v2481_v24 = vld [vmem:[%s2260_s8 + $0x10f] sm:$0xff]  ;;  %v2484_v25 = vld [vmem:[%s2260_s8 + $0x107] sm:$0xff] }
  0x9f   : > { %v2487_v26 = vld [vmem:[%s2260_s8 + $0xef] sm:$0xff] }
  0xa0   : > { %674 = vrot.lane.b32.xlu2 %v2302_v42, %s1947_s10  ;;  %v487_v31 = vld [vmem:[%s2260_s8 + $0xf] sm:$0xff] }
  0xa1   : > { %672 = vrot.lane.b32.xlu1 %v2305_v43, %s1947_s10 }
  0xa2   : > { %670 = vrot.lane.b32.xlu0 %v2308_v44, %s1947_s10 }
  0xa8   : > { %680 = vrot.lane.b32.xlu2 %v2317_v45, %s1947_s10 }
  0xa9   : > { %678 = vrot.lane.b32.xlu1 %v2320_v46, %s1947_s10 }
  0xaa   : > { %676 = vrot.lane.b32.xlu0 %v2323_v47, %s1947_s10 }
  0xb0   : > { %718 = vrot.lane.b32.xlu2 %v519_v48, %s1948_s24 }
  0xb1   : > { %716 = vrot.lane.b32.xlu1 %v518_v49, %s1948_s24 }
  0xb2   : > { %682 = vrot.lane.b32.xlu0 %v2334_v50, %s1947_s10 }
  0xb8   : > { %724 = vrot.lane.b32.xlu2 %v2341_v51, %s1948_s24 }
  0xb9   : > { %722 = vrot.lane.b32.xlu1 %v2344_v52, %s1948_s24 }
  0xba   : > { %720 = vrot.lane.b32.xlu0 %v2347_v53, %s1948_s24 }
  0xc0   : > { %730 = vrot.lane.b32.xlu2 %v2356_v54, %s1948_s24 }
  0xc1   : > { %728 = vrot.lane.b32.xlu1 %v2359_v55, %s1948_s24 }
  0xc2   : > { %726 = vrot.lane.b32.xlu0 %v2362_v56, %s1948_s24 }
  0xc8   : > { %736 = vrot.lane.b32.xlu2 %v2371_v57, %s1948_s24 }
  0xc9   : > { %734 = vrot.lane.b32.xlu1 %v2374_v58, %s1948_s24 }
  0xca   : > { %732 = vrot.lane.b32.xlu0 %v2377_v59, %s1948_s24 }
  0xd0   : > { %742 = vrot.lane.b32.xlu2 %v2386_v60, %s1948_s24 }
  0xd1   : > { %740 = vrot.lane.b32.xlu1 %v2389_v61, %s1948_s24 }
  0xd2   : > { %738 = vrot.lane.b32.xlu0 %v2392_v62, %s1948_s24 }
  0xd8   : > { %780 = vrot.lane.b32.xlu2 %v1720_v63, %s1949_s11 }
  0xd9   : > { %746 = vrot.lane.b32.xlu1 %v2402_v0, %s1948_s24 }
  0xda   : > { %744 = vrot.lane.b32.xlu0 %v2405_v1, %s1948_s24 }
  0xe0   : > { %786 = vrot.lane.b32.xlu2 %v2413_v2, %s1949_s11 }
  0xe1   : > { %784 = vrot.lane.b32.xlu1 %v1722_v3, %s1949_s11 }
  0xe2   : > { %782 = vrot.lane.b32.xlu0 %v1721_v4, %s1949_s11  ;;  %v661_v5 = vpop.permute.xlu2 %660 }
  0xe3   : > { %v1153_v6 = vsel %vm1148_vm1, %v1722_v3, %v661_v5 }
  0xe8   : > { %792 = vrot.lane.b32.xlu2 %v2423_v7, %s1949_s11 }
  0xe9   : > { %790 = vrot.lane.b32.xlu1 %v2426_v8, %s1949_s11 }
  0xea   : > { %788 = vrot.lane.b32.xlu0 %v2429_v9, %s1949_s11  ;;  %v663_v10 = vpop.permute.xlu2 %662 }
  0xeb   : > { %v2439_v11 = vsel %vm1148_vm1, %v2413_v2, %v663_v10 }
  0xf0   : > { %798 = vrot.lane.b32.xlu2 %v2442_v12, %s1949_s11 }
  0xf1   : > { %796 = vrot.lane.b32.xlu1 %v2445_v13, %s1949_s11 }
  0xf2   : > { %794 = vrot.lane.b32.xlu0 %v2448_v14, %s1949_s11  ;;  %v669_v15 = vpop.permute.xlu2 %668 }
  0xf3   : > { %v2458_v16 = vsel %vm1148_vm1, %v2423_v7, %v669_v15 }
  0xf8   : > { %804 = vrot.lane.b32.xlu2 %v2461_v17, %s1949_s11 }
  0xf9   : > { %802 = vrot.lane.b32.xlu1 %v2464_v18, %s1949_s11 }
  0xfa   : > { %800 = vrot.lane.b32.xlu0 %v2467_v19, %s1949_s11  ;;  %v2475_v20 = vpop.permute.xlu2 %674 }
  0xfb   : > { %v657_v21 = vpop.permute.xlu1 %656 }
  0xfc   : > { %v2478_v22 = vsel %vm1148_vm1, %v1720_v63, %v657_v21  ;;  %v653_v23 = vpop.permute.xlu0 %652  ;;  %v486_v21 = vld [vmem:[%s2260_s8 + $0x7] sm:$0xff] }
 0x100   : > { %810 = vrot.lane.b32.xlu2 %v2481_v24, %s1949_s11 }
 0x101   : > { %808 = vrot.lane.b32.xlu1 %v2484_v25, %s1949_s11 }
 0x102   : > { %806 = vrot.lane.b32.xlu0 %v2487_v26, %s1949_s11  ;;  %v2495_v27 = vpop.permute.xlu2 %680 }
 0x103   : > { %v659_v28 = vpop.permute.xlu1 %658 }
 0x104   : > { %v1152_v29 = vsel %vm1148_vm1, %v1721_v4, %v659_v28  ;;  %v655_v30 = vpop.permute.xlu0 %654 }
 0x105   : > { %v1150_v32 = vsel %vm1148_vm1, %v487_v31, %v655_v30 }
 0x108   : > { %908 = vrot.lane.b32.xlu2 %v2347_v53, %s1950_s12 }
 0x109   : > { %846 = vrot.lane.b32.xlu1 %v2278_v37, %s1951_s13 }
 0x10a   : > { %844 = vrot.lane.b32.xlu0 %v2266_v34, %s1951_s13  ;;  %v719_v35 = vpop.permute.xlu2 %718 }
 0x10b   : > { %v667_v38 = vpop.permute.xlu1 %666  ;;  %v2507_v48 = vsel %vm1165_vm2, %v1150_v32, %v719_v35 }
 0x10c   : > { %v665_v49 = vpop.permute.xlu0 %664  ;;  %v1156_v4 = vsel %vm1148_vm1, %v2426_v8, %v667_v38 }
 0x110   : > { %1100 = vrot.lane.b32.xlu2 %v2341_v51, %s1952_s14 }
 0x111   : > { %1036 = vrot.lane.b32.xlu1 %v2263_v33, %s1953_s15 }
 0x112   : > { %972 = vrot.lane.b32.xlu0 %v1722_v3, %s1954_s16  ;;  %v725_v34 = vpop.permute.xlu2 %724 }
 0x113   : > { %v673_v37 = vpop.permute.xlu1 %672  ;;  %v2515_v53 = vsel %vm1165_vm2, %v1153_v6, %v725_v34 }
 0x114   : > { %v671_v63 = vpop.permute.xlu0 %670  ;;  %v1159_v28 = vsel %vm1148_vm1, %v2445_v13, %v673_v37 }
 0x118   : > { %916 = vrot.lane.b32.xlu2 %v2359_v55, %s1950_s12 }
 0x119   : > { %910 = vrot.lane.b32.xlu1 %v2344_v52, %s1950_s12  ;;  %v1149_v52 = vsel %vm1148_vm1, %v486_v21, %v653_v23 }
 0x11a   : > { %852 = vrot.lane.b32.xlu0 %v2293_v41, %s1951_s13  ;;  %v731_v5 = vpop.permute.xlu2 %730 }
 0x11b   : > { %v679_v3 = vpop.permute.xlu1 %678  ;;  %v2526_v10 = vsel %vm1165_vm2, %v1156_v4, %v731_v5 }
 0x11c   : > { %v677_v6 = vpop.permute.xlu0 %676 }
 0x11d   : > { %v1161_v15 = vsel %vm1148_vm1, %v2467_v19, %v677_v6 }
 0x120   : > { %980 = vrot.lane.b32.xlu2 %v2423_v7, %s1954_s16 }
 0x121   : > { %974 = vrot.lane.b32.xlu1 %v2413_v2, %s1954_s16  ;;  %v1162_v2 = vsel %vm1148_vm1, %v2464_v18, %v679_v3  ;;  %v1155_v3 = vsel %vm1148_vm1, %v2429_v9, %v665_v49 }
 0x122   : > { %860 = vrot.lane.b32.xlu0 %v2305_v43, %s1951_s13  ;;  %v737_v30 = vpop.permute.xlu2 %736 }
 0x123   : > { %v717_v31 = vpop.permute.xlu1 %716  ;;  %v2541_v32 = vsel %vm1165_vm2, %v1159_v28, %v737_v30 }
 0x124   : > { %v1166_v35 = vsel %vm1165_vm2, %v1149_v52, %v717_v31  ;;  %v683_v38 = vpop.permute.xlu0 %682 }
 0x128   : > { %1044 = vrot.lane.b32.xlu2 %v2287_v39, %s1953_s15 }
 0x129   : > { %1038 = vrot.lane.b32.xlu1 %v2275_v36, %s1953_s15 }
 0x12a   : > { %924 = vrot.lane.b32.xlu0 %v2371_v57, %s1950_s12  ;;  %v743_v7 = vpop.permute.xlu2 %742 }
 0x12b   : > { %v723_v23 = vpop.permute.xlu1 %722  ;;  %v2553_v34 = vsel %vm1165_vm2, %v1162_v2, %v743_v7  ;;  %v1160_v7 = vsel %vm1148_vm1, %v2442_v12, %v2475_v20 }
 0x12c   : > { %v1169_v37 = vsel %vm1165_vm2, %v1152_v29, %v723_v23  ;;  %v721_v4 = vpop.permute.xlu0 %720 }
 0x12d   : > { %v1168_v5 = vsel %vm1165_vm2, %v2478_v22, %v721_v4 }
 0x130   : > { %1108 = vrot.lane.b32.xlu2 %v2377_v59, %s1952_s14 }
 0x131   : > { %1102 = vrot.lane.b32.xlu1 %v2362_v56, %s1952_s14 }
 0x132   : > { %988 = vrot.lane.b32.xlu0 %v2467_v19, %s1954_s16  ;;  %v781_v6 = vpop.permute.xlu2 %780  ;;  %v1158_v19 = vsel %vm1148_vm1, %v2448_v14, %v671_v63 }
 0x133   : > { %v729_v21 = vpop.permute.xlu1 %728  ;;  %v2567_v29 = vsel %vm1182_vm3, %v1166_v35, %v781_v6 }
 0x134   : > { %v1172_v22 = vsel %vm1165_vm2, %v1155_v3, %v729_v21  ;;  %v727_v52 = vpop.permute.xlu0 %726 }
 0x135   : > { %v1171_v28 = vsel %vm1165_vm2, %v2439_v11, %v727_v52 }
 0x138   : > { %848 = vrot.lane.b32.xlu2 %v2263_v33, %s1951_s13 }
 0x139   : > { %1116 = vrot.lane.b32.xlu1 %v2389_v61, %s1952_s14 }
 0x13a   : > { %1052 = vrot.lane.b32.xlu0 %v2323_v47, %s1953_s15  ;;  %v787_v49 = vpop.permute.xlu2 %786 }
 0x13b   : > { %v735_v30 = vpop.permute.xlu1 %734  ;;  %v2581_v31 = vsel %vm1182_vm3, %v1169_v37, %v787_v49 }
 0x13c   : > { %v1175_v35 = vsel %vm1165_vm2, %v1158_v19, %v735_v30  ;;  %v733_v11 = vpop.permute.xlu0 %732 }
 0x13d   : > { %v1174_v33 = vsel %vm1165_vm2, %v2458_v16, %v733_v11 }
 0x140   : > { %918 = vrot.lane.b32.xlu2 %v2356_v54, %s1950_s12 }
 0x141   : > { %912 = vrot.lane.b32.xlu1 %v2341_v51, %s1950_s12  ;;  %v1164_v51 = vsel %vm1148_vm1, %v2487_v26, %v683_v38 }
 0x142   : > { %854 = vrot.lane.b32.xlu0 %v2290_v40, %s1951_s13  ;;  %v793_v63 = vpop.permute.xlu2 %792 }
 0x143   : > { %v741_v2 = vpop.permute.xlu1 %740  ;;  %v2596_v23 = vsel %vm1182_vm3, %v1172_v22, %v793_v63 }
 0x144   : > { %v1178_v16 = vsel %vm1165_vm2, %v1161_v15, %v741_v2  ;;  %v739_v37 = vpop.permute.xlu0 %738  ;;  %v1163_v15 = vsel %vm1148_vm1, %v2461_v17, %v2495_v27 }
 0x145   : > { %v2600_v4 = vsel %vm1165_vm2, %v1160_v7, %v739_v37  ;;  %v1284_v37 = vld [vmem:[%s3041_s3] sm:$0xff] }
 0x148   : > { %976 = vrot.lane.b32.xlu2 %v2429_v9, %s1954_s16 }
 0x149   : > { %868 = vrot.lane.b32.xlu1 %v2317_v45, %s1951_s13 }
 0x14a   : > { %862 = vrot.lane.b32.xlu0 %v2302_v42, %s1951_s13  ;;  %v799_v20 = vpop.permute.xlu2 %798 }
 0x14b   : > { %v747_v3 = vpop.permute.xlu1 %746  ;;  %v2614_v6 = vsel %vm1182_vm3, %v1175_v35, %v799_v20 }
 0x14c   : > { %v1181_v9 = vsel %vm1165_vm2, %v1164_v51, %v747_v3  ;;  %v745_v21 = vpop.permute.xlu0 %744  ;;  %v2679_v51 = vld [vmem:[%s2260_s8 + $0x108] sm:$0xff] }
 0x14d   : > { %v2618_v22 = vsel %vm1165_vm2, %v1163_v15, %v745_v21 }
 0x150   : > { %932 = vrot.lane.b32.xlu2 %v2405_v1, %s1950_s12 }
 0x151   : > { %926 = vrot.lane.b32.xlu1 %v2392_v62, %s1950_s12 }
 0x152   : > { %982 = vrot.lane.b32.xlu0 %v2448_v14, %s1954_s16  ;;  %v805_v38 = vpop.permute.xlu2 %804 }
 0x153   : > { %v785_v27 = vpop.permute.xlu1 %784  ;;  %v2627_v52 = vsel %vm1182_vm3, %v1178_v16, %v805_v38 }
 0x154   : > { %v2630_v19 = vsel %vm1182_vm3, %v1168_v5, %v785_v27  ;;  %v783_v49 = vpop.permute.xlu0 %782 }
 0x155   : > { %v2634_v30 = vsel %vm1182_vm3, %v2507_v48, %v783_v49  ;;  %v1287_v48 = vld [vmem:[%s3041_s3 + $0x18] sm:$0xff] }
 0x158   : > { %990 = vrot.lane.b32.xlu2 %v2464_v18, %s1954_s16  ;;  %v1288_v18 = vld [vmem:[%s3041_s3 + $0x20] sm:$0xf] }
 0x159   : > { %1046 = vrot.lane.b32.xlu1 %v2308_v44, %s1953_s15  ;;  %1818 = vmatpush.msk.msra.mxu0 %vm1342_vm4, %v1288_v18 }
 0x15a   : > { %1040 = vrot.lane.b32.xlu0 %v2293_v41, %s1953_s15  ;;  %v811_v14 = vpop.permute.xlu2 %810  ;;  %1841 = vmatpush.msk.msra.mxu1 %vm1342_vm4, %v1288_v18  ;;  %v1286_v41 = vld [vmem:[%s3041_s3 + $0x10] sm:$0xff] }
 0x15b   : > { %v791_v35 = vpop.permute.xlu1 %790  ;;  %v2643_v11 = vsel %vm1182_vm3, %v1181_v9, %v811_v14  ;;  %1842 = vmatpush.msk.msra.mxu2 %vm1342_vm4, %v1288_v18  ;;  %1843 = vmatpush.msk.msra.mxu3 %vm1342_vm4, %v1288_v18  ;;  %v2696_v9 = vld [vmem:[%s2260_s8 + $0x109] sm:$0xff] }
 0x15c   : > { %v2646_v5 = vsel %vm1182_vm3, %v1171_v28, %v791_v35  ;;  %v2648_v63 = vpop.permute.xlu0 %788  ;;  %1358 = vmatpush.msra.mxu0 %v1287_v48  ;;  %1844 = vmatpush.msra.mxu1 %v1287_v48 }
 0x15d   : > { %1845 = vmatpush.msra.mxu2 %v1287_v48  ;;  %1846 = vmatpush.msra.mxu3 %v1287_v48  ;;  %v1187_v18 = vsel %vm1182_vm3, %v2515_v53, %v2648_v63 }
 0x15e   : > { %1359 = vmatpush.msra.mxu0 %v1286_v41  ;;  %1847 = vmatpush.msra.mxu1 %v1286_v41 }
 0x15f   : > { %1848 = vmatpush.msra.mxu2 %v1286_v41  ;;  %1849 = vmatpush.msra.mxu3 %v1286_v41 }
 0x160   : > { %1110 = vrot.lane.b32.xlu2 %v2374_v58, %s1952_s14 }
 0x161   : > { %1104 = vrot.lane.b32.xlu1 %v2359_v55, %s1952_s14  ;;  %v1285_v55 = vld [vmem:[%s3041_s3 + $0x8] sm:$0xff] }
 0x162   : > { %996 = vrot.lane.b32.xlu0 %v2484_v25, %s1954_s16  ;;  %v909_v28 = vpop.permute.xlu2 %908  ;;  %1360 = vmatpush.msra.mxu0 %v1285_v55 }
 0x163   : > { %v797_v2 = vpop.permute.xlu1 %796  ;;  %1850 = vmatpush.msra.mxu1 %v1285_v55  ;;  %1851 = vmatpush.msra.mxu2 %v1285_v55 }
 0x164   : > { %v2666_v7 = vsel %vm1182_vm3, %v1174_v33, %v797_v2  ;;  %v795_v16 = vpop.permute.xlu0 %794  ;;  %1361 = vmatpush.msra.mxu0 %v1284_v37  ;;  %1852 = vmatpush.msra.mxu3 %v1285_v55 }
 0x165   : > { %v2673_v25 = vsel %vm1182_vm3, %v2526_v10, %v795_v16  ;;  %1853 = vmatpush.msra.mxu1 %v1284_v37  ;;  %1854 = vmatpush.msra.mxu2 %v1284_v37 }
 0x166   : > { %1855 = vmatpush.msra.mxu3 %v1284_v37  ;;  %v1815_v37 = vld [vmem:[%s2260_s8 + $0x111] sm:$0xff] }
 0x168   : > { %1118 = vrot.lane.b32.xlu2 %v2386_v60, %s1952_s14 }
 0x169   : > { %1060 = vrot.lane.b32.xlu1 %v2679_v51, %s1953_s15 }
 0x16a   : > { %1054 = vrot.lane.b32.xlu0 %v2320_v46, %s1953_s15  ;;  %v1101_v10 = vpop.permute.xlu2 %1100 }
 0x16b   : > { %v803_v33 = vpop.permute.xlu1 %802 }
 0x16c   : > { %v2689_v20 = vsel %vm1182_vm3, %v2600_v4, %v803_v33  ;;  %v801_v3 = vpop.permute.xlu0 %800 }
 0x16d   : > { %v2693_v15 = vsel %vm1182_vm3, %v2541_v32, %v801_v3 }
 0x170   : > { %856 = vrot.lane.b32.xlu2 %v2287_v39, %s1951_s13 }
 0x171   : > { %850 = vrot.lane.b32.xlu1 %v2275_v36, %s1951_s13 }
 0x172   : > { %1124 = vrot.lane.b32.xlu0 %v2696_v9, %s1952_s14  ;;  %v917_v21 = vpop.permute.xlu2 %916 }
 0x173   : > { %v809_v38 = vpop.permute.xlu1 %808 }
 0x174   : > { %v2706_v4 = vsel %vm1182_vm3, %v2618_v22, %v809_v38  ;;  %v807_v27 = vpop.permute.xlu0 %806 }
 0x175   : > { %v2710_v32 = vsel %vm1182_vm3, %v2553_v34, %v807_v27 }
 0x178   : > { %864 = vrot.lane.b32.xlu2 %v2323_v47, %s1951_s13 }
 0x179   : > { %920 = vrot.lane.b32.xlu1 %v2377_v59, %s1950_s12 }
 0x17a   : > { %914 = vrot.lane.b32.xlu0 %v2362_v56, %s1950_s12  ;;  %v981_v36 = vpop.permute.xlu2 %980 }
 0x17b   : > { %v847_v39 = vpop.permute.xlu1 %846 }
 0x17c   : > { %v845_v49 = vpop.permute.xlu0 %844 }
 0x17d   : > { %v1200_v22 = vsel %vm1199_vm5, %v2567_v29, %v845_v49 }
 0x17e   : > { %v1217_v34 = vsel %vm1216_vm6, %v1200_v22, %v909_v28 }
 0x180   : > { %984 = vrot.lane.b32.xlu2 %v2445_v13, %s1954_s16 }
 0x181   : > { %978 = vrot.lane.b32.xlu1 %v2426_v8, %s1954_s16 }
 0x182   : > { %870 = vrot.lane.b32.xlu0 %v2334_v50, %s1951_s13  ;;  %v1045_v47 = vpop.permute.xlu2 %1044 }
 0x183   : > { %v1037_v56 = vpop.permute.xlu1 %1036 }
 0x184   : > { %v973_v59 = vpop.permute.xlu0 %972 }
 0x185   : > { %v1234_v29 = vsel %vm1233_vm7, %v1217_v34, %v973_v59  ;;  %v1800_v34 = vld [vmem:[%s2260_s8 + $0x128] sm:$0xff] }
 0x186   : > { %v1251_v13 = vsel %vm1250_vm8, %v1234_v29, %v1037_v56  ;;  %v1784_v56 = vld [vmem:[%s2260_s8 + $0x127] sm:$0xff] }
 0x187   : > { %v1268_v14 = vsel %vm1267_vm9, %v1251_v13, %v1101_v10  ;;  %v1201_v10 = vsel %vm1199_vm5, %v2634_v30, %v847_v39 }
 0x188   : > { %1819 = vmatmul.msk.f32.vlgmr.msra.gmra.mxu0 %vm1293_vm10, %v1268_v14  ;;  %1042 = vrot.lane.b32.xlu2 %v2290_v40, %s1953_s15 }
 0x189   : > { %934 = vrot.lane.b32.xlu1 %v2402_v0, %s1950_s12 }
 0x18a   : > { %928 = vrot.lane.b32.xlu0 %v2389_v61, %s1950_s12  ;;  %v1109_v8 = vpop.permute.xlu2 %1108 }
 0x18b   : > { %v911_v35 = vpop.permute.xlu1 %910 }
 0x18c   : > { %v853_v48 = vpop.permute.xlu0 %852  ;;  %v1218_v33 = vsel %vm1216_vm6, %v1201_v10, %v911_v35 }
 0x18d   : > { %v1204_v41 = vsel %vm1199_vm5, %v1187_v18, %v853_v48 }
 0x18e   : > { %v1221_v28 = vsel %vm1216_vm6, %v1204_v41, %v917_v21 }
 0x18f   : > { %v1238_v2 = vsel %vm1233_vm7, %v1221_v28, %v981_v36 }
 0x190   : > { %v1255_v40 = vsel %vm1250_vm8, %v1238_v2, %v1045_v47  ;;  %998 = vrot.lane.b32.xlu2 %v2481_v24, %s1954_s16 }
 0x191   : > { %992 = vrot.lane.b32.xlu1 %v2461_v17, %s1954_s16  ;;  %v1272_v61 = vsel %vm1267_vm9, %v1255_v40, %v1109_v8  ;;  %v1817_v40 = vld [vmem:[%s2260_s8 + $0x131] sm:$0xff] }
 0x192   : > { %1048 = vrot.lane.b32.xlu0 %v2305_v43, %s1953_s15  ;;  %1823 = vmatmul.msk.f32.vlgmr.msra.gmra.mxu1 %vm1293_vm10, %v1272_v61  ;;  %v2752_v53 = vpop.permute.xlu2 %848  ;;  %v2762_v43 = vld [vmem:[%s2260_s8 + $0x110] sm:$0xff] }
 0x193   : > { %v975_v63 = vpop.permute.xlu1 %974  ;;  %v1801_v61 = vld [vmem:[%s2260_s8 + $0x130] sm:$0xff] }
 0x194   : > { %v861_v16 = vpop.permute.xlu0 %860 }
 0x198   : > { %1056 = vrot.lane.b32.xlu2 %v2317_v45, %s1953_s15  ;;  %v1235_v45 = vsel %vm1233_vm7, %v1218_v33, %v975_v63 }
 0x199   : > { %1112 = vrot.lane.b32.xlu1 %v2371_v57, %s1952_s14 }
 0x19a   : > { %1106 = vrot.lane.b32.xlu0 %v2356_v54, %s1952_s14  ;;  %v919_v17 = vpop.permute.xlu2 %918 }
 0x19b   : > { %v1039_v24 = vpop.permute.xlu1 %1038 }
 0x19c   : > { %v925_v55 = vpop.permute.xlu0 %924  ;;  %v1252_v54 = vsel %vm1250_vm8, %v1235_v45, %v1039_v24 }
 0x1a0   : > { %1126 = vrot.lane.b32.xlu2 %v1815_v37, %s1952_s14 }
 0x1a1   : > { %1120 = vrot.lane.b32.xlu1 %v2405_v1, %s1952_s14  ;;  %v1208_v1 = vsel %vm1199_vm5, %v2666_v7, %v861_v16 }
 0x1a2   : > { %1062 = vrot.lane.b32.xlu0 %v2762_v43, %s1953_s15  ;;  %v977_v57 = vpop.permute.xlu2 %976  ;;  %v1225_v30 = vsel %vm1216_vm6, %v1208_v1, %v925_v55 }
 0x1a3   : > { %v1103_v3 = vpop.permute.xlu1 %1102 }
 0x1a4   : > { %v989_v21 = vpop.permute.xlu0 %988  ;;  %v1269_v38 = vsel %vm1267_vm9, %v1252_v54, %v1103_v3 }
 0x1a5   : > { %1820 = vmatmul.msk.f32.gmra.mxu0 %vm1293_vm10, %v1269_v38  ;;  %v1242_v39 = vsel %vm1233_vm7, %v1225_v30, %v989_v21 }
 0x1a8   : > { %866 = vrot.lane.b32.xlu2 %v2320_v46, %s1951_s13 }
 0x1a9   : > { %922 = vrot.lane.b32.xlu1 %v2374_v58, %s1950_s12 }
 0x1aa   : > { %858 = vrot.lane.b32.xlu0 %v2308_v44, %s1951_s13  ;;  %v2785_v27 = vpop.permute.xlu2 %932 }
 0x1ab   : > { %v1117_v36 = vpop.permute.xlu1 %1116 }
 0x1ac   : > { %v1053_v49 = vpop.permute.xlu0 %1052 }
 0x1ad   : > { %v1259_v46 = vsel %vm1250_vm8, %v1242_v39, %v1053_v49 }
 0x1ae   : > { %v1276_v22 = vsel %vm1267_vm9, %v1259_v46, %v1117_v36 }
 0x1af   : > { %1827 = vmatmul.msk.f32.vlgmr.msra.gmra.mxu2 %vm1293_vm10, %v1276_v22  ;;  %v2857_v22 = vld [vmem:[%s3042_s4] ss:$0 sm:$0xff] }
 0x1b0   : > { %930 = vrot.lane.b32.xlu2 %v2386_v60, %s1950_s12 }
 0x1b1   : > { %986 = vrot.lane.b32.xlu1 %v2442_v12, %s1954_s16 }
 0x1b2   : > { %872 = vrot.lane.b32.xlu0 %v2679_v51, %s1951_s13  ;;  %v991_v44 = vpop.permute.xlu2 %990 }
 0x1b3   : > { %v913_v58 = vpop.permute.xlu1 %912 }
 0x1b4   : > { %v855_v7 = vpop.permute.xlu0 %854 }
 0x1b8   : > { %994 = vrot.lane.b32.xlu2 %v2487_v26, %s1954_s16 }
 0x1b9   : > { %1050 = vrot.lane.b32.xlu1 %v2302_v42, %s1953_s15  ;;  %v1816_v42 = vld [vmem:[%s2260_s8 + $0x129] sm:$0xff] }
 0x1ba   : > { %936 = vrot.lane.b32.xlu0 %v2696_v9, %s1950_s12  ;;  %v1111_v60 = vpop.permute.xlu2 %1110  ;;  %v1205_v9 = vsel %vm1199_vm5, %v2646_v5, %v855_v7  ;;  %v1785_v5 = vld [vmem:[%s2260_s8 + $0x12f] sm:$0xff] }
 0x1bb   : > { %v869_v47 = vpop.permute.xlu1 %868 }
 0x1bc   : > { %v863_v12 = vpop.permute.xlu0 %862  ;;  %v1212_v10 = vsel %vm1199_vm5, %v2627_v52, %v869_v47 }
 0x1c0   : > { %1058 = vrot.lane.b32.xlu2 %v2334_v50, %s1953_s15  ;;  %v1222_v50 = vsel %vm1216_vm6, %v1205_v9, %v919_v17 }
 0x1c1   : > { %1114 = vrot.lane.b32.xlu1 %v2392_v62, %s1952_s14 }
 0x1c2   : > { %1000 = vrot.lane.b32.xlu0 %v1784_v56, %s1954_s16  ;;  %v1119_v59 = vpop.permute.xlu2 %1118 }
 0x1c3   : > { %v927_v51 = vpop.permute.xlu1 %926 }
 0x1c4   : > { %v983_v26 = vpop.permute.xlu0 %982 }
 0x1c5   : > { %v1239_v62 = vsel %vm1233_vm7, %v1222_v50, %v983_v26 }
 0x1c8   : > { %1128 = vrot.lane.b32.xlu2 %v1816_v42, %s1952_s14 }
 0x1c9   : > { %1122 = vrot.lane.b32.xlu1 %v2402_v0, %s1952_s14  ;;  %v1202_v0 = vsel %vm1199_vm5, %v2630_v19, %v2752_v53  ;;  %v1209_v53 = vsel %vm1199_vm5, %v2614_v6, %v863_v12  ;;  %v1229_v6 = vsel %vm1216_vm6, %v1212_v10, %v2785_v27 }
 0x1ca   : > { %1064 = vrot.lane.b32.xlu0 %v1800_v34, %s1953_s15  ;;  %v1219_v35 = vsel %vm1216_vm6, %v1202_v0, %v913_v58  ;;  %v857_v18 = vpop.permute.xlu2 %856  ;;  %v1226_v63 = vsel %vm1216_vm6, %v1209_v53, %v927_v51 }
 0x1cb   : > { %v1047_v29 = vpop.permute.xlu1 %1046  ;;  %v1236_v48 = vsel %vm1233_vm7, %v1219_v35, %v977_v57  ;;  %v1243_v55 = vsel %vm1233_vm7, %v1226_v63, %v991_v44 }
 0x1cc   : > { %v1256_v13 = vsel %vm1250_vm8, %v1239_v62, %v1047_v29  ;;  %v1041_v14 = vpop.permute.xlu0 %1040 }
 0x1cd   : > { %v1273_v8 = vsel %vm1267_vm9, %v1256_v13, %v1111_v60  ;;  %v1253_v41 = vsel %vm1250_vm8, %v1236_v48, %v1041_v14  ;;  %v1206_v60 = vsel %vm1199_vm5, %v2596_v23, %v857_v18 }
 0x1ce   : > { %1824 = vmatmul.msk.f32.gmra.mxu1 %vm1293_vm10, %v1273_v8 }
 0x1d0   : > { %1002 = vrot.lane.b32.xlu2 %v1785_v5, %s1954_s16 }
 0x1d1   : > { %938 = vrot.lane.b32.xlu1 %v1815_v37, %s1950_s12 }
 0x1d2   : > { %874 = vrot.lane.b32.xlu0 %v2762_v43, %s1951_s13  ;;  %v865_v16 = vpop.permute.xlu2 %864 }
 0x1d3   : > { %v1105_v28 = vpop.permute.xlu1 %1104  ;;  %v1210_v29 = vsel %vm1199_vm5, %v2693_v15, %v865_v16 }
 0x1d4   : > { %v997_v2 = vpop.permute.xlu0 %996  ;;  %v1270_v19 = vsel %vm1267_vm9, %v1253_v41, %v1105_v28 }
 0x1d5   : > { %1821 = vmatmul.msk.f32.gmra.mxu0 %vm1293_vm10, %v1270_v19  ;;  %v1246_v33 = vsel %vm1233_vm7, %v1229_v6, %v997_v2 }
 0x1d9   : > { %1130 = vrot.lane.b32.xlu1 %v1817_v40, %s1952_s14 }
 0x1da   : > { %1066 = vrot.lane.b32.xlu0 %v1801_v61, %s1953_s15  ;;  %v985_v45 = vpop.permute.xlu2 %984 }
 0x1db   : > { %v1061_v17 = vpop.permute.xlu1 %1060 }
 0x1dc   : > { %v1055_v24 = vpop.permute.xlu0 %1054  ;;  %v1263_v57 = vsel %vm1250_vm8, %v1246_v33, %v1061_v17 }
 0x1dd   : > { %v1260_v37 = vsel %vm1250_vm8, %v1243_v55, %v1055_v24 }
 0x1de   : > { %v1277_v43 = vsel %vm1267_vm9, %v1260_v37, %v1119_v59 }
 0x1df   : > { %1828 = vmatmul.msk.f32.gmra.mxu2 %vm1293_vm10, %v1277_v43 }
 0x1e2   : > { %v1043_v30 = vpop.permute.xlu2 %1042 }
 0x1e3   : > { %v851_v54 = vpop.permute.xlu1 %850 }
 0x1e4   : > { %v1125_v3 = vpop.permute.xlu0 %1124  ;;  %v1203_v12 = vsel %vm1199_vm5, %v2581_v31, %v851_v54 }
 0x1e5   : > { %v1280_v21 = vsel %vm1267_vm9, %v1263_v57, %v1125_v3 }
 0x1e6   : > { %1831 = vmatmul.msk.f32.vlgmr.msra.gmra.mxu3 %vm1293_vm10, %v1280_v21 }
 0x1ea   : > { %v999_v39 = vpop.permute.xlu2 %998 }
 0x1eb   : > { %v921_v38 = vpop.permute.xlu1 %920 }
 0x1ec   : > { %v915_v1 = vpop.permute.xlu0 %914  ;;  %v1223_v56 = vsel %vm1216_vm6, %v1206_v60, %v921_v38 }
 0x1ed   : > { %v1220_v51 = vsel %vm1216_vm6, %v1203_v12, %v915_v1  ;;  %v1240_v59 = vsel %vm1233_vm7, %v1223_v56, %v985_v45 }
 0x1f2   : > { %v1057_v46 = vpop.permute.xlu2 %1056 }
 0x1f3   : > { %v979_v52 = vpop.permute.xlu1 %978 }
 0x1f4   : > { %v871_v36 = vpop.permute.xlu0 %870  ;;  %v1237_v26 = vsel %vm1233_vm7, %v1220_v51, %v979_v52 }
 0x1f5   : > { %v1254_v50 = vsel %vm1250_vm8, %v1237_v26, %v1043_v30  ;;  %v1213_v8 = vsel %vm1199_vm5, %v2710_v32, %v871_v36 }
 0x1fa   : > { %v1127_v42 = vpop.permute.xlu2 %1126 }
 0x1fb   : > { %v935_v49 = vpop.permute.xlu1 %934 }
 0x1fc   : > { %v929_v27 = vpop.permute.xlu0 %928  ;;  %v1230_v35 = vsel %vm1216_vm6, %v1213_v8, %v935_v49 }
 0x1fd   : > { %v1227_v13 = vsel %vm1216_vm6, %v1210_v29, %v929_v27  ;;  %v1247_v41 = vsel %vm1233_vm7, %v1230_v35, %v999_v39 }
 0x202   : > { %v867_v32 = vpop.permute.xlu2 %866 }
 0x203   : > { %v993_v44 = vpop.permute.xlu1 %992 }
 0x204   : > { %v1049_v58 = vpop.permute.xlu0 %1048  ;;  %v1244_v0 = vsel %vm1233_vm7, %v1227_v13, %v993_v44 }
 0x205   : > { %v1363_v7 = vpop.f32.mrf.mxu0  ;;  %v1257_v9 = vsel %vm1250_vm8, %v1240_v59, %v1049_v58  ;;  %v1261_v15 = vsel %vm1250_vm8, %v1244_v0, %v1057_v46 }
 0x206   : > { %v1364_v47 = vadd.f32 %v2857_v22, %v1363_v7 }
 0x208   : > { %1411 = vst.msk [vmem:[%s2037_s17] sm:$0xff] %vm1165_vm2, %v1364_v47  ;;  %v1466_v16 = vmul.f32 %v1364_v47, %v1364_v47  ;;  %v1427_v37 = vsel %vm1165_vm2, %v1364_v47, 0.0 }
 0x20a   : > { %v931_v53 = vpop.permute.xlu2 %930  ;;  %v1482_v33 = vsel %vm1165_vm2, %v1466_v16, 0.0 }
 0x20b   : > { %v1113_v23 = vpop.permute.xlu1 %1112 }
 0x20c   : > { %v1107_v34 = vpop.permute.xlu0 %1106  ;;  %v1274_v31 = vsel %vm1267_vm9, %v1257_v9, %v1113_v23 }
 0x20d   : > { %v1271_v62 = vsel %vm1267_vm9, %v1254_v50, %v1107_v34  ;;  %1825 = vmatmul.msk.f32.gmra.mxu1 %vm1293_vm10, %v1274_v31 }
 0x20e   : > { %1822 = vmatmul.msk.f32.gmra.mxu0 %vm1293_vm10, %v1271_v62 }
 0x20f   : > { %v1375_v14 = vpop.f32.mrf.mxu1 }
 0x210   : > { %v2883_v5 = vadd.f32 %v2857_v22, %v1375_v14 }
 0x212   : > { %1415 = vst.msk [vmem:[%s2037_s17 + $0x20] sm:$0xff] %vm1165_vm2, %v2883_v5  ;;  %v995_v57 = vpop.permute.xlu2 %994 }
 0x213   : > { %v1121_v18 = vpop.permute.xlu1 %1120 }
 0x214   : > { %v1063_v48 = vpop.permute.xlu0 %1062  ;;  %v1278_v28 = vsel %vm1267_vm9, %v1261_v15, %v1121_v18 }
 0x215   : > { %v1264_v2 = vsel %vm1250_vm8, %v1247_v41, %v1063_v48  ;;  %1829 = vmatmul.msk.f32.gmra.mxu2 %vm1293_vm10, %v1278_v28 }
 0x216   : > { %v1281_v19 = vsel %vm1267_vm9, %v1264_v2, %v1127_v42 }
 0x217   : > { %1832 = vmatmul.msk.f32.gmra.mxu3 %vm1293_vm10, %v1281_v19 }
 0x21a   : > { %v1059_v36 = vpop.permute.xlu2 %1058 }
 0x21b   : > { %v923_v40 = vpop.permute.xlu1 %922 }
 0x21c   : > { %v859_v61 = vpop.permute.xlu0 %858 }
 0x21d   : > { %v1207_v38 = vsel %vm1199_vm5, %v2673_v25, %v859_v61  ;;  %v1211_v25 = vsel %vm1199_vm5, %v2689_v20, %v867_v32 }
 0x21e   : > { %v1224_v1 = vsel %vm1216_vm6, %v1207_v38, %v923_v40  ;;  %v1228_v58 = vsel %vm1216_vm6, %v1211_v25, %v931_v53 }
 0x21f   : > { %v1245_v7 = vsel %vm1233_vm7, %v1228_v58, %v995_v57 }
 0x220   : > { %v1262_v47 = vsel %vm1250_vm8, %v1245_v7, %v1059_v36 }
 0x222   : > { %v1366_v63 = vpop.f32.mrf.mxu0  ;;  %v1129_v51 = vpop.permute.xlu2 %1128 }
 0x223   : > { %v1367_v17 = vadd.f32 %v2857_v22, %v1366_v63  ;;  %v987_v24 = vpop.permute.xlu1 %986 }
 0x224   : > { %v873_v55 = vpop.permute.xlu0 %872  ;;  %v1241_v30 = vsel %vm1233_vm7, %v1224_v1, %v987_v24  ;;  %v1470_v24 = vmul.f32 %v2883_v5, %v2883_v5 }
 0x225   : > { %1412 = vst.msk [vmem:[%s2037_s17 + $0x8] sm:$0xff] %vm1165_vm2, %v1367_v17  ;;  %v1428_v43 = vsel %vm1165_vm2, %v1367_v17, 0.0  ;;  %v1467_v10 = vmul.f32 %v1367_v17, %v1367_v17  ;;  %v1214_v60 = vsel %vm1199_vm5, %v2706_v4, %v873_v55 }
 0x226   : > { %v1429_v6 = vadd.f32 %v1428_v43, %v1427_v37  ;;  %v1489_v57 = vsel %vm1165_vm2, %v1470_v24, 0.0 }
 0x227   : > { %v1483_v45 = vsel %vm1165_vm2, %v1467_v10, 0.0  ;;  %v1434_v10 = vsel %vm1165_vm2, %v2883_v5, 0.0 }
 0x228   : > { %v1484_v54 = vadd.f32 %v1483_v45, %v1482_v33 }
 0x22a   : > { %v1003_v31 = vpop.permute.xlu2 %1002 }
 0x22b   : > { %v1051_v3 = vpop.permute.xlu1 %1050 }
 0x22c   : > { %v937_v21 = vpop.permute.xlu0 %936  ;;  %v1258_v39 = vsel %vm1250_vm8, %v1241_v30, %v1051_v3 }
 0x22d   : > { %v1231_v12 = vsel %vm1216_vm6, %v1214_v60, %v937_v21 }
 0x232   : > { %v1387_v52 = vpop.f32.mrf.mxu2 }
 0x233   : > { %v2909_v49 = vadd.f32 %v2857_v22, %v1387_v52  ;;  %v1115_v27 = vpop.permute.xlu1 %1114 }
 0x234   : > { %v1001_v46 = vpop.permute.xlu0 %1000  ;;  %v1275_v44 = vsel %vm1267_vm9, %v1258_v39, %v1115_v27 }
 0x235   : > { %1419 = vst.msk [vmem:[%s2037_s17 + $0x40] sm:$0xff] %vm1165_vm2, %v2909_v49  ;;  %1826 = vmatmul.msk.f32.gmra.mxu1 %vm1293_vm10, %v1275_v44  ;;  %v1248_v26 = vsel %vm1233_vm7, %v1231_v12, %v1001_v46  ;;  %v1474_v7 = vmul.f32 %v2909_v49, %v2909_v49 }
 0x23b   : > { %v1123_v56 = vpop.permute.xlu1 %1122 }
 0x23c   : > { %v1065_v59 = vpop.permute.xlu0 %1064  ;;  %v1279_v42 = vsel %vm1267_vm9, %v1262_v47, %v1123_v56 }
 0x23d   : > { %v1265_v20 = vsel %vm1250_vm8, %v1248_v26, %v1065_v59  ;;  %1830 = vmatmul.msk.f32.gmra.mxu2 %vm1293_vm10, %v1279_v42  ;;  %v1442_v26 = vsel %vm1165_vm2, %v2909_v49, 0.0 }
 0x23e   : > { %v1282_v9 = vsel %vm1267_vm9, %v1265_v20, %v1129_v51 }
 0x23f   : > { %1833 = vmatmul.msk.f32.gmra.mxu3 %vm1293_vm10, %v1282_v9 }
 0x243   : > { %v939_v4 = vpop.permute.xlu1 %938 }
 0x244   : > { %v875_v23 = vpop.permute.xlu0 %874 }
 0x245   : > { %v1215_v34 = vsel %vm1199_vm5, %v2643_v11, %v875_v23 }
 0x246   : > { %v1232_v50 = vsel %vm1216_vm6, %v1215_v34, %v939_v4  ;;  %v1497_v4 = vsel %vm1165_vm2, %v1474_v7, 0.0 }
 0x247   : > { %v1249_v13 = vsel %vm1233_vm7, %v1232_v50, %v1003_v31 }
 0x24b   : > { %v1378_v62 = vpop.f32.mrf.mxu1  ;;  %v1131_v29 = vpop.permute.xlu1 %1130 }
 0x24c   : > { %v1067_v14 = vpop.permute.xlu0 %1066  ;;  %v1379_v8 = vadd.f32 %v2857_v22, %v1378_v62 }
 0x24d   : > { %v1266_v0 = vsel %vm1250_vm8, %v1249_v13, %v1067_v14 }
 0x24e   : > { %1416 = vst.msk [vmem:[%s2037_s17 + $0x28] sm:$0xff] %vm1165_vm2, %v1379_v8  ;;  %v1283_v35 = vsel %vm1267_vm9, %v1266_v0, %v1131_v29  ;;  %v1436_v3 = vsel %vm1165_vm2, %v1379_v8, 0.0 }
 0x24f   : > { %1834 = vmatmul.msk.f32.gmra.mxu3 %vm1293_vm10, %v1283_v35 }
 0x252   : > { %v1369_v11 = vpop.f32.mrf.mxu0 }
 0x253   : > { %v1370_v18 = vadd.f32 %v2857_v22, %v1369_v11 }
 0x255   : > { %1413 = vst.msk [vmem:[%s2037_s17 + $0x10] sm:$0xff] %vm1165_vm2, %v1370_v18  ;;  %v1430_v15 = vsel %vm1165_vm2, %v1370_v18, 0.0  ;;  %v1468_v48 = vmul.f32 %v1370_v18, %v1370_v18 }
 0x256   : > { %v1431_v41 = vadd.f32 %v1430_v15, %v1429_v6  ;;  %v1471_v6 = vmul.f32 %v1379_v8, %v1379_v8 }
 0x257   : > { %v1485_v28 = vsel %vm1165_vm2, %v1468_v48, 0.0 }
 0x258   : > { %v1486_v32 = vadd.f32 %v1485_v28, %v1484_v54  ;;  %v1491_v1 = vsel %vm1165_vm2, %v1471_v6, 0.0 }
 0x262   : > { %v1390_v2 = vpop.f32.mrf.mxu2 }
 0x263   : > { %v1391_v19 = vadd.f32 %v2857_v22, %v1390_v2 }
 0x265   : > { %1420 = vst.msk [vmem:[%s2037_s17 + $0x48] sm:$0xff] %vm1165_vm2, %v1391_v19  ;;  %v1475_v59 = vmul.f32 %v1391_v19, %v1391_v19  ;;  %v1444_v23 = vsel %vm1165_vm2, %v1391_v19, 0.0 }
 0x267   : > { %v1499_v31 = vsel %vm1165_vm2, %v1475_v59, 0.0 }
 0x269   : > { %v1399_v40 = vpop.f32.mrf.mxu3 }
 0x26a   : > { %v2949_v61 = vadd.f32 %v2857_v22, %v1399_v40 }
 0x26c   : > { %1423 = vst.msk [vmem:[%s2037_s17 + $0x60] sm:$0xff] %vm1165_vm2, %v2949_v61  ;;  %v1478_v8 = vmul.f32 %v2949_v61, %v2949_v61 }
 0x28a   : > { %v1381_v53 = vpop.f32.mrf.mxu1 }
 0x28b   : > { %v1372_v63 = vpop.f32.mrf.mxu0  ;;  %v1382_v16 = vadd.f32 %v2857_v22, %v1381_v53  ;;  %v1505_v53 = vsel %vm1165_vm2, %v1478_v8, 0.0 }
 0x28c   : > { %v1373_v17 = vadd.f32 %v2857_v22, %v1372_v63 }
 0x28d   : > { %1417 = vst.msk [vmem:[%s2037_s17 + $0x30] sm:$0xff] %vm1165_vm2, %v1382_v16  ;;  %v1472_v27 = vmul.f32 %v1382_v16, %v1382_v16  ;;  %v1438_v44 = vsel %vm1165_vm2, %v1382_v16, 0.0 }
 0x28e   : > { %1414 = vst.msk [vmem:[%s2037_s17 + $0x18] sm:$0xff] %vm1165_vm2, %v1373_v17  ;;  %v1432_v55 = vsel %vm1165_vm2, %v1373_v17, 0.0  ;;  %v1469_v37 = vmul.f32 %v1373_v17, %v1373_v17 }
 0x28f   : > { %v1433_v43 = vadd.f32 %v1432_v55, %v1431_v41  ;;  %v1493_v60 = vsel %vm1165_vm2, %v1472_v27, 0.0 }
 0x290   : > { %v1487_v33 = vsel %vm1165_vm2, %v1469_v37, 0.0 }
 0x291   : > { %v1435_v45 = vadd.f32 %v1434_v10, %v1433_v43  ;;  %v1488_v54 = vadd.f32 %v1487_v33, %v1486_v32  ;;  %v1450_v32 = vsel %vm1165_vm2, %v2949_v61, 0.0 }
 0x293   : > { %v1490_v21 = vadd.f32 %v1489_v57, %v1488_v54  ;;  %v1437_v38 = vadd.f32 %v1436_v3, %v1435_v45 }
 0x295   : > { %v1492_v30 = vadd.f32 %v1491_v1, %v1490_v21  ;;  %v1439_v58 = vadd.f32 %v1438_v44, %v1437_v38 }
 0x297   : > { %v1494_v56 = vadd.f32 %v1493_v60, %v1492_v30 }
 0x298   : > { %v1393_v52 = vpop.f32.mrf.mxu2 }
 0x299   : > { %v1394_v36 = vadd.f32 %v2857_v22, %v1393_v52 }
 0x29a   : > { %v1402_v5 = vpop.f32.mrf.mxu3 }
 0x29b   : > { %1421 = vst.msk [vmem:[%s2037_s17 + $0x50] sm:$0xff] %vm1165_vm2, %v1394_v36  ;;  %v1403_v39 = vadd.f32 %v2857_v22, %v1402_v5  ;;  %v1476_v29 = vmul.f32 %v1394_v36, %v1394_v36  ;;  %v1446_v49 = vsel %vm1165_vm2, %v1394_v36, 0.0 }
 0x29d   : > { %1424 = vst.msk [vmem:[%s2037_s17 + $0x68] sm:$0xff] %vm1165_vm2, %v1403_v39  ;;  %v1501_v11 = vsel %vm1165_vm2, %v1476_v29, 0.0  ;;  %v1479_v16 = vmul.f32 %v1403_v39, %v1403_v39  ;;  %v1452_v17 = vsel %vm1165_vm2, %v1403_v39, 0.0 }
 0x29f   : > { %v1507_v55 = vsel %vm1165_vm2, %v1479_v16, 0.0 }
 0x2b2   : > { %v1384_v46 = vpop.f32.mrf.mxu1 }
 0x2b3   : > { %v1385_v25 = vadd.f32 %v2857_v22, %v1384_v46 }
 0x2b5   : > { %1418 = vst.msk [vmem:[%s2037_s17 + $0x38] sm:$0xff] %vm1165_vm2, %v1385_v25  ;;  %v1440_v47 = vsel %vm1165_vm2, %v1385_v25, 0.0  ;;  %v1473_v12 = vmul.f32 %v1385_v25, %v1385_v25 }
 0x2b6   : > { %v1441_v51 = vadd.f32 %v1440_v47, %v1439_v58 }
 0x2b7   : > { %v1495_v42 = vsel %vm1165_vm2, %v1473_v12, 0.0 }
 0x2b8   : > { %v1443_v20 = vadd.f32 %v1442_v26, %v1441_v51  ;;  %v1496_v9 = vadd.f32 %v1495_v42, %v1494_v56 }
 0x2ba   : > { %v1498_v34 = vadd.f32 %v1497_v4, %v1496_v9  ;;  %v1445_v50 = vadd.f32 %v1444_v23, %v1443_v20 }
 0x2bc   : > { %v1500_v62 = vadd.f32 %v1499_v31, %v1498_v34  ;;  %v1447_v0 = vadd.f32 %v1446_v49, %v1445_v50 }
 0x2be   : > { %v1502_v28 = vadd.f32 %v1501_v11, %v1500_v62 }
 0x2c0   : > { %v1396_v13 = vpop.f32.mrf.mxu2 }
 0x2c1   : > { %v1397_v14 = vadd.f32 %v2857_v22, %v1396_v13 }
 0x2c2   : > { %v1405_v35 = vpop.f32.mrf.mxu3 }
 0x2c3   : > { %1422 = vst.msk [vmem:[%s2037_s17 + $0x58] sm:$0xff] %vm1165_vm2, %v1397_v14  ;;  %v1448_v18 = vsel %vm1165_vm2, %v1397_v14, 0.0  ;;  %v1477_v15 = vmul.f32 %v1397_v14, %v1397_v14  ;;  %v1406_v48 = vadd.f32 %v2857_v22, %v1405_v35 }
 0x2c4   : > { %v1449_v41 = vadd.f32 %v1448_v18, %v1447_v0 }
 0x2c5   : > { %v1503_v2 = vsel %vm1165_vm2, %v1477_v15, 0.0  ;;  %1425 = vst.msk [vmem:[%s2037_s17 + $0x70] sm:$0xff] %vm1165_vm2, %v1406_v48  ;;  %v1480_v37 = vmul.f32 %v1406_v48, %v1406_v48  ;;  %v1454_v61 = vsel %vm1165_vm2, %v1406_v48, 0.0 }
 0x2c6   : > { %v1451_v19 = vadd.f32 %v1450_v32, %v1449_v41  ;;  %v1504_v40 = vadd.f32 %v1503_v2, %v1502_v28 }
 0x2c7   : > { %v1509_v45 = vsel %vm1165_vm2, %v1480_v37, 0.0 }
 0x2c8   : > { %v1506_v63 = vadd.f32 %v1505_v53, %v1504_v40  ;;  %v1453_v24 = vadd.f32 %v1452_v17, %v1451_v19 }
 0x2ca   : > { %v1508_v43 = vadd.f32 %v1507_v55, %v1506_v63  ;;  %v1455_v33 = vadd.f32 %v1454_v61, %v1453_v24 }
 0x2cc   : > { %v1510_v3 = vadd.f32 %v1509_v45, %v1508_v43 }
 0x2d2   : > { %v1408_v10 = vpop.f32.mrf.mxu3 }
 0x2d3   : > { %v1409_v6 = vadd.f32 %v2857_v22, %v1408_v10 }
 0x2d5   : > { %1426 = vst.msk [vmem:[%s2037_s17 + $0x78] sm:$0xff] %vm1165_vm2, %v1409_v6  ;;  %v1456_v54 = vsel %vm1165_vm2, %v1409_v6, 0.0  ;;  %v1481_v57 = vmul.f32 %v1409_v6, %v1409_v6 }
 0x2d6   : > { %v1457_v21 = vadd.f32 %v1456_v54, %v1455_v33 }
 0x2d7   : > { %v1511_v38 = vsel %vm1165_vm2, %v1481_v57, 0.0 }
 0x2d8   : > { %v1458_v1 = vrot.slane %v1457_v21, 4  ;;  %v1512_v30 = vadd.f32 %v1511_v38, %v1510_v3 }
 0x2da   : > { %v1459_v52 = vadd.f32 %v1458_v1, %v1457_v21  ;;  %v1513_v36 = vrot.slane %v1512_v30, 4 }
 0x2dc   : > { %v1460_v5 = vrot.slane %v1459_v52, 2  ;;  %v1514_v22 = vadd.f32 %v1513_v36, %v1512_v30 }
 0x2de   : > { %v1461_v39 = vadd.f32 %v1460_v5, %v1459_v52  ;;  %v1515_v27 = vrot.slane %v1514_v22, 2 }
 0x2e0   : > { %v1462_v46 = vrot.slane %v1461_v39, 1  ;;  %v1516_v44 = vadd.f32 %v1515_v27, %v1514_v22 }
 0x2e2   : > { %v1463_v25 = vadd.f32 %v1462_v46, %v1461_v39  ;;  %v1517_v58 = vrot.slane %v1516_v44, 1 }
 0x2e4   : > { %1465 = vst.msk [vmem:[%s333_s23] sm:$0x1] %vm1464_vm11, %v1463_v25  ;;  %v1518_v7 = vadd.f32 %v1517_v58, %v1516_v44 }
 0x2e6   : > { %1519 = vst.msk [vmem:[%s340_s29] sm:$0x1] %vm1464_vm11, %v1518_v7 }
 0x2e7 PF: > { %s18_s26 = sadd.s32 1, %s1944_s26   ;;  %s3046_s24 = smov %s1936_s2 }
 0x2e8   : > { %p15_p9 = scmp.ge.s32.totalorder %s18_s26, 6   ;;  %s3047_s1 = smov %s1940_s25 }
 0x2e9   : > { %s3048_s2 = smov %s3051_s27  ;;  %s3049_s25 = smov %s3055_s28 }
 0x2ea   :  { %17 = sbr.rel (!%p15_p9) target bundleno = 3 (0x3), region = 102 }

// kernel: down_forward.4
= control target key start
LH: loop header
LB: loop body
LE: loop exit
PB: predicated region body
PF: predicated region fallthrough
CT: control target
= control target key end

     0   :  { %s2112_s24 = smov 0   ;;  %s2114_s25 = smov 0   ;;  %s3244_s0 = inlined_call_operand.vmem [shape: f32[2,16,16,8], index: 0, kind: input, shape index: {}]   ;;  %s3245_s1 = inlined_call_operand.vmem [shape: f32[1,8], index: 1, kind: input, shape index: {}]   ;;  %s3246_s2 = inlined_call_operand.vmem [shape: f32[1,8], index: 2, kind: input, shape index: {}]   ;;  %s3247_s3 = inlined_call_operand.vmem [shape: f32[72,8], index: 3, kind: input, shape index: {}]   ;;  %s3248_s4 = inlined_call_operand.vmem [shape: f32[1,8], index: 4, kind: input, shape index: {}]   ;;  %s3249_s5 = inlined_call_operand.vmem [shape: f32[2,16,16,8], index: 5, kind: output, shape index: {0}]   ;;  %s3250_s6 = inlined_call_operand.vmem [shape: f32[2,2,1,8], index: 6, kind: output, shape index: {1}]   ;;  %s3251_s7 = inlined_call_operand.vmem [shape: f32[2,2,1,8], index: 7, kind: output, shape index: {2}]  }
   0x1   :  { %s2116_s26 = smov 0   ;;  %s2118_s27 = smov 0  }
   0x2   :  { %s2120_s28 = smov 0  }
   0x3 LB: > { %s27_s29 = sadd.s32 1, %s2053_s26  ;;  %s30_s30 = sadd.s32 1, %s2057_s27  ;;  %s2061_s28 = sphi %s2120_s28, %s18_s28   ;;  %s2057_s27 = sphi %s2118_s27, %s3257_s27   ;;  %s2053_s26 = sphi %s2116_s26, %s3256_s26   ;;  %s2049_s25 = sphi %s2114_s25, %s3255_s25   ;;  %s2045_s24 = sphi %s2112_s24, %s3254_s24  }
   0x4   : > { %p28_p0 = scmp.ge.s32.totalorder %s27_s29, 2  ;;  %p1810_p1 = scmp.ge.s32.totalorder %s2061_s28, 1 }
   0x5   : > { %p260_p2 = scmp.lt.s32.totalorder %s2061_s28, 5 }
   0x6   : > { %s3259_s29 = smov (%p28_p0, %s27_s29), 0  ;;  %s3261_s30 = smov (!%p28_p0, %s30_s30), %s2057_s27 }
   0x7   : > { %p261_p3 = pnand %p1810_p1, %p260_p2  ;;  %p32_p4 = scmp.ge.s32.totalorder %s3261_s30, 2 }
   0x8   : > { %p311_p5 = scmp.lt.s32.totalorder (!%p261_p3), %s2049_s25, 1  ;;  %s1813_s8 = sshll.u32 (!%p261_p3), %s2045_s24, 3 }
   0x9   : > { %s3263_s30 = smov (%p32_p4, %s3261_s30), 0  ;;  %264 = sbr.rel (%p261_p3) target bundleno = 743 (0x2e7), region = 40 }
   0xa   : > { %3252 = sst [smem:[#allocation3_spill]] %s3263_s30  ;;  %p319_p6 = scmp.lt.s32.totalorder (!%p261_p3), %s1813_s8, 15 }
   0xb   : > { %p329_p7 = scmp.lt.s32.totalorder (!%p261_p3), %s2045_s24, 1  ;;  %p1819_p8 = scmp.ne.s32.totalorder (!%p261_p3), %s2045_s24, 0 }
   0xe   : > { %s3265_s25 = smov (!%p311_p5, %s2049_s25), 1  ;;  %s3267_s8 = smov (!%p319_p6, %s1813_s8), 15 }
   0xf   : > { %s1940_s9 = sshll.u32 %s3265_s25, 8  ;;  %s1815_s10 = sshll.u32 %s3265_s25, 5 }
  0x10   : > { %s2149_s13 = scalar_lea.vmem %s3244_s0, %s1940_s9  ;;  %s1814_s14 = sshll.u32 %s3267_s8, 1 }
  0x11   : > { %s323_s15 = sadd.s32 %s1815_s10, %s1814_s14  ;;  %s1817_s20 = sshll.u32 %s3265_s25, 1 }
  0x12   : > { %s1816_s16 = sshll.u32 %s323_s15, 3 }
  0x13   : > { %s2154_s19 = scalar_lea.vmem %s3249_s5, %s1816_s16  ;;  %344 = sbr.rel (%p1819_p8) target bundleno = 129 (0x81), region = 44 }
  0x14   : > { %s330_s21 = scalar_select %p329_p7, %s2045_s24, 1 }
  0x16   : > { %s2157_s22 = sadd.s32 %s1817_s20, %s330_s21 }
  0x17   : > { %s333_s11 = scalar_lea.vmem %s3250_s6, %s2157_s22  ;;  %s340_s8 = scalar_lea.vmem %s3251_s7, %s2157_s22 }
  0x18   : > { %vm345_vm0 = vcmask 64512   ;;  %v2063_v0 = vmov 0.0   ;;  %v2285_v1 = vld [vmem:[%s3245_s1] ss:$0 sm:$0xff]  ;;  %v419_v3 = vld [vmem:[%s2149_s13 + $0x8] sm:$0xff]  ;;  %v420_v4 = vld [vmem:[%s2149_s13 + $0x10] sm:$0xff] }
  0x19   : > { %351 = vst.msk [vmem:[#allocation2 + $0x28] sm:$0xff] %vm345_vm0, %v2063_v0  ;;  %v418_v2 = vld [vmem:[%s2149_s13] sm:$0xff]  ;;  %v421_v7 = vld [vmem:[%s2149_s13 + $0x18] sm:$0xff]  ;;  %v455_v8 = vmul.f32 %v2285_v1, %v419_v3  ;;  %v456_v10 = vmul.f32 %v2285_v1, %v420_v4  ;;  %v423_v11 = vld [vmem:[%s2149_s13 + $0x28] sm:$0xff] }
  0x1a   : > { %346 = vst.msk [vmem:[#allocation2] sm:$0xff] %vm345_vm0, %v2063_v0  ;;  %v454_v5 = vmul.f32 %v2285_v1, %v418_v2  ;;  %v2302_v6 = vld [vmem:[%s3246_s2] ss:$0 sm:$0xff]  ;;  %v457_v12 = vmul.f32 %v2285_v1, %v421_v7  ;;  %v424_v13 = vld [vmem:[%s2149_s13 + $0x30] sm:$0xff]  ;;  %v425_v16 = vld [vmem:[%s2149_s13 + $0x38] sm:$0xff]  ;;  %v459_v18 = vmul.f32 %v2285_v1, %v423_v11 }
  0x1b   : > { %347 = vst.msk [vmem:[#allocation2 + $0x8] sm:$0xff] %vm345_vm0, %v2063_v0  ;;  %v422_v9 = vld [vmem:[%s2149_s13 + $0x20] sm:$0xff]  ;;  %v491_v17 = vadd.f32 %v2302_v6, %v455_v8  ;;  %v492_v20 = vadd.f32 %v2302_v6, %v456_v10  ;;  %v460_v21 = vmul.f32 %v2285_v1, %v424_v13  ;;  %v427_v22 = vld [vmem:[%s2149_s13 + $0x48] sm:$0xff]  ;;  %v461_v24 = vmul.f32 %v2285_v1, %v425_v16  ;;  %v428_v25 = vld [vmem:[%s2149_s13 + $0x50] sm:$0xff] }
  0x1c   : > { %348 = vst.msk [vmem:[#allocation2 + $0x10] sm:$0xff] %vm345_vm0, %v2063_v0  ;;  %v490_v14 = vadd.f32 %v2302_v6, %v454_v5  ;;  %v458_v15 = vmul.f32 %v2285_v1, %v422_v9  ;;  %v426_v19 = vld [vmem:[%s2149_s13 + $0x40] sm:$0xff]  ;;  %v493_v23 = vadd.f32 %v2302_v6, %v457_v12  ;;  %v429_v29 = vld [vmem:[%s2149_s13 + $0x58] sm:$0xff]  ;;  %v495_v31 = vadd.f32 %v2302_v6, %v459_v18  ;;  %v431_v37 = vld [vmem:[%s2149_s13 + $0x68] sm:$0xff] }
  0x1d   : > { %349 = vst.msk [vmem:[#allocation2 + $0x18] sm:$0xff] %vm345_vm0, %v2063_v0  ;;  %v462_v28 = vmul.f32 %v2285_v1, %v426_v19  ;;  %v523_v30 = vmax.f32 %v491_v17, 0.0  ;;  %v463_v32 = vmul.f32 %v2285_v1, %v427_v22  ;;  %v430_v33 = vld [vmem:[%s2149_s13 + $0x60] sm:$0xff]  ;;  %v524_v34 = vmax.f32 %v492_v20, 0.0  ;;  %v432_v41 = vld [vmem:[%s2149_s13 + $0x70] sm:$0xff]  ;;  %v433_v45 = vld [vmem:[%s2149_s13 + $0x78] sm:$0xff] }
  0x1e   : > { %350 = vst.msk [vmem:[#allocation2 + $0x20] sm:$0xff] %vm345_vm0, %v2063_v0  ;;  %v522_v26 = vmax.f32 %v490_v14, 0.0  ;;  %v494_v27 = vadd.f32 %v2302_v6, %v458_v15  ;;  %v496_v35 = vadd.f32 %v2302_v6, %v460_v21  ;;  %v464_v36 = vmul.f32 %v2285_v1, %v428_v25  ;;  %v434_v49 = vld [vmem:[%s2149_s13 + $0x80] sm:$0xff]  ;;  %v435_v53 = vld [vmem:[%s2149_s13 + $0x88] sm:$0xff]  ;;  %v436_v57 = vld [vmem:[%s2149_s13 + $0x90] sm:$0xff] }
  0x1f   : > { %352 = vst.msk [vmem:[#allocation2 + $0x30] sm:$0xff] %vm345_vm0, %v2063_v0  ;;  %v525_v38 = vmax.f32 %v493_v23, 0.0  ;;  %v497_v39 = vadd.f32 %v2302_v6, %v461_v24  ;;  %v465_v40 = vmul.f32 %v2285_v1, %v429_v29  ;;  %v498_v43 = vadd.f32 %v2302_v6, %v462_v28  ;;  %v437_v61 = vld [vmem:[%s2149_s13 + $0x98] sm:$0xff]  ;;  %v438_v2 = vld [vmem:[%s2149_s13 + $0xa0] sm:$0xff]  ;;  %v439_v7 = vld [vmem:[%s2149_s13 + $0xa8] sm:$0xff] }
  0x20   : > { %353 = vst.msk [vmem:[#allocation2 + $0x38] sm:$0xff] %vm345_vm0, %v2063_v0  ;;  %v526_v42 = vmax.f32 %v494_v27, 0.0  ;;  %v466_v44 = vmul.f32 %v2285_v1, %v430_v33  ;;  %v527_v46 = vmax.f32 %v495_v31, 0.0  ;;  %v499_v47 = vadd.f32 %v2302_v6, %v463_v32  ;;  %v440_v11 = vld [vmem:[%s2149_s13 + $0xb0] sm:$0xff]  ;;  %v441_v15 = vld [vmem:[%s2149_s13 + $0xb8] sm:$0xff]  ;;  %v442_v19 = vld [vmem:[%s2149_s13 + $0xc0] sm:$0xff] }
  0x21   : > { %354 = vst.msk [vmem:[#allocation2 + $0x40] sm:$0xff] %vm345_vm0, %v2063_v0  ;;  %v467_v48 = vmul.f32 %v2285_v1, %v431_v37  ;;  %v528_v50 = vmax.f32 %v496_v35, 0.0  ;;  %v500_v51 = vadd.f32 %v2302_v6, %v464_v36  ;;  %v468_v52 = vmul.f32 %v2285_v1, %v432_v41  ;;  %v443_v23 = vld [vmem:[%s2149_s13 + $0xc8] sm:$0xff]  ;;  %v444_v27 = vld [vmem:[%s2149_s13 + $0xd0] sm:$0xff]  ;;  %v445_v31 = vld [vmem:[%s2149_s13 + $0xd8] sm:$0xff] }
  0x22   : > { %355 = vst.msk [vmem:[#allocation2 + $0x48] sm:$0xff] %vm345_vm0, %v2063_v0  ;;  %v529_v54 = vmax.f32 %v497_v39, 0.0  ;;  %v501_v55 = vadd.f32 %v2302_v6, %v465_v40  ;;  %v469_v56 = vmul.f32 %v2285_v1, %v433_v45  ;;  %v530_v58 = vmax.f32 %v498_v43, 0.0  ;;  %v446_v35 = vld [vmem:[%s2149_s13 + $0xe0] sm:$0xff]  ;;  %v447_v39 = vld [vmem:[%s2149_s13 + $0xe8] sm:$0xff]  ;;  %v448_v43 = vld [vmem:[%s2149_s13 + $0xf0] sm:$0xff] }
  0x23   : > { %356 = vst.msk [vmem:[#allocation2 + $0x50] sm:$0xff] %vm345_vm0, %v2063_v0  ;;  %v502_v59 = vadd.f32 %v2302_v6, %v466_v44  ;;  %v470_v60 = vmul.f32 %v2285_v1, %v434_v49  ;;  %v531_v62 = vmax.f32 %v499_v47, 0.0  ;;  %v503_v63 = vadd.f32 %v2302_v6, %v467_v48  ;;  %v449_v47 = vld [vmem:[%s2149_s13 + $0xf8] sm:$0xff] }
  0x24   : > { %357 = vst.msk [vmem:[#allocation2 + $0x58] sm:$0xff] %vm345_vm0, %v2063_v0  ;;  %v532_v3 = vmax.f32 %v500_v51, 0.0  ;;  %v504_v4 = vadd.f32 %v2302_v6, %v468_v52  ;;  %v472_v5 = vmul.f32 %v2285_v1, %v436_v57  ;;  %v533_v8 = vmax.f32 %v501_v55, 0.0 }
  0x25   : > { %358 = vst.msk [vmem:[#allocation2 + $0x60] sm:$0xff] %vm345_vm0, %v2063_v0  ;;  %v505_v9 = vadd.f32 %v2302_v6, %v469_v56  ;;  %v473_v10 = vmul.f32 %v2285_v1, %v437_v61  ;;  %v534_v12 = vmax.f32 %v502_v59, 0.0  ;;  %v506_v13 = vadd.f32 %v2302_v6, %v470_v60 }
  0x26   : > { %359 = vst.msk [vmem:[#allocation2 + $0x68] sm:$0xff] %vm345_vm0, %v2063_v0  ;;  %v474_v14 = vmul.f32 %v2285_v1, %v438_v2  ;;  %v535_v16 = vmax.f32 %v503_v63, 0.0  ;;  %v475_v18 = vmul.f32 %v2285_v1, %v439_v7  ;;  %v536_v20 = vmax.f32 %v504_v4, 0.0 }
  0x27   : > { %360 = vst.msk [vmem:[#allocation2 + $0x70] sm:$0xff] %vm345_vm0, %v2063_v0  ;;  %v508_v21 = vadd.f32 %v2302_v6, %v472_v5  ;;  %v476_v22 = vmul.f32 %v2285_v1, %v440_v11  ;;  %v537_v24 = vmax.f32 %v505_v9, 0.0  ;;  %v509_v25 = vadd.f32 %v2302_v6, %v473_v10 }
  0x28   : > { %361 = vst.msk [vmem:[#allocation2 + $0x78] sm:$0xff] %vm345_vm0, %v2063_v0  ;;  %v538_v28 = vmax.f32 %v506_v13, 0.0  ;;  %v510_v29 = vadd.f32 %v2302_v6, %v474_v14  ;;  %v511_v33 = vadd.f32 %v2302_v6, %v475_v18  ;;  %v485_v56 = vmul.f32 %v2285_v1, %v449_v47 }
  0x29   : > { %362 = vst.msk [vmem:[#allocation2 + $0x80] sm:$0xff] %vm345_vm0, %v2063_v0  ;;  %v540_v36 = vmax.f32 %v508_v21, 0.0  ;;  %v512_v37 = vadd.f32 %v2302_v6, %v476_v22  ;;  %v541_v40 = vmax.f32 %v509_v25, 0.0 }
  0x2a   : > { %363 = vst.msk [vmem:[#allocation2 + $0x88] sm:$0xff] %vm345_vm0, %v2063_v0  ;;  %v542_v44 = vmax.f32 %v510_v29, 0.0  ;;  %v543_v48 = vmax.f32 %v511_v33, 0.0 }
  0x2b   : > { %364 = vst.msk [vmem:[#allocation2 + $0x90] sm:$0xff] %vm345_vm0, %v2063_v0  ;;  %v544_v51 = vmax.f32 %v512_v37, 0.0 }
  0x2c   : > { %365 = vst.msk [vmem:[#allocation2 + $0x98] sm:$0xff] %vm345_vm0, %v2063_v0 }
  0x2d   : > { %366 = vst.msk [vmem:[#allocation2 + $0xa0] sm:$0xff] %vm345_vm0, %v2063_v0 }
  0x2e   : > { %367 = vst.msk [vmem:[#allocation2 + $0xa8] sm:$0xff] %vm345_vm0, %v2063_v0 }
  0x2f   : > { %368 = vst.msk [vmem:[#allocation2 + $0xb0] sm:$0xff] %vm345_vm0, %v2063_v0 }
  0x30   : > { %369 = vst.msk [vmem:[#allocation2 + $0xb8] sm:$0xff] %vm345_vm0, %v2063_v0 }
  0x31   : > { %370 = vst.msk [vmem:[#allocation2 + $0xc0] sm:$0xff] %vm345_vm0, %v2063_v0 }
  0x32   : > { %371 = vst.msk [vmem:[#allocation2 + $0xc8] sm:$0xff] %vm345_vm0, %v2063_v0 }
  0x33   : > { %372 = vst.msk [vmem:[#allocation2 + $0xd0] sm:$0xff] %vm345_vm0, %v2063_v0 }
  0x34   : > { %373 = vst.msk [vmem:[#allocation2 + $0xd8] sm:$0xff] %vm345_vm0, %v2063_v0 }
  0x35   : > { %374 = vst.msk [vmem:[#allocation2 + $0xe0] sm:$0xff] %vm345_vm0, %v2063_v0 }
  0x36   : > { %375 = vst.msk [vmem:[#allocation2 + $0xe8] sm:$0xff] %vm345_vm0, %v2063_v0 }
  0x37   : > { %376 = vst.msk [vmem:[#allocation2 + $0xf0] sm:$0xff] %vm345_vm0, %v2063_v0 }
  0x38   : > { %377 = vst.msk [vmem:[#allocation2 + $0xf8] sm:$0xff] %vm345_vm0, %v2063_v0 }
  0x39   : > { %378 = vst.msk [vmem:[#allocation2 + $0x100] sm:$0xff] %vm345_vm0, %v2063_v0 }
  0x3a   : > { %379 = vst.msk [vmem:[#allocation2 + $0x108] sm:$0xff] %vm345_vm0, %v2063_v0 }
  0x3b   : > { %380 = vst.msk [vmem:[#allocation2 + $0x110] sm:$0xff] %vm345_vm0, %v2063_v0 }
  0x3c   : > { %381 = vst.msk [vmem:[#allocation2 + $0x118] sm:$0xff] %vm345_vm0, %v2063_v0 }
  0x3d   : > { %382 = vst.msk [vmem:[#allocation2 + $0x120] sm:$0xff] %vm345_vm0, %v2063_v0 }
  0x3e   : > { %383 = vst.msk [vmem:[#allocation2 + $0x128] sm:$0xff] %vm345_vm0, %v2063_v0 }
  0x3f   : > { %384 = vst.msk [vmem:[#allocation2 + $0x130] sm:$0xff] %vm345_vm0, %v2063_v0 }
  0x40   : > { %385 = vst.msk [vmem:[#allocation2 + $0x138] sm:$0xff] %vm345_vm0, %v2063_v0 }
  0x41   : > { %386 = vst.msk [vmem:[#allocation2 + $0x140] sm:$0xff] %vm345_vm0, %v2063_v0 }
  0x42   : > { %387 = vst.msk [vmem:[#allocation2 + $0x148] sm:$0xff] %vm345_vm0, %v2063_v0 }
  0x43   : > { %388 = vst.msk [vmem:[#allocation2 + $0x150] sm:$0xff] %vm345_vm0, %v2063_v0 }
  0x44   : > { %389 = vst.msk [vmem:[#allocation2 + $0x158] sm:$0xff] %vm345_vm0, %v2063_v0 }
  0x45   : > { %390 = vst.msk [vmem:[#allocation2 + $0x160] sm:$0xff] %vm345_vm0, %v2063_v0 }
  0x46   : > { %391 = vst.msk [vmem:[#allocation2 + $0x168] sm:$0xff] %vm345_vm0, %v2063_v0 }
  0x47   : > { %392 = vst.msk [vmem:[#allocation2 + $0x170] sm:$0xff] %vm345_vm0, %v2063_v0 }
  0x48   : > { %393 = vst.msk [vmem:[#allocation2 + $0x178] sm:$0xff] %vm345_vm0, %v2063_v0 }
  0x49   : > { %394 = vst.msk [vmem:[#allocation2 + $0x180] sm:$0xff] %vm345_vm0, %v2063_v0 }
  0x4a   : > { %395 = vst.msk [vmem:[#allocation2 + $0x188] sm:$0xff] %vm345_vm0, %v2063_v0 }
  0x4b   : > { %396 = vst.msk [vmem:[#allocation2 + $0x190] sm:$0xff] %vm345_vm0, %v2063_v0 }
  0x4c   : > { %397 = vst.msk [vmem:[#allocation2 + $0x198] sm:$0xff] %vm345_vm0, %v2063_v0 }
  0x4d   : > { %398 = vst.msk [vmem:[#allocation2 + $0x1a0] sm:$0xff] %vm345_vm0, %v2063_v0 }
  0x4e   : > { %399 = vst.msk [vmem:[#allocation2 + $0x1a8] sm:$0xff] %vm345_vm0, %v2063_v0 }
  0x4f   : > { %400 = vst.msk [vmem:[#allocation2 + $0x1b0] sm:$0xff] %vm345_vm0, %v2063_v0 }
  0x50   : > { %401 = vst.msk [vmem:[#allocation2 + $0x1b8] sm:$0xff] %vm345_vm0, %v2063_v0 }
  0x51   : > { %402 = vst.msk [vmem:[#allocation2 + $0x1c0] sm:$0xff] %vm345_vm0, %v2063_v0 }
  0x52   : > { %403 = vst.msk [vmem:[#allocation2 + $0x1c8] sm:$0xff] %vm345_vm0, %v2063_v0 }
  0x53   : > { %404 = vst.msk [vmem:[#allocation2 + $0x1d0] sm:$0xff] %vm345_vm0, %v2063_v0 }
  0x54   : > { %405 = vst.msk [vmem:[#allocation2 + $0x1d8] sm:$0xff] %vm345_vm0, %v2063_v0 }
  0x55   : > { %406 = vst.msk [vmem:[#allocation2 + $0x1e0] sm:$0xff] %vm345_vm0, %v2063_v0 }
  0x56   : > { %407 = vst.msk [vmem:[#allocation2 + $0x1e8] sm:$0xff] %vm345_vm0, %v2063_v0 }
  0x57   : > { %408 = vst.msk [vmem:[#allocation2 + $0x1f0] sm:$0xff] %vm345_vm0, %v2063_v0 }
  0x58   : > { %409 = vst.msk [vmem:[#allocation2 + $0x1f8] sm:$0xff] %vm345_vm0, %v2063_v0 }
  0x59   : > { %410 = vst.msk [vmem:[#allocation2 + $0x200] sm:$0xff] %vm345_vm0, %v2063_v0 }
  0x5a   : > { %411 = vst.msk [vmem:[#allocation2 + $0x208] sm:$0xff] %vm345_vm0, %v2063_v0 }
  0x5b   : > { %412 = vst.msk [vmem:[#allocation2 + $0x210] sm:$0xff] %vm345_vm0, %v2063_v0 }
  0x5c   : > { %413 = vst.msk [vmem:[#allocation2 + $0x218] sm:$0xff] %vm345_vm0, %v2063_v0 }
  0x5d   : > { %414 = vst.msk [vmem:[#allocation2 + $0x220] sm:$0xff] %vm345_vm0, %v2063_v0 }
  0x5e   : > { %415 = vst.msk [vmem:[#allocation2 + $0x228] sm:$0xff] %vm345_vm0, %v2063_v0 }
  0x5f   : > { %416 = vst.msk [vmem:[#allocation2 + $0x230] sm:$0xff] %vm345_vm0, %v2063_v0 }
  0x60   : > { %417 = vst.msk [vmem:[#allocation2 + $0x238] sm:$0xff] %vm345_vm0, %v2063_v0  ;;  %v471_v0 = vmul.f32 %v2285_v1, %v435_v53  ;;  %v484_v53 = vmul.f32 %v2285_v1, %v448_v43 }
  0x61   : > { %555 = vst.msk [vmem:[#allocation2 + $0x28] sm:$0xff] %vm345_vm0, %v522_v26  ;;  %v477_v26 = vmul.f32 %v2285_v1, %v441_v15 }
  0x62   : > { %556 = vst.msk [vmem:[#allocation2 + $0x30] sm:$0xff] %vm345_vm0, %v523_v30  ;;  %v507_v17 = vadd.f32 %v2302_v6, %v471_v0  ;;  %v478_v30 = vmul.f32 %v2285_v1, %v442_v19 }
  0x63   : > { %557 = vst.msk [vmem:[#allocation2 + $0x48] sm:$0xff] %vm345_vm0, %v524_v34  ;;  %v479_v34 = vmul.f32 %v2285_v1, %v443_v23  ;;  %v513_v41 = vadd.f32 %v2302_v6, %v477_v26 }
  0x64   : > { %558 = vst.msk [vmem:[#allocation2 + $0x50] sm:$0xff] %vm345_vm0, %v525_v38  ;;  %v539_v32 = vmax.f32 %v507_v17, 0.0  ;;  %v480_v38 = vmul.f32 %v2285_v1, %v444_v27  ;;  %v514_v45 = vadd.f32 %v2302_v6, %v478_v30 }
  0x65   : > { %559 = vst.msk [vmem:[#allocation2 + $0x68] sm:$0xff] %vm345_vm0, %v526_v42  ;;  %v481_v42 = vmul.f32 %v2285_v1, %v445_v31  ;;  %v515_v49 = vadd.f32 %v2302_v6, %v479_v34 }
  0x66   : > { %560 = vst.msk [vmem:[#allocation2 + $0x70] sm:$0xff] %vm345_vm0, %v527_v46  ;;  %v482_v46 = vmul.f32 %v2285_v1, %v446_v35  ;;  %v516_v52 = vadd.f32 %v2302_v6, %v480_v38  ;;  %v546_v57 = vmax.f32 %v514_v45, 0.0 }
  0x67   : > { %561 = vst.msk [vmem:[#allocation2 + $0x88] sm:$0xff] %vm345_vm0, %v528_v50  ;;  %v483_v50 = vmul.f32 %v2285_v1, %v447_v39  ;;  %v517_v55 = vadd.f32 %v2302_v6, %v481_v42  ;;  %v547_v59 = vmax.f32 %v515_v49, 0.0  ;;  %v521_v1 = vadd.f32 %v2302_v6, %v485_v56 }
  0x68   : > { %562 = vst.msk [vmem:[#allocation2 + $0x90] sm:$0xff] %vm345_vm0, %v529_v54  ;;  %v545_v54 = vmax.f32 %v513_v41, 0.0  ;;  %v548_v61 = vmax.f32 %v516_v52, 0.0 }
  0x69   : > { %563 = vst.msk [vmem:[#allocation2 + $0xa8] sm:$0xff] %vm345_vm0, %v530_v58  ;;  %v518_v58 = vadd.f32 %v2302_v6, %v482_v46  ;;  %v519_v60 = vadd.f32 %v2302_v6, %v483_v50  ;;  %v549_v63 = vmax.f32 %v517_v55, 0.0  ;;  %v553_v4 = vmax.f32 %v521_v1, 0.0 }
  0x6a   : > { %564 = vst.msk [vmem:[#allocation2 + $0xb0] sm:$0xff] %vm345_vm0, %v531_v62  ;;  %v520_v62 = vadd.f32 %v2302_v6, %v484_v53 }
  0x6b   : > { %565 = vst.msk [vmem:[#allocation2 + $0xc8] sm:$0xff] %vm345_vm0, %v532_v3  ;;  %v550_v0 = vmax.f32 %v518_v58, 0.0  ;;  %v551_v2 = vmax.f32 %v519_v60, 0.0 }
  0x6c   : > { %566 = vst.msk [vmem:[#allocation2 + $0xd0] sm:$0xff] %vm345_vm0, %v533_v8  ;;  %v552_v3 = vmax.f32 %v520_v62, 0.0 }
  0x6d   : > { %567 = vst.msk [vmem:[#allocation2 + $0xe8] sm:$0xff] %vm345_vm0, %v534_v12 }
  0x6e   : > { %568 = vst.msk [vmem:[#allocation2 + $0xf0] sm:$0xff] %vm345_vm0, %v535_v16 }
  0x6f   : > { %569 = vst.msk [vmem:[#allocation2 + $0x108] sm:$0xff] %vm345_vm0, %v536_v20 }
  0x70   : > { %570 = vst.msk [vmem:[#allocation2 + $0x110] sm:$0xff] %vm345_vm0, %v537_v24 }
  0x71   : > { %571 = vst.msk [vmem:[#allocation2 + $0x128] sm:$0xff] %vm345_vm0, %v538_v28 }
  0x72   : > { %572 = vst.msk [vmem:[#allocation2 + $0x130] sm:$0xff] %vm345_vm0, %v539_v32 }
  0x73   : > { %573 = vst.msk [vmem:[#allocation2 + $0x148] sm:$0xff] %vm345_vm0, %v540_v36 }
  0x74   : > { %574 = vst.msk [vmem:[#allocation2 + $0x150] sm:$0xff] %vm345_vm0, %v541_v40 }
  0x75   : > { %575 = vst.msk [vmem:[#allocation2 + $0x168] sm:$0xff] %vm345_vm0, %v542_v44 }
  0x76   : > { %576 = vst.msk [vmem:[#allocation2 + $0x170] sm:$0xff] %vm345_vm0, %v543_v48 }
  0x77   : > { %577 = vst.msk [vmem:[#allocation2 + $0x188] sm:$0xff] %vm345_vm0, %v544_v51 }
  0x78   : > { %578 = vst.msk [vmem:[#allocation2 + $0x190] sm:$0xff] %vm345_vm0, %v545_v54 }
  0x79   : > { %579 = vst.msk [vmem:[#allocation2 + $0x1a8] sm:$0xff] %vm345_vm0, %v546_v57 }
  0x7a   : > { %580 = vst.msk [vmem:[#allocation2 + $0x1b0] sm:$0xff] %vm345_vm0, %v547_v59 }
  0x7b   : > { %581 = vst.msk [vmem:[#allocation2 + $0x1c8] sm:$0xff] %vm345_vm0, %v548_v61 }
  0x7c   : > { %582 = vst.msk [vmem:[#allocation2 + $0x1d0] sm:$0xff] %vm345_vm0, %v549_v63 }
  0x7d   : > { %583 = vst.msk [vmem:[#allocation2 + $0x1e8] sm:$0xff] %vm345_vm0, %v550_v0 }
  0x7e   : > { %584 = vst.msk [vmem:[#allocation2 + $0x1f0] sm:$0xff] %vm345_vm0, %v551_v2 }
  0x7f   : > { %585 = vst.msk [vmem:[#allocation2 + $0x208] sm:$0xff] %vm345_vm0, %v552_v3 }
  0x80   : > { %586 = vst.msk [vmem:[#allocation2 + $0x210] sm:$0xff] %vm345_vm0, %v553_v4 }
  0x81 PF: > { %s1941_s13 = sshll.u32 %s2045_s24, 8  ;;  %s2064_s16 = smov 8   ;;  %vm1252_vm1 = vcmask 64512   ;;  %vm1269_vm2 = vcmask 130048   ;;  %vm1286_vm3 = vcmask 195584   ;;  %vm1303_vm4 = vcmask 261120  }
  0x82   : > { %s2451_s15 = scalar_lea.vmem [#allocation2], %s1941_s13  ;;  %s2065_s24 = smov 16   ;;  %vm1320_vm5 = vcmask 326656   ;;  %vm1337_vm6 = vcmask 392192   ;;  %vm1354_vm7 = vcmask 457728   ;;  %vm1371_vm8 = vcmask 523264  }
  0x83   : > { %s2066_s17 = smov 24   ;;  %s2067_s18 = smov 40   ;;  %vm1401_vm9 = vcmask 588800   ;;  %vm1568_vm10 = vcmask 57344  }
  0x84   : > { %s2068_s20 = smov 32   ;;  %s2069_s21 = smov 64  }
  0x85   : > { %s2070_s23 = smov 56   ;;  %s2071_s9 = smov 48  }
  0x87   : > { %v2454_v6 = vld [vmem:[%s2451_s15 + $0x48] sm:$0xff]  ;;  %v2466_v8 = vld [vmem:[%s2451_s15 + $0x50] sm:$0xff] }
  0x88   : > { %v2457_v5 = vld [vmem:[%s2451_s15 + $0x28] sm:$0xff]  ;;  %764 = vrot.lane.b32.xlu2 %v2454_v6, %s2064_s16  ;;  %v2469_v9 = vld [vmem:[%s2451_s15 + $0x30] sm:$0xff] }
  0x89   : > { %v606_v7 = vld [vmem:[%s2451_s15 + $0x8] sm:$0xff]  ;;  %760 = vrot.lane.b32.xlu1 %v2457_v5, %s2064_s16  ;;  %v607_v10 = vld [vmem:[%s2451_s15 + $0x10] sm:$0xff] }
  0x8a   : > { %756 = vrot.lane.b32.xlu0 %v606_v7, %s2064_s16  ;;  %v2478_v11 = vld [vmem:[%s2451_s15 + $0x88] sm:$0xff]  ;;  %v2481_v12 = vld [vmem:[%s2451_s15 + $0x70] sm:$0xff] }
  0x8b   : > { %v2484_v13 = vld [vmem:[%s2451_s15 + $0x68] sm:$0xff]  ;;  %v2493_v14 = vld [vmem:[%s2451_s15 + $0xb0] sm:$0xff] }
  0x8c   : > { %v2496_v15 = vld [vmem:[%s2451_s15 + $0xa8] sm:$0xff]  ;;  %v2499_v16 = vld [vmem:[%s2451_s15 + $0x90] sm:$0xff] }
  0x8d   : > { %v2508_v17 = vld [vmem:[%s2451_s15 + $0xe8] sm:$0xff]  ;;  %v2511_v18 = vld [vmem:[%s2451_s15 + $0xd0] sm:$0xff] }
  0x8e   : > { %v2514_v19 = vld [vmem:[%s2451_s15 + $0xc8] sm:$0xff]  ;;  %v623_v20 = vld [vmem:[%s2451_s15 + $0x11] sm:$0xff] }
  0x8f   : > { %v622_v21 = vld [vmem:[%s2451_s15 + $0x9] sm:$0xff]  ;;  %v2535_v24 = vld [vmem:[%s2451_s15 + $0x31] sm:$0xff] }
  0x90   : > { %766 = vrot.lane.b32.xlu2 %v2466_v8, %s2064_s16  ;;  %v2525_v22 = vld [vmem:[%s2451_s15 + $0xf0] sm:$0xff]  ;;  %v1824_v35 = vld [vmem:[%s2451_s15 + $0x27] sm:$0xff] }
  0x91   : > { %762 = vrot.lane.b32.xlu1 %v2469_v9, %s2064_s16  ;;  %v2532_v23 = vld [vmem:[%s2451_s15 + $0x49] sm:$0xff]  ;;  %v2547_v26 = vld [vmem:[%s2451_s15 + $0x71] sm:$0xff] }
  0x92   : > { %758 = vrot.lane.b32.xlu0 %v607_v10, %s2064_s16  ;;  %v2538_v25 = vld [vmem:[%s2451_s15 + $0x29] sm:$0xff]  ;;  %v2553_v28 = vld [vmem:[%s2451_s15 + $0x51] sm:$0xff] }
  0x93   : > { %v2550_v27 = vld [vmem:[%s2451_s15 + $0x69] sm:$0xff]  ;;  %v2565_v30 = vld [vmem:[%s2451_s15 + $0x91] sm:$0xff] }
  0x94   : > { %v2562_v29 = vld [vmem:[%s2451_s15 + $0xa9] sm:$0xff]  ;;  %v2577_v32 = vld [vmem:[%s2451_s15 + $0xd1] sm:$0xff] }
  0x95   : > { %v2568_v31 = vld [vmem:[%s2451_s15 + $0x89] sm:$0xff]  ;;  %v2583_v34 = vld [vmem:[%s2451_s15 + $0xb1] sm:$0xff] }
  0x96   : > { %v2580_v33 = vld [vmem:[%s2451_s15 + $0xc9] sm:$0xff]  ;;  %v2593_v36 = vld [vmem:[%s2451_s15 + $0xf1] sm:$0xff] }
  0x97   : > { %v2596_v37 = vld [vmem:[%s2451_s15 + $0xe9] sm:$0xff] }
  0x98   : > { %772 = vrot.lane.b32.xlu2 %v2478_v11, %s2064_s16  ;;  %v2604_v38 = vld [vmem:[%s2451_s15 + $0x4f] sm:$0xff]  ;;  %v1826_v39 = vld [vmem:[%s2451_s15 + $0x47] sm:$0xff] }
  0x99   : > { %770 = vrot.lane.b32.xlu1 %v2481_v12, %s2064_s16  ;;  %v1825_v40 = vld [vmem:[%s2451_s15 + $0x2f] sm:$0xff]  ;;  %v2614_v43 = vld [vmem:[%s2451_s15 + $0x87] sm:$0xff] }
  0x9a   : > { %768 = vrot.lane.b32.xlu0 %v2484_v13, %s2064_s16  ;;  %v2617_v44 = vld [vmem:[%s2451_s15 + $0x6f] sm:$0xff]  ;;  %v2620_v45 = vld [vmem:[%s2451_s15 + $0x67] sm:$0xff] }
  0x9b   : > { %v2633_v48 = vld [vmem:[%s2451_s15 + $0xaf] sm:$0xff]  ;;  %v2636_v49 = vld [vmem:[%s2451_s15 + $0xa7] sm:$0xff] }
  0x9c   : > { %v2639_v50 = vld [vmem:[%s2451_s15 + $0x8f] sm:$0xff]  ;;  %v2652_v53 = vld [vmem:[%s2451_s15 + $0xe7] sm:$0xff] }
  0x9d   : > { %v2655_v54 = vld [vmem:[%s2451_s15 + $0xcf] sm:$0xff]  ;;  %v2658_v55 = vld [vmem:[%s2451_s15 + $0xc7] sm:$0xff] }
  0x9e   : > { %v2672_v60 = vld [vmem:[%s2451_s15 + $0x10f] sm:$0xff]  ;;  %v2675_v61 = vld [vmem:[%s2451_s15 + $0x107] sm:$0xff] }
  0x9f   : > { %v2678_v62 = vld [vmem:[%s2451_s15 + $0xef] sm:$0xff] }
  0xa0   : > { %778 = vrot.lane.b32.xlu2 %v2493_v14, %s2064_s16  ;;  %v591_v3 = vld [vmem:[%s2451_s15 + $0xf] sm:$0xff] }
  0xa1   : > { %776 = vrot.lane.b32.xlu1 %v2496_v15, %s2064_s16 }
  0xa2   : > { %774 = vrot.lane.b32.xlu0 %v2499_v16, %s2064_s16 }
  0xa8   : > { %784 = vrot.lane.b32.xlu2 %v2508_v17, %s2064_s16 }
  0xa9   : > { %782 = vrot.lane.b32.xlu1 %v2511_v18, %s2064_s16 }
  0xaa   : > { %780 = vrot.lane.b32.xlu0 %v2514_v19, %s2064_s16 }
  0xb0   : > { %822 = vrot.lane.b32.xlu2 %v623_v20, %s2065_s24 }
  0xb1   : > { %820 = vrot.lane.b32.xlu1 %v622_v21, %s2065_s24 }
  0xb2   : > { %786 = vrot.lane.b32.xlu0 %v2525_v22, %s2064_s16 }
  0xb8   : > { %828 = vrot.lane.b32.xlu2 %v2532_v23, %s2065_s24 }
  0xb9   : > { %826 = vrot.lane.b32.xlu1 %v2535_v24, %s2065_s24 }
  0xba   : > { %824 = vrot.lane.b32.xlu0 %v2538_v25, %s2065_s24 }
  0xc0   : > { %834 = vrot.lane.b32.xlu2 %v2547_v26, %s2065_s24 }
  0xc1   : > { %832 = vrot.lane.b32.xlu1 %v2550_v27, %s2065_s24 }
  0xc2   : > { %830 = vrot.lane.b32.xlu0 %v2553_v28, %s2065_s24 }
  0xc8   : > { %840 = vrot.lane.b32.xlu2 %v2562_v29, %s2065_s24 }
  0xc9   : > { %838 = vrot.lane.b32.xlu1 %v2565_v30, %s2065_s24 }
  0xca   : > { %836 = vrot.lane.b32.xlu0 %v2568_v31, %s2065_s24 }
  0xd0   : > { %846 = vrot.lane.b32.xlu2 %v2577_v32, %s2065_s24 }
  0xd1   : > { %844 = vrot.lane.b32.xlu1 %v2580_v33, %s2065_s24 }
  0xd2   : > { %842 = vrot.lane.b32.xlu0 %v2583_v34, %s2065_s24 }
  0xd8   : > { %884 = vrot.lane.b32.xlu2 %v1824_v35, %s2066_s17 }
  0xd9   : > { %850 = vrot.lane.b32.xlu1 %v2593_v36, %s2065_s24 }
  0xda   : > { %848 = vrot.lane.b32.xlu0 %v2596_v37, %s2065_s24 }
  0xe0   : > { %890 = vrot.lane.b32.xlu2 %v2604_v38, %s2066_s17 }
  0xe1   : > { %888 = vrot.lane.b32.xlu1 %v1826_v39, %s2066_s17 }
  0xe2   : > { %886 = vrot.lane.b32.xlu0 %v1825_v40, %s2066_s17  ;;  %v765_v41 = vpop.permute.xlu2 %764 }
  0xe3   : > { %v1257_v42 = vsel %vm1252_vm1, %v1826_v39, %v765_v41 }
  0xe8   : > { %896 = vrot.lane.b32.xlu2 %v2614_v43, %s2066_s17 }
  0xe9   : > { %894 = vrot.lane.b32.xlu1 %v2617_v44, %s2066_s17 }
  0xea   : > { %892 = vrot.lane.b32.xlu0 %v2620_v45, %s2066_s17  ;;  %v767_v46 = vpop.permute.xlu2 %766 }
  0xeb   : > { %v2630_v47 = vsel %vm1252_vm1, %v2604_v38, %v767_v46 }
  0xf0   : > { %902 = vrot.lane.b32.xlu2 %v2633_v48, %s2066_s17 }
  0xf1   : > { %900 = vrot.lane.b32.xlu1 %v2636_v49, %s2066_s17 }
  0xf2   : > { %898 = vrot.lane.b32.xlu0 %v2639_v50, %s2066_s17  ;;  %v773_v51 = vpop.permute.xlu2 %772 }
  0xf3   : > { %v2649_v52 = vsel %vm1252_vm1, %v2614_v43, %v773_v51 }
  0xf8   : > { %908 = vrot.lane.b32.xlu2 %v2652_v53, %s2066_s17 }
  0xf9   : > { %906 = vrot.lane.b32.xlu1 %v2655_v54, %s2066_s17 }
  0xfa   : > { %904 = vrot.lane.b32.xlu0 %v2658_v55, %s2066_s17  ;;  %v2666_v56 = vpop.permute.xlu2 %778 }
  0xfb   : > { %v761_v57 = vpop.permute.xlu1 %760 }
  0xfc   : > { %v2669_v58 = vsel %vm1252_vm1, %v1824_v35, %v761_v57  ;;  %v757_v59 = vpop.permute.xlu0 %756  ;;  %v590_v57 = vld [vmem:[%s2451_s15 + $0x7] sm:$0xff] }
 0x100   : > { %914 = vrot.lane.b32.xlu2 %v2672_v60, %s2066_s17 }
 0x101   : > { %912 = vrot.lane.b32.xlu1 %v2675_v61, %s2066_s17 }
 0x102   : > { %910 = vrot.lane.b32.xlu0 %v2678_v62, %s2066_s17  ;;  %v2686_v63 = vpop.permute.xlu2 %784 }
 0x103   : > { %v763_v1 = vpop.permute.xlu1 %762 }
 0x104   : > { %v1256_v0 = vsel %vm1252_vm1, %v1825_v40, %v763_v1  ;;  %v759_v2 = vpop.permute.xlu0 %758 }
 0x105   : > { %v1254_v4 = vsel %vm1252_vm1, %v591_v3, %v759_v2 }
 0x108   : > { %1012 = vrot.lane.b32.xlu2 %v2538_v25, %s2067_s18 }
 0x109   : > { %950 = vrot.lane.b32.xlu1 %v2469_v9, %s2068_s20 }
 0x10a   : > { %948 = vrot.lane.b32.xlu0 %v2457_v5, %s2068_s20  ;;  %v823_v7 = vpop.permute.xlu2 %822 }
 0x10b   : > { %v771_v10 = vpop.permute.xlu1 %770  ;;  %v2698_v20 = vsel %vm1269_vm2, %v1254_v4, %v823_v7 }
 0x10c   : > { %v769_v21 = vpop.permute.xlu0 %768  ;;  %v1260_v40 = vsel %vm1252_vm1, %v2617_v44, %v771_v10 }
 0x110   : > { %1204 = vrot.lane.b32.xlu2 %v2532_v23, %s2069_s21 }
 0x111   : > { %1140 = vrot.lane.b32.xlu1 %v2454_v6, %s2070_s23 }
 0x112   : > { %1076 = vrot.lane.b32.xlu0 %v1826_v39, %s2071_s9  ;;  %v829_v5 = vpop.permute.xlu2 %828 }
 0x113   : > { %v777_v9 = vpop.permute.xlu1 %776  ;;  %v2706_v25 = vsel %vm1269_vm2, %v1257_v42, %v829_v5 }
 0x114   : > { %v775_v35 = vpop.permute.xlu0 %774  ;;  %v1263_v1 = vsel %vm1252_vm1, %v2636_v49, %v777_v9 }
 0x118   : > { %1020 = vrot.lane.b32.xlu2 %v2550_v27, %s2067_s18 }
 0x119   : > { %1014 = vrot.lane.b32.xlu1 %v2535_v24, %s2067_s18  ;;  %v1253_v24 = vsel %vm1252_vm1, %v590_v57, %v757_v59 }
 0x11a   : > { %956 = vrot.lane.b32.xlu0 %v2484_v13, %s2068_s20  ;;  %v835_v41 = vpop.permute.xlu2 %834 }
 0x11b   : > { %v783_v39 = vpop.permute.xlu1 %782  ;;  %v2717_v46 = vsel %vm1269_vm2, %v1260_v40, %v835_v41 }
 0x11c   : > { %v781_v42 = vpop.permute.xlu0 %780 }
 0x11d   : > { %v1265_v51 = vsel %vm1252_vm1, %v2658_v55, %v781_v42 }
 0x120   : > { %1084 = vrot.lane.b32.xlu2 %v2614_v43, %s2071_s9 }
 0x121   : > { %1078 = vrot.lane.b32.xlu1 %v2604_v38, %s2071_s9  ;;  %v1266_v38 = vsel %vm1252_vm1, %v2655_v54, %v783_v39  ;;  %v1259_v39 = vsel %vm1252_vm1, %v2620_v45, %v769_v21 }
 0x122   : > { %964 = vrot.lane.b32.xlu0 %v2496_v15, %s2068_s20  ;;  %v841_v2 = vpop.permute.xlu2 %840 }
 0x123   : > { %v821_v3 = vpop.permute.xlu1 %820  ;;  %v2732_v4 = vsel %vm1269_vm2, %v1263_v1, %v841_v2 }
 0x124   : > { %v1270_v7 = vsel %vm1269_vm2, %v1253_v24, %v821_v3  ;;  %v787_v10 = vpop.permute.xlu0 %786 }
 0x128   : > { %1148 = vrot.lane.b32.xlu2 %v2478_v11, %s2070_s23 }
 0x129   : > { %1142 = vrot.lane.b32.xlu1 %v2466_v8, %s2070_s23 }
 0x12a   : > { %1028 = vrot.lane.b32.xlu0 %v2562_v29, %s2067_s18  ;;  %v847_v43 = vpop.permute.xlu2 %846 }
 0x12b   : > { %v827_v59 = vpop.permute.xlu1 %826  ;;  %v2744_v5 = vsel %vm1269_vm2, %v1266_v38, %v847_v43  ;;  %v1264_v43 = vsel %vm1252_vm1, %v2633_v48, %v2666_v56 }
 0x12c   : > { %v1273_v9 = vsel %vm1269_vm2, %v1256_v0, %v827_v59  ;;  %v825_v40 = vpop.permute.xlu0 %824 }
 0x12d   : > { %v1272_v41 = vsel %vm1269_vm2, %v2669_v58, %v825_v40 }
 0x130   : > { %1212 = vrot.lane.b32.xlu2 %v2568_v31, %s2069_s21 }
 0x131   : > { %1206 = vrot.lane.b32.xlu1 %v2553_v28, %s2069_s21 }
 0x132   : > { %1092 = vrot.lane.b32.xlu0 %v2658_v55, %s2071_s9  ;;  %v885_v42 = vpop.permute.xlu2 %884  ;;  %v1262_v55 = vsel %vm1252_vm1, %v2639_v50, %v775_v35 }
 0x133   : > { %v833_v57 = vpop.permute.xlu1 %832  ;;  %v2758_v0 = vsel %vm1286_vm3, %v1270_v7, %v885_v42 }
 0x134   : > { %v1276_v58 = vsel %vm1269_vm2, %v1259_v39, %v833_v57  ;;  %v831_v24 = vpop.permute.xlu0 %830 }
 0x135   : > { %v1275_v1 = vsel %vm1269_vm2, %v2630_v47, %v831_v24 }
 0x138   : > { %952 = vrot.lane.b32.xlu2 %v2454_v6, %s2068_s20 }
 0x139   : > { %1220 = vrot.lane.b32.xlu1 %v2580_v33, %s2069_s21 }
 0x13a   : > { %1156 = vrot.lane.b32.xlu0 %v2514_v19, %s2070_s23  ;;  %v891_v21 = vpop.permute.xlu2 %890 }
 0x13b   : > { %v839_v2 = vpop.permute.xlu1 %838  ;;  %v2772_v3 = vsel %vm1286_vm3, %v1273_v9, %v891_v21 }
 0x13c   : > { %v1279_v7 = vsel %vm1269_vm2, %v1262_v55, %v839_v2  ;;  %v837_v47 = vpop.permute.xlu0 %836 }
 0x13d   : > { %v2777_v6 = vsel %vm1269_vm2, %v2649_v52, %v837_v47 }
 0x140   : > { %1022 = vrot.lane.b32.xlu2 %v2547_v26, %s2067_s18 }
 0x141   : > { %1016 = vrot.lane.b32.xlu1 %v2532_v23, %s2067_s18  ;;  %v1268_v23 = vsel %vm1252_vm1, %v2678_v62, %v787_v10 }
 0x142   : > { %958 = vrot.lane.b32.xlu0 %v2481_v12, %s2068_s20  ;;  %v897_v35 = vpop.permute.xlu2 %896 }
 0x143   : > { %v845_v38 = vpop.permute.xlu1 %844  ;;  %v2789_v59 = vsel %vm1286_vm3, %v1276_v58, %v897_v35 }
 0x144   : > { %v1282_v52 = vsel %vm1269_vm2, %v1265_v51, %v845_v38  ;;  %v843_v9 = vpop.permute.xlu0 %842  ;;  %v1267_v51 = vsel %vm1252_vm1, %v2652_v53, %v2686_v63 }
 0x145   : > { %v2793_v40 = vsel %vm1269_vm2, %v1264_v43, %v843_v9  ;;  %v1392_v43 = vld [vmem:[%s3247_s3 + $0x20] sm:$0xff] }
 0x148   : > { %1080 = vrot.lane.b32.xlu2 %v2620_v45, %s2071_s9 }
 0x149   : > { %972 = vrot.lane.b32.xlu1 %v2508_v17, %s2068_s20 }
 0x14a   : > { %966 = vrot.lane.b32.xlu0 %v2493_v14, %s2068_s20  ;;  %v903_v56 = vpop.permute.xlu2 %902 }
 0x14b   : > { %v851_v39 = vpop.permute.xlu1 %850  ;;  %v2807_v42 = vsel %vm1286_vm3, %v1279_v7, %v903_v56  ;;  %v1396_v7 = vld [vmem:[%s3247_s3 + $0x40] sm:$0xff] }
 0x14c   : > { %v1285_v45 = vsel %vm1269_vm2, %v1268_v23, %v851_v39  ;;  %v849_v57 = vpop.permute.xlu0 %848  ;;  %1457 = vmatpush.msra.mxu0 %v1396_v7  ;;  %1944 = vmatpush.msra.mxu1 %v1396_v7 }
 0x14d   : > { %v2811_v58 = vsel %vm1269_vm2, %v1267_v51, %v849_v57  ;;  %1945 = vmatpush.msra.mxu2 %v1396_v7  ;;  %1946 = vmatpush.msra.mxu3 %v1396_v7  ;;  %v1388_v51 = vld [vmem:[%s3247_s3] sm:$0xff] }
 0x150   : > { %1036 = vrot.lane.b32.xlu2 %v2596_v37, %s2067_s18 }
 0x151   : > { %1030 = vrot.lane.b32.xlu1 %v2583_v34, %s2067_s18 }
 0x152   : > { %1086 = vrot.lane.b32.xlu0 %v2639_v50, %s2071_s9  ;;  %v909_v10 = vpop.permute.xlu2 %908  ;;  %v1395_v50 = vld [vmem:[%s3247_s3 + $0x38] sm:$0xff] }
 0x153   : > { %v889_v63 = vpop.permute.xlu1 %888  ;;  %v2820_v24 = vsel %vm1286_vm3, %v1282_v52, %v909_v10  ;;  %1458 = vmatpush.msra.mxu0 %v1395_v50  ;;  %1947 = vmatpush.msra.mxu1 %v1395_v50  ;;  %v1390_v52 = vld [vmem:[%s3247_s3 + $0x10] sm:$0xff] }
 0x154   : > { %v2823_v55 = vsel %vm1286_vm3, %v1272_v41, %v889_v63  ;;  %v887_v21 = vpop.permute.xlu0 %886  ;;  %1948 = vmatpush.msra.mxu2 %v1395_v50  ;;  %1949 = vmatpush.msra.mxu3 %v1395_v50 }
 0x155   : > { %v2827_v2 = vsel %vm1286_vm3, %v2698_v20, %v887_v21  ;;  %v1394_v20 = vld [vmem:[%s3247_s3 + $0x30] sm:$0xff] }
 0x156   : > { %1459 = vmatpush.msra.mxu0 %v1394_v20  ;;  %1950 = vmatpush.msra.mxu1 %v1394_v20  ;;  %v2902_v21 = vld [vmem:[%s2451_s15 + $0x109] sm:$0xff] }
 0x157   : > { %1951 = vmatpush.msra.mxu2 %v1394_v20  ;;  %1952 = vmatpush.msra.mxu3 %v1394_v20 }
 0x158   : > { %1094 = vrot.lane.b32.xlu2 %v2655_v54, %s2071_s9 }
 0x159   : > { %1150 = vrot.lane.b32.xlu1 %v2499_v16, %s2070_s23 }
 0x15a   : > { %1144 = vrot.lane.b32.xlu0 %v2484_v13, %s2070_s23  ;;  %v915_v41 = vpop.permute.xlu2 %914  ;;  %v1393_v13 = vld [vmem:[%s3247_s3 + $0x28] sm:$0xff] }
 0x15b   : > { %v895_v47 = vpop.permute.xlu1 %894  ;;  %v2845_v35 = vsel %vm1286_vm3, %v1285_v45, %v915_v41  ;;  %1460 = vmatpush.msra.mxu0 %v1393_v13  ;;  %1953 = vmatpush.msra.mxu1 %v1393_v13  ;;  %v2885_v45 = vld [vmem:[%s2451_s15 + $0x108] sm:$0xff] }
 0x15c   : > { %v2848_v54 = vsel %vm1286_vm3, %v1275_v1, %v895_v47  ;;  %v2850_v38 = vpop.permute.xlu0 %892  ;;  %1954 = vmatpush.msra.mxu2 %v1393_v13  ;;  %v1391_v1 = vld [vmem:[%s3247_s3 + $0x18] sm:$0xff]  ;;  %1955 = vmatpush.msra.mxu3 %v1393_v13 }
 0x15d   : > { %1461 = vmatpush.msra.mxu0 %v1392_v43  ;;  %1956 = vmatpush.msra.mxu1 %v1392_v43 }
 0x15e   : > { %1957 = vmatpush.msra.mxu2 %v1392_v43  ;;  %1958 = vmatpush.msra.mxu3 %v1392_v43  ;;  %v1291_v43 = vsel %vm1286_vm3, %v2706_v25, %v2850_v38 }
 0x15f   : > { %1462 = vmatpush.msra.mxu0 %v1391_v1  ;;  %1959 = vmatpush.msra.mxu1 %v1391_v1 }
 0x160   : > { %1214 = vrot.lane.b32.xlu2 %v2565_v30, %s2069_s21  ;;  %1960 = vmatpush.msra.mxu2 %v1391_v1 }
 0x161   : > { %1208 = vrot.lane.b32.xlu1 %v2550_v27, %s2069_s21  ;;  %1463 = vmatpush.msra.mxu0 %v1390_v52  ;;  %v1389_v27 = vld [vmem:[%s3247_s3 + $0x8] sm:$0xff] }
 0x162   : > { %1100 = vrot.lane.b32.xlu0 %v2675_v61, %s2071_s9  ;;  %v1013_v9 = vpop.permute.xlu2 %1012  ;;  %1962 = vmatpush.msra.mxu1 %v1390_v52 }
 0x163   : > { %v901_v23 = vpop.permute.xlu1 %900  ;;  %1963 = vmatpush.msra.mxu2 %v1390_v52  ;;  %1464 = vmatpush.msra.mxu0 %v1389_v27 }
 0x164   : > { %v2872_v56 = vsel %vm1286_vm3, %v2777_v6, %v901_v23  ;;  %v899_v39 = vpop.permute.xlu0 %898  ;;  %1961 = vmatpush.msra.mxu3 %v1391_v1  ;;  %1965 = vmatpush.msra.mxu1 %v1389_v27 }
 0x165   : > { %v2879_v61 = vsel %vm1286_vm3, %v2717_v46, %v899_v39  ;;  %1966 = vmatpush.msra.mxu2 %v1389_v27  ;;  %1465 = vmatpush.msra.mxu0 %v1388_v51 }
 0x166   : > { %1964 = vmatpush.msra.mxu3 %v1390_v52  ;;  %1968 = vmatpush.msra.mxu1 %v1388_v51 }
 0x167   : > { %1969 = vmatpush.msra.mxu2 %v1388_v51 }
 0x168   : > { %1222 = vrot.lane.b32.xlu2 %v2577_v32, %s2069_s21  ;;  %1967 = vmatpush.msra.mxu3 %v1389_v27 }
 0x169   : > { %1164 = vrot.lane.b32.xlu1 %v2885_v45, %s2070_s23 }
 0x16a   : > { %1158 = vrot.lane.b32.xlu0 %v2511_v18, %s2070_s23  ;;  %v1205_v46 = vpop.permute.xlu2 %1204  ;;  %1970 = vmatpush.msra.mxu3 %v1388_v51  ;;  %v1919_v51 = vld [vmem:[%s2451_s15 + $0x111] sm:$0xff] }
 0x16b   : > { %v907_v6 = vpop.permute.xlu1 %906 }
 0x16c   : > { %v2895_v57 = vsel %vm1286_vm3, %v2793_v40, %v907_v6  ;;  %v905_v10 = vpop.permute.xlu0 %904 }
 0x16d   : > { %v2899_v63 = vsel %vm1286_vm3, %v2732_v4, %v905_v10 }
 0x170   : > { %960 = vrot.lane.b32.xlu2 %v2478_v11, %s2068_s20 }
 0x171   : > { %954 = vrot.lane.b32.xlu1 %v2466_v8, %s2068_s20 }
 0x172   : > { %1228 = vrot.lane.b32.xlu0 %v2902_v21, %s2069_s21  ;;  %v1021_v7 = vpop.permute.xlu2 %1020 }
 0x173   : > { %v913_v40 = vpop.permute.xlu1 %912 }
 0x174   : > { %v2912_v50 = vsel %vm1286_vm3, %v2811_v58, %v913_v40  ;;  %v911_v4 = vpop.permute.xlu0 %910 }
 0x175   : > { %v2916_v20 = vsel %vm1286_vm3, %v2744_v5, %v911_v4 }
 0x178   : > { %968 = vrot.lane.b32.xlu2 %v2514_v19, %s2068_s20 }
 0x179   : > { %1024 = vrot.lane.b32.xlu1 %v2568_v31, %s2067_s18 }
 0x17a   : > { %1018 = vrot.lane.b32.xlu0 %v2553_v28, %s2067_s18  ;;  %v1085_v8 = vpop.permute.xlu2 %1084 }
 0x17b   : > { %v951_v11 = vpop.permute.xlu1 %950 }
 0x17c   : > { %v949_v41 = vpop.permute.xlu0 %948 }
 0x17d   : > { %v1304_v58 = vsel %vm1303_vm4, %v2758_v0, %v949_v41 }
 0x17e   : > { %v1321_v5 = vsel %vm1320_vm5, %v1304_v58, %v1013_v9 }
 0x180   : > { %1088 = vrot.lane.b32.xlu2 %v2636_v49, %s2071_s9 }
 0x181   : > { %1082 = vrot.lane.b32.xlu1 %v2617_v44, %s2071_s9 }
 0x182   : > { %974 = vrot.lane.b32.xlu0 %v2525_v22, %s2068_s20  ;;  %v1149_v19 = vpop.permute.xlu2 %1148 }
 0x183   : > { %v1141_v28 = vpop.permute.xlu1 %1140 }
 0x184   : > { %v1077_v31 = vpop.permute.xlu0 %1076 }
 0x185   : > { %v1338_v0 = vsel %vm1337_vm6, %v1321_v5, %v1077_v31  ;;  %v1904_v5 = vld [vmem:[%s2451_s15 + $0x128] sm:$0xff] }
 0x186   : > { %v1355_v49 = vsel %vm1354_vm7, %v1338_v0, %v1141_v28  ;;  %v1888_v28 = vld [vmem:[%s2451_s15 + $0x127] sm:$0xff] }
 0x187   : > { %v1372_v47 = vsel %vm1371_vm8, %v1355_v49, %v1205_v46  ;;  %v1305_v46 = vsel %vm1303_vm4, %v2827_v2, %v951_v11 }
 0x188   : > { %1922 = vmatmul.msk.f32.vlgmr.msra.gmra.mxu0 %vm1401_vm9, %v1372_v47  ;;  %1146 = vrot.lane.b32.xlu2 %v2481_v12, %s2070_s23 }
 0x189   : > { %1038 = vrot.lane.b32.xlu1 %v2593_v36, %s2067_s18 }
 0x18a   : > { %1032 = vrot.lane.b32.xlu0 %v2580_v33, %s2067_s18  ;;  %v1213_v44 = vpop.permute.xlu2 %1212 }
 0x18b   : > { %v1015_v13 = vpop.permute.xlu1 %1014 }
 0x18c   : > { %v957_v1 = vpop.permute.xlu0 %956  ;;  %v1322_v6 = vsel %vm1320_vm5, %v1305_v46, %v1015_v13 }
 0x18d   : > { %v1308_v52 = vsel %vm1303_vm4, %v1291_v43, %v957_v1 }
 0x18e   : > { %v1325_v9 = vsel %vm1320_vm5, %v1308_v52, %v1021_v7 }
 0x18f   : > { %v1342_v23 = vsel %vm1337_vm6, %v1325_v9, %v1085_v8 }
 0x190   : > { %v1359_v12 = vsel %vm1354_vm7, %v1342_v23, %v1149_v19  ;;  %1102 = vrot.lane.b32.xlu2 %v2672_v60, %s2071_s9 }
 0x191   : > { %1096 = vrot.lane.b32.xlu1 %v2652_v53, %s2071_s9  ;;  %v1376_v33 = vsel %vm1371_vm8, %v1359_v12, %v1213_v44  ;;  %v1921_v12 = vld [vmem:[%s2451_s15 + $0x131] sm:$0xff] }
 0x192   : > { %1152 = vrot.lane.b32.xlu0 %v2496_v15, %s2070_s23  ;;  %1926 = vmatmul.msk.f32.vlgmr.msra.gmra.mxu1 %vm1401_vm9, %v1376_v33  ;;  %v2958_v25 = vpop.permute.xlu2 %952  ;;  %v2968_v15 = vld [vmem:[%s2451_s15 + $0x110] sm:$0xff] }
 0x193   : > { %v1079_v38 = vpop.permute.xlu1 %1078  ;;  %v1905_v33 = vld [vmem:[%s2451_s15 + $0x130] sm:$0xff] }
 0x194   : > { %v965_v39 = vpop.permute.xlu0 %964 }
 0x198   : > { %1160 = vrot.lane.b32.xlu2 %v2508_v17, %s2070_s23  ;;  %v1339_v17 = vsel %vm1337_vm6, %v1322_v6, %v1079_v38 }
 0x199   : > { %1216 = vrot.lane.b32.xlu1 %v2562_v29, %s2069_s21 }
 0x19a   : > { %1210 = vrot.lane.b32.xlu0 %v2547_v26, %s2069_s21  ;;  %v1023_v53 = vpop.permute.xlu2 %1022 }
 0x19b   : > { %v1143_v60 = vpop.permute.xlu1 %1142 }
 0x19c   : > { %v1029_v27 = vpop.permute.xlu0 %1028  ;;  %v1356_v26 = vsel %vm1354_vm7, %v1339_v17, %v1143_v60 }
 0x1a0   : > { %1230 = vrot.lane.b32.xlu2 %v1919_v51, %s2069_s21 }
 0x1a1   : > { %1224 = vrot.lane.b32.xlu1 %v2596_v37, %s2069_s21  ;;  %v1312_v37 = vsel %vm1303_vm4, %v2872_v56, %v965_v39 }
 0x1a2   : > { %1166 = vrot.lane.b32.xlu0 %v2968_v15, %s2070_s23  ;;  %v1081_v29 = vpop.permute.xlu2 %1080  ;;  %v1329_v2 = vsel %vm1320_vm5, %v1312_v37, %v1029_v27 }
 0x1a3   : > { %v1207_v10 = vpop.permute.xlu1 %1206 }
 0x1a4   : > { %v1093_v7 = vpop.permute.xlu0 %1092  ;;  %v1373_v40 = vsel %vm1371_vm8, %v1356_v26, %v1207_v10 }
 0x1a5   : > { %1923 = vmatmul.msk.f32.gmra.mxu0 %vm1401_vm9, %v1373_v40  ;;  %v1346_v11 = vsel %vm1337_vm6, %v1329_v2, %v1093_v7 }
 0x1a8   : > { %970 = vrot.lane.b32.xlu2 %v2511_v18, %s2068_s20 }
 0x1a9   : > { %1026 = vrot.lane.b32.xlu1 %v2565_v30, %s2067_s18 }
 0x1aa   : > { %962 = vrot.lane.b32.xlu0 %v2499_v16, %s2068_s20  ;;  %v2991_v4 = vpop.permute.xlu2 %1036 }
 0x1ab   : > { %v1221_v8 = vpop.permute.xlu1 %1220 }
 0x1ac   : > { %v1157_v41 = vpop.permute.xlu0 %1156 }
 0x1ad   : > { %v1363_v18 = vsel %vm1354_vm7, %v1346_v11, %v1157_v41 }
 0x1ae   : > { %v1380_v58 = vsel %vm1371_vm8, %v1363_v18, %v1221_v8 }
 0x1af   : > { %1930 = vmatmul.msk.f32.vlgmr.msra.gmra.mxu2 %vm1401_vm9, %v1380_v58  ;;  %v3063_v58 = vld [vmem:[%s3248_s4] ss:$0 sm:$0xff] }
 0x1b0   : > { %1034 = vrot.lane.b32.xlu2 %v2577_v32, %s2067_s18 }
 0x1b1   : > { %1090 = vrot.lane.b32.xlu1 %v2633_v48, %s2071_s9 }
 0x1b2   : > { %976 = vrot.lane.b32.xlu0 %v2885_v45, %s2068_s20  ;;  %v1095_v16 = vpop.permute.xlu2 %1094 }
 0x1b3   : > { %v1017_v30 = vpop.permute.xlu1 %1016 }
 0x1b4   : > { %v959_v56 = vpop.permute.xlu0 %958 }
 0x1b8   : > { %1098 = vrot.lane.b32.xlu2 %v2678_v62, %s2071_s9 }
 0x1b9   : > { %1154 = vrot.lane.b32.xlu1 %v2493_v14, %s2070_s23  ;;  %v1920_v14 = vld [vmem:[%s2451_s15 + $0x129] sm:$0xff] }
 0x1ba   : > { %1040 = vrot.lane.b32.xlu0 %v2902_v21, %s2067_s18  ;;  %v1215_v32 = vpop.permute.xlu2 %1214  ;;  %v1309_v21 = vsel %vm1303_vm4, %v2848_v54, %v959_v56  ;;  %v1889_v54 = vld [vmem:[%s2451_s15 + $0x12f] sm:$0xff] }
 0x1bb   : > { %v973_v19 = vpop.permute.xlu1 %972 }
 0x1bc   : > { %v967_v48 = vpop.permute.xlu0 %966  ;;  %v1316_v46 = vsel %vm1303_vm4, %v2820_v24, %v973_v19 }
 0x1c0   : > { %1162 = vrot.lane.b32.xlu2 %v2525_v22, %s2070_s23  ;;  %v1326_v22 = vsel %vm1320_vm5, %v1309_v21, %v1023_v53 }
 0x1c1   : > { %1218 = vrot.lane.b32.xlu1 %v2583_v34, %s2069_s21 }
 0x1c2   : > { %1104 = vrot.lane.b32.xlu0 %v1888_v28, %s2071_s9  ;;  %v1223_v31 = vpop.permute.xlu2 %1222 }
 0x1c3   : > { %v1031_v45 = vpop.permute.xlu1 %1030 }
 0x1c4   : > { %v1087_v62 = vpop.permute.xlu0 %1086 }
 0x1c5   : > { %v1343_v34 = vsel %vm1337_vm6, %v1326_v22, %v1087_v62 }
 0x1c8   : > { %1232 = vrot.lane.b32.xlu2 %v1920_v14, %s2069_s21 }
 0x1c9   : > { %1226 = vrot.lane.b32.xlu1 %v2593_v36, %s2069_s21  ;;  %v1306_v36 = vsel %vm1303_vm4, %v2823_v55, %v2958_v25  ;;  %v1313_v25 = vsel %vm1303_vm4, %v2807_v42, %v967_v48  ;;  %v1333_v42 = vsel %vm1320_vm5, %v1316_v46, %v2991_v4 }
 0x1ca   : > { %1168 = vrot.lane.b32.xlu0 %v1904_v5, %s2070_s23  ;;  %v1323_v13 = vsel %vm1320_vm5, %v1306_v36, %v1017_v30  ;;  %v961_v43 = vpop.permute.xlu2 %960  ;;  %v1330_v38 = vsel %vm1320_vm5, %v1313_v25, %v1031_v45 }
 0x1cb   : > { %v1151_v0 = vpop.permute.xlu1 %1150  ;;  %v1340_v1 = vsel %vm1337_vm6, %v1323_v13, %v1081_v29  ;;  %v1347_v27 = vsel %vm1337_vm6, %v1330_v38, %v1095_v16 }
 0x1cc   : > { %v1360_v49 = vsel %vm1354_vm7, %v1343_v34, %v1151_v0  ;;  %v1145_v47 = vpop.permute.xlu0 %1144 }
 0x1cd   : > { %v1377_v44 = vsel %vm1371_vm8, %v1360_v49, %v1215_v32  ;;  %v1357_v52 = vsel %vm1354_vm7, %v1340_v1, %v1145_v47  ;;  %v1310_v32 = vsel %vm1303_vm4, %v2789_v59, %v961_v43 }
 0x1ce   : > { %1927 = vmatmul.msk.f32.gmra.mxu1 %vm1401_vm9, %v1377_v44 }
 0x1d0   : > { %1106 = vrot.lane.b32.xlu2 %v1889_v54, %s2071_s9 }
 0x1d1   : > { %1042 = vrot.lane.b32.xlu1 %v1919_v51, %s2067_s18 }
 0x1d2   : > { %978 = vrot.lane.b32.xlu0 %v2968_v15, %s2068_s20  ;;  %v969_v39 = vpop.permute.xlu2 %968 }
 0x1d3   : > { %v1209_v9 = vpop.permute.xlu1 %1208  ;;  %v1314_v0 = vsel %vm1303_vm4, %v2899_v63, %v969_v39 }
 0x1d4   : > { %v1101_v23 = vpop.permute.xlu0 %1100  ;;  %v1374_v55 = vsel %vm1371_vm8, %v1357_v52, %v1209_v9 }
 0x1d5   : > { %1924 = vmatmul.msk.f32.gmra.mxu0 %vm1401_vm9, %v1374_v55  ;;  %v1350_v6 = vsel %vm1337_vm6, %v1333_v42, %v1101_v23 }
 0x1d9   : > { %1234 = vrot.lane.b32.xlu1 %v1921_v12, %s2069_s21 }
 0x1da   : > { %1170 = vrot.lane.b32.xlu0 %v1905_v33, %s2070_s23  ;;  %v1089_v17 = vpop.permute.xlu2 %1088 }
 0x1db   : > { %v1165_v53 = vpop.permute.xlu1 %1164 }
 0x1dc   : > { %v1159_v60 = vpop.permute.xlu0 %1158  ;;  %v1367_v29 = vsel %vm1354_vm7, %v1350_v6, %v1165_v53 }
 0x1dd   : > { %v1364_v51 = vsel %vm1354_vm7, %v1347_v27, %v1159_v60 }
 0x1de   : > { %v1381_v15 = vsel %vm1371_vm8, %v1364_v51, %v1223_v31 }
 0x1df   : > { %1931 = vmatmul.msk.f32.gmra.mxu2 %vm1401_vm9, %v1381_v15 }
 0x1e2   : > { %v1147_v2 = vpop.permute.xlu2 %1146 }
 0x1e3   : > { %v955_v26 = vpop.permute.xlu1 %954 }
 0x1e4   : > { %v1229_v10 = vpop.permute.xlu0 %1228  ;;  %v1307_v48 = vsel %vm1303_vm4, %v2772_v3, %v955_v26 }
 0x1e5   : > { %v1384_v7 = vsel %vm1371_vm8, %v1367_v29, %v1229_v10 }
 0x1e6   : > { %1934 = vmatmul.msk.f32.vlgmr.msra.gmra.mxu3 %vm1401_vm9, %v1384_v7 }
 0x1ea   : > { %v1103_v11 = vpop.permute.xlu2 %1102 }
 0x1eb   : > { %v1025_v40 = vpop.permute.xlu1 %1024 }
 0x1ec   : > { %v1019_v37 = vpop.permute.xlu0 %1018  ;;  %v1327_v28 = vsel %vm1320_vm5, %v1310_v32, %v1025_v40 }
 0x1ed   : > { %v1324_v45 = vsel %vm1320_vm5, %v1307_v48, %v1019_v37  ;;  %v1344_v31 = vsel %vm1337_vm6, %v1327_v28, %v1089_v17 }
 0x1f2   : > { %v1161_v18 = vpop.permute.xlu2 %1160 }
 0x1f3   : > { %v1083_v24 = vpop.permute.xlu1 %1082 }
 0x1f4   : > { %v975_v8 = vpop.permute.xlu0 %974  ;;  %v1341_v62 = vsel %vm1337_vm6, %v1324_v45, %v1083_v24 }
 0x1f5   : > { %v1358_v22 = vsel %vm1354_vm7, %v1341_v62, %v1147_v2  ;;  %v1317_v44 = vsel %vm1303_vm4, %v2916_v20, %v975_v8 }
 0x1fa   : > { %v1231_v14 = vpop.permute.xlu2 %1230 }
 0x1fb   : > { %v1039_v41 = vpop.permute.xlu1 %1038 }
 0x1fc   : > { %v1033_v4 = vpop.permute.xlu0 %1032  ;;  %v1334_v13 = vsel %vm1320_vm5, %v1317_v44, %v1039_v41 }
 0x1fd   : > { %v1331_v49 = vsel %vm1320_vm5, %v1314_v0, %v1033_v4  ;;  %v1351_v52 = vsel %vm1337_vm6, %v1334_v13, %v1103_v11 }
 0x202   : > { %v971_v20 = vpop.permute.xlu2 %970 }
 0x203   : > { %v1097_v16 = vpop.permute.xlu1 %1096 }
 0x204   : > { %v1153_v30 = vpop.permute.xlu0 %1152  ;;  %v1348_v36 = vsel %vm1337_vm6, %v1331_v49, %v1097_v16 }
 0x205   : > { %v1467_v56 = vpop.f32.mrf.mxu0  ;;  %v1361_v21 = vsel %vm1354_vm7, %v1344_v31, %v1153_v30  ;;  %v1365_v63 = vsel %vm1354_vm7, %v1348_v36, %v1161_v18 }
 0x206   : > { %v1468_v19 = vadd.f32 %v3063_v58, %v1467_v56 }
 0x208   : > { %1515 = vst.msk [vmem:[%s2154_s19] sm:$0xff] %vm1252_vm1, %v1468_v19  ;;  %v1570_v39 = vmul.f32 %v1468_v19, %v1468_v19  ;;  %v1531_v51 = vsel %vm1252_vm1, %v1468_v19, 0.0 }
 0x20a   : > { %v1035_v25 = vpop.permute.xlu2 %1034  ;;  %v1586_v6 = vsel %vm1252_vm1, %v1570_v39, 0.0 }
 0x20b   : > { %v1217_v59 = vpop.permute.xlu1 %1216 }
 0x20c   : > { %v1211_v5 = vpop.permute.xlu0 %1210  ;;  %v1378_v3 = vsel %vm1371_vm8, %v1361_v21, %v1217_v59 }
 0x20d   : > { %v1375_v34 = vsel %vm1371_vm8, %v1358_v22, %v1211_v5  ;;  %1928 = vmatmul.msk.f32.gmra.mxu1 %vm1401_vm9, %v1378_v3 }
 0x20e   : > { %1925 = vmatmul.msk.f32.gmra.mxu0 %vm1401_vm9, %v1375_v34 }
 0x20f   : > { %v1479_v47 = vpop.f32.mrf.mxu1 }
 0x210   : > { %v3089_v54 = vadd.f32 %v3063_v58, %v1479_v47 }
 0x212   : > { %1519 = vst.msk [vmem:[%s2154_s19 + $0x20] sm:$0xff] %vm1252_vm1, %v3089_v54  ;;  %v1099_v29 = vpop.permute.xlu2 %1098 }
 0x213   : > { %v1225_v43 = vpop.permute.xlu1 %1224 }
 0x214   : > { %v1167_v1 = vpop.permute.xlu0 %1166  ;;  %v1382_v9 = vsel %vm1371_vm8, %v1365_v63, %v1225_v43 }
 0x215   : > { %v1368_v23 = vsel %vm1354_vm7, %v1351_v52, %v1167_v1  ;;  %1932 = vmatmul.msk.f32.gmra.mxu2 %vm1401_vm9, %v1382_v9 }
 0x216   : > { %v1385_v55 = vsel %vm1371_vm8, %v1368_v23, %v1231_v14 }
 0x217   : > { %1935 = vmatmul.msk.f32.gmra.mxu3 %vm1401_vm9, %v1385_v55 }
 0x21a   : > { %v1163_v8 = vpop.permute.xlu2 %1162 }
 0x21b   : > { %v1027_v12 = vpop.permute.xlu1 %1026 }
 0x21c   : > { %v963_v33 = vpop.permute.xlu0 %962 }
 0x21d   : > { %v1311_v40 = vsel %vm1303_vm4, %v2879_v61, %v963_v33  ;;  %v1315_v61 = vsel %vm1303_vm4, %v2895_v57, %v971_v20 }
 0x21e   : > { %v1328_v37 = vsel %vm1320_vm5, %v1311_v40, %v1027_v12  ;;  %v1332_v30 = vsel %vm1320_vm5, %v1315_v61, %v1035_v25 }
 0x21f   : > { %v1349_v56 = vsel %vm1337_vm6, %v1332_v30, %v1099_v29 }
 0x220   : > { %v1366_v19 = vsel %vm1354_vm7, %v1349_v56, %v1163_v8 }
 0x222   : > { %v1470_v38 = vpop.f32.mrf.mxu0  ;;  %v1233_v45 = vpop.permute.xlu2 %1232 }
 0x223   : > { %v1471_v53 = vadd.f32 %v3063_v58, %v1470_v38  ;;  %v1091_v60 = vpop.permute.xlu1 %1090 }
 0x224   : > { %v977_v27 = vpop.permute.xlu0 %976  ;;  %v1345_v2 = vsel %vm1337_vm6, %v1328_v37, %v1091_v60  ;;  %v1574_v60 = vmul.f32 %v3089_v54, %v3089_v54 }
 0x225   : > { %1516 = vst.msk [vmem:[%s2154_s19 + $0x8] sm:$0xff] %vm1252_vm1, %v1471_v53  ;;  %v1532_v15 = vsel %vm1252_vm1, %v1471_v53, 0.0  ;;  %v1571_v46 = vmul.f32 %v1471_v53, %v1471_v53  ;;  %v1318_v32 = vsel %vm1303_vm4, %v2912_v50, %v977_v27 }
 0x226   : > { %v1533_v42 = vadd.f32 %v1532_v15, %v1531_v51  ;;  %v1593_v29 = vsel %vm1252_vm1, %v1574_v60, 0.0 }
 0x227   : > { %v1587_v17 = vsel %vm1252_vm1, %v1571_v46, 0.0  ;;  %v1538_v46 = vsel %vm1252_vm1, %v3089_v54, 0.0 }
 0x228   : > { %v1588_v26 = vadd.f32 %v1587_v17, %v1586_v6 }
 0x22a   : > { %v1107_v3 = vpop.permute.xlu2 %1106 }
 0x22b   : > { %v1155_v10 = vpop.permute.xlu1 %1154 }
 0x22c   : > { %v1041_v7 = vpop.permute.xlu0 %1040  ;;  %v1362_v11 = vsel %vm1354_vm7, %v1345_v2, %v1155_v10 }
 0x22d   : > { %v1335_v48 = vsel %vm1320_vm5, %v1318_v32, %v1041_v7 }
 0x232   : > { %v1491_v24 = vpop.f32.mrf.mxu2 }
 0x233   : > { %v3115_v41 = vadd.f32 %v3063_v58, %v1491_v24  ;;  %v1219_v4 = vpop.permute.xlu1 %1218 }
 0x234   : > { %v1105_v18 = vpop.permute.xlu0 %1104  ;;  %v1379_v16 = vsel %vm1371_vm8, %v1362_v11, %v1219_v4 }
 0x235   : > { %1523 = vst.msk [vmem:[%s2154_s19 + $0x40] sm:$0xff] %vm1252_vm1, %v3115_v41  ;;  %1929 = vmatmul.msk.f32.gmra.mxu1 %vm1401_vm9, %v1379_v16  ;;  %v1352_v62 = vsel %vm1337_vm6, %v1335_v48, %v1105_v18  ;;  %v1578_v56 = vmul.f32 %v3115_v41, %v3115_v41 }
 0x23b   : > { %v1227_v28 = vpop.permute.xlu1 %1226 }
 0x23c   : > { %v1169_v31 = vpop.permute.xlu0 %1168  ;;  %v1383_v14 = vsel %vm1371_vm8, %v1366_v19, %v1227_v28 }
 0x23d   : > { %v1369_v57 = vsel %vm1354_vm7, %v1352_v62, %v1169_v31  ;;  %1933 = vmatmul.msk.f32.gmra.mxu2 %vm1401_vm9, %v1383_v14  ;;  %v1546_v62 = vsel %vm1252_vm1, %v3115_v41, 0.0 }
 0x23e   : > { %v1386_v21 = vsel %vm1371_vm8, %v1369_v57, %v1233_v45 }
 0x23f   : > { %1936 = vmatmul.msk.f32.gmra.mxu3 %vm1401_vm9, %v1386_v21 }
 0x243   : > { %v1043_v50 = vpop.permute.xlu1 %1042 }
 0x244   : > { %v979_v59 = vpop.permute.xlu0 %978 }
 0x245   : > { %v1319_v5 = vsel %vm1303_vm4, %v2845_v35, %v979_v59 }
 0x246   : > { %v1336_v22 = vsel %vm1320_vm5, %v1319_v5, %v1043_v50  ;;  %v1601_v50 = vsel %vm1252_vm1, %v1578_v56, 0.0 }
 0x247   : > { %v1353_v49 = vsel %vm1337_vm6, %v1336_v22, %v1107_v3 }
 0x24b   : > { %v1482_v34 = vpop.f32.mrf.mxu1  ;;  %v1235_v0 = vpop.permute.xlu1 %1234 }
 0x24c   : > { %v1171_v47 = vpop.permute.xlu0 %1170  ;;  %v1483_v44 = vadd.f32 %v3063_v58, %v1482_v34 }
 0x24d   : > { %v1370_v36 = vsel %vm1354_vm7, %v1353_v49, %v1171_v47 }
 0x24e   : > { %1520 = vst.msk [vmem:[%s2154_s19 + $0x28] sm:$0xff] %vm1252_vm1, %v1483_v44  ;;  %v1387_v13 = vsel %vm1371_vm8, %v1370_v36, %v1235_v0  ;;  %v1540_v10 = vsel %vm1252_vm1, %v1483_v44, 0.0 }
 0x24f   : > { %1937 = vmatmul.msk.f32.gmra.mxu3 %vm1401_vm9, %v1387_v13 }
 0x252   : > { %v1473_v35 = vpop.f32.mrf.mxu0 }
 0x253   : > { %v1474_v43 = vadd.f32 %v3063_v58, %v1473_v35 }
 0x255   : > { %1517 = vst.msk [vmem:[%s2154_s19 + $0x10] sm:$0xff] %vm1252_vm1, %v1474_v43  ;;  %v1534_v63 = vsel %vm1252_vm1, %v1474_v43, 0.0  ;;  %v1572_v1 = vmul.f32 %v1474_v43, %v1474_v43 }
 0x256   : > { %v1535_v52 = vadd.f32 %v1534_v63, %v1533_v42  ;;  %v1575_v42 = vmul.f32 %v1483_v44, %v1483_v44 }
 0x257   : > { %v1589_v9 = vsel %vm1252_vm1, %v1572_v1, 0.0 }
 0x258   : > { %v1590_v20 = vadd.f32 %v1589_v9, %v1588_v26  ;;  %v1595_v37 = vsel %vm1252_vm1, %v1575_v42, 0.0 }
 0x262   : > { %v1494_v23 = vpop.f32.mrf.mxu2 }
 0x263   : > { %v1495_v55 = vadd.f32 %v3063_v58, %v1494_v23 }
 0x265   : > { %1524 = vst.msk [vmem:[%s2154_s19 + $0x48] sm:$0xff] %vm1252_vm1, %v1495_v55  ;;  %v1579_v31 = vmul.f32 %v1495_v55, %v1495_v55  ;;  %v1548_v59 = vsel %vm1252_vm1, %v1495_v55, 0.0 }
 0x267   : > { %v1603_v3 = vsel %vm1252_vm1, %v1579_v31, 0.0 }
 0x269   : > { %v1503_v12 = vpop.f32.mrf.mxu3 }
 0x26a   : > { %v3155_v33 = vadd.f32 %v3063_v58, %v1503_v12 }
 0x26c   : > { %1527 = vst.msk [vmem:[%s2154_s19 + $0x60] sm:$0xff] %vm1252_vm1, %v3155_v33  ;;  %v1582_v44 = vmul.f32 %v3155_v33, %v3155_v33 }
 0x28a   : > { %v1485_v25 = vpop.f32.mrf.mxu1 }
 0x28b   : > { %v1476_v38 = vpop.f32.mrf.mxu0  ;;  %v1486_v39 = vadd.f32 %v3063_v58, %v1485_v25  ;;  %v1609_v25 = vsel %vm1252_vm1, %v1582_v44, 0.0 }
 0x28c   : > { %v1477_v53 = vadd.f32 %v3063_v58, %v1476_v38 }
 0x28d   : > { %1521 = vst.msk [vmem:[%s2154_s19 + $0x30] sm:$0xff] %vm1252_vm1, %v1486_v39  ;;  %v1576_v4 = vmul.f32 %v1486_v39, %v1486_v39  ;;  %v1542_v16 = vsel %vm1252_vm1, %v1486_v39, 0.0 }
 0x28e   : > { %1518 = vst.msk [vmem:[%s2154_s19 + $0x18] sm:$0xff] %vm1252_vm1, %v1477_v53  ;;  %v1536_v27 = vsel %vm1252_vm1, %v1477_v53, 0.0  ;;  %v1573_v51 = vmul.f32 %v1477_v53, %v1477_v53 }
 0x28f   : > { %v1537_v15 = vadd.f32 %v1536_v27, %v1535_v52  ;;  %v1597_v32 = vsel %vm1252_vm1, %v1576_v4, 0.0 }
 0x290   : > { %v1591_v6 = vsel %vm1252_vm1, %v1573_v51, 0.0 }
 0x291   : > { %v1539_v17 = vadd.f32 %v1538_v46, %v1537_v15  ;;  %v1592_v26 = vadd.f32 %v1591_v6, %v1590_v20  ;;  %v1554_v20 = vsel %vm1252_vm1, %v3155_v33, 0.0 }
 0x293   : > { %v1594_v7 = vadd.f32 %v1593_v29, %v1592_v26  ;;  %v1541_v40 = vadd.f32 %v1540_v10, %v1539_v17 }
 0x295   : > { %v1596_v2 = vadd.f32 %v1595_v37, %v1594_v7  ;;  %v1543_v30 = vadd.f32 %v1542_v16, %v1541_v40 }
 0x297   : > { %v1598_v28 = vadd.f32 %v1597_v32, %v1596_v2 }
 0x298   : > { %v1497_v24 = vpop.f32.mrf.mxu2 }
 0x299   : > { %v1498_v8 = vadd.f32 %v3063_v58, %v1497_v24 }
 0x29a   : > { %v1506_v54 = vpop.f32.mrf.mxu3 }
 0x29b   : > { %1525 = vst.msk [vmem:[%s2154_s19 + $0x50] sm:$0xff] %vm1252_vm1, %v1498_v8  ;;  %v1507_v11 = vadd.f32 %v3063_v58, %v1506_v54  ;;  %v1580_v0 = vmul.f32 %v1498_v8, %v1498_v8  ;;  %v1550_v41 = vsel %vm1252_vm1, %v1498_v8, 0.0 }
 0x29d   : > { %1528 = vst.msk [vmem:[%s2154_s19 + $0x68] sm:$0xff] %vm1252_vm1, %v1507_v11  ;;  %v1605_v35 = vsel %vm1252_vm1, %v1580_v0, 0.0  ;;  %v1583_v39 = vmul.f32 %v1507_v11, %v1507_v11  ;;  %v1556_v53 = vsel %vm1252_vm1, %v1507_v11, 0.0 }
 0x29f   : > { %v1611_v27 = vsel %vm1252_vm1, %v1583_v39, 0.0 }
 0x2b2   : > { %v1488_v18 = vpop.f32.mrf.mxu1 }
 0x2b3   : > { %v1489_v61 = vadd.f32 %v3063_v58, %v1488_v18 }
 0x2b5   : > { %1522 = vst.msk [vmem:[%s2154_s19 + $0x38] sm:$0xff] %vm1252_vm1, %v1489_v61  ;;  %v1544_v19 = vsel %vm1252_vm1, %v1489_v61, 0.0  ;;  %v1577_v48 = vmul.f32 %v1489_v61, %v1489_v61 }
 0x2b6   : > { %v1545_v45 = vadd.f32 %v1544_v19, %v1543_v30 }
 0x2b7   : > { %v1599_v14 = vsel %vm1252_vm1, %v1577_v48, 0.0 }
 0x2b8   : > { %v1547_v57 = vadd.f32 %v1546_v62, %v1545_v45  ;;  %v1600_v21 = vadd.f32 %v1599_v14, %v1598_v28 }
 0x2ba   : > { %v1602_v5 = vadd.f32 %v1601_v50, %v1600_v21  ;;  %v1549_v22 = vadd.f32 %v1548_v59, %v1547_v57 }
 0x2bc   : > { %v1604_v34 = vadd.f32 %v1603_v3, %v1602_v5  ;;  %v1551_v36 = vadd.f32 %v1550_v41, %v1549_v22 }
 0x2be   : > { %v1606_v9 = vadd.f32 %v1605_v35, %v1604_v34 }
 0x2c0   : > { %v1500_v49 = vpop.f32.mrf.mxu2 }
 0x2c1   : > { %v1501_v47 = vadd.f32 %v3063_v58, %v1500_v49 }
 0x2c2   : > { %v1509_v13 = vpop.f32.mrf.mxu3 }
 0x2c3   : > { %1526 = vst.msk [vmem:[%s2154_s19 + $0x58] sm:$0xff] %vm1252_vm1, %v1501_v47  ;;  %v1552_v43 = vsel %vm1252_vm1, %v1501_v47, 0.0  ;;  %v1581_v63 = vmul.f32 %v1501_v47, %v1501_v47  ;;  %v1510_v1 = vadd.f32 %v3063_v58, %v1509_v13 }
 0x2c4   : > { %v1553_v52 = vadd.f32 %v1552_v43, %v1551_v36 }
 0x2c5   : > { %v1607_v23 = vsel %vm1252_vm1, %v1581_v63, 0.0  ;;  %1529 = vst.msk [vmem:[%s2154_s19 + $0x70] sm:$0xff] %vm1252_vm1, %v1510_v1  ;;  %v1584_v51 = vmul.f32 %v1510_v1, %v1510_v1  ;;  %v1558_v33 = vsel %vm1252_vm1, %v1510_v1, 0.0 }
 0x2c6   : > { %v1555_v55 = vadd.f32 %v1554_v20, %v1553_v52  ;;  %v1608_v12 = vadd.f32 %v1607_v23, %v1606_v9 }
 0x2c7   : > { %v1613_v17 = vsel %vm1252_vm1, %v1584_v51, 0.0 }
 0x2c8   : > { %v1610_v38 = vadd.f32 %v1609_v25, %v1608_v12  ;;  %v1557_v60 = vadd.f32 %v1556_v53, %v1555_v55 }
 0x2ca   : > { %v1612_v15 = vadd.f32 %v1611_v27, %v1610_v38  ;;  %v1559_v6 = vadd.f32 %v1558_v33, %v1557_v60 }
 0x2cc   : > { %v1614_v10 = vadd.f32 %v1613_v17, %v1612_v15 }
 0x2d2   : > { %v1512_v46 = vpop.f32.mrf.mxu3 }
 0x2d3   : > { %v1513_v42 = vadd.f32 %v3063_v58, %v1512_v46 }
 0x2d5   : > { %1530 = vst.msk [vmem:[%s2154_s19 + $0x78] sm:$0xff] %vm1252_vm1, %v1513_v42  ;;  %v1560_v26 = vsel %vm1252_vm1, %v1513_v42, 0.0  ;;  %v1585_v29 = vmul.f32 %v1513_v42, %v1513_v42 }
 0x2d6   : > { %v1561_v7 = vadd.f32 %v1560_v26, %v1559_v6 }
 0x2d7   : > { %v1615_v40 = vsel %vm1252_vm1, %v1585_v29, 0.0 }
 0x2d8   : > { %v1562_v37 = vrot.slane %v1561_v7, 4  ;;  %v1616_v2 = vadd.f32 %v1615_v40, %v1614_v10 }
 0x2da   : > { %v1563_v24 = vadd.f32 %v1562_v37, %v1561_v7  ;;  %v1617_v8 = vrot.slane %v1616_v2, 4 }
 0x2dc   : > { %v1564_v54 = vrot.slane %v1563_v24, 2  ;;  %v1618_v58 = vadd.f32 %v1617_v8, %v1616_v2 }
 0x2de   : > { %v1565_v11 = vadd.f32 %v1564_v54, %v1563_v24  ;;  %v1619_v4 = vrot.slane %v1618_v58, 2 }
 0x2e0   : > { %v1566_v18 = vrot.slane %v1565_v11, 1  ;;  %v1620_v16 = vadd.f32 %v1619_v4, %v1618_v58 }
 0x2e2   : > { %v1567_v61 = vadd.f32 %v1566_v18, %v1565_v11  ;;  %v1621_v30 = vrot.slane %v1620_v16, 1 }
 0x2e4   : > { %1569 = vst.msk [vmem:[%s333_s11] sm:$0x1] %vm1568_vm10, %v1567_v61  ;;  %v1622_v56 = vadd.f32 %v1621_v30, %v1620_v16 }
 0x2e6   : > { %1623 = vst.msk [vmem:[%s340_s8] sm:$0x1] %vm1568_vm10, %v1622_v56 }
 0x2e7 PF: > { %s18_s28 = sadd.s32 1, %s2061_s28   ;;  %s3253_s9 = sld [smem:[#allocation3_spill]] }
 0x2e8   : > { %p15_p9 = scmp.ge.s32.totalorder %s18_s28, 6   ;;  %s3254_s24 = smov %s2053_s26 }
 0x2e9   : > { %s3255_s25 = smov %s2057_s27  ;;  %s3256_s26 = smov %s3259_s29 }
 0x2ea   :  { %17 = sbr.rel (!%p15_p9) target bundleno = 3 (0x3), region = 102 }
 0x2ed   : > { %s3257_s27 = smov %s3253_s9 }

</bundles_post_ra>
